<compile_context>
chip_gen: v7x
topology: tpu7x:2x2x1
jax: 0.10.0
libtpu: 0.0.40
codegen_flags: <defaults>
</compile_context>

<pallas_src>
import jax
import jax.numpy as jnp
from jax.experimental import pallas as pl
from jax.experimental.pallas import tpu as pltpu

# Module hyper-parameters (SKI_length / ActionsCount are free constants in the
# reference source; hidden_dims / layers_cnt are the PyTorch defaults).
SKI_LENGTH = 32          # input_shape
ACTIONS_COUNT = 8        # num_actions
HIDDEN_DIMS = 256        # hidden_dims (PyTorch default)
LAYERS_CNT = 5           # layers_cnt -> 6 Linear layers total
NEG_SLOPE = 0.01         # nn.LeakyReLU default
N_HIDDEN = LAYERS_CNT - 1  # number of (H, H) hidden Linear layers = 4


def _leaky_relu(x):
    # max(x, a*x) == LeakyReLU for 0 < a < 1; 2 VALU ops/elem vs 3 for
    # cmp+mul+select.
    return jnp.maximum(x, NEG_SLOPE * x)


def dqn_mlp_kernel(x_ref, w0_ref, wh_ref, wout_ref, bh_ref, bout_ref, out_ref):
    """Fused 6-layer MLP forward on one (batch_tile, *) activation slab.

    x_ref   : (bt, 32)            bf16
    w0_ref  : (32, H)             bf16
    wh_ref  : (N_HIDDEN, H, H)    bf16   (stacked hidden weights)
    wout_ref: (H, 8)              bf16
    bh_ref  : (LAYERS_CNT, H)     f32    (biases of layers 0..4)
    bout_ref: (1, 8)              f32
    out_ref : (bt, 8)             f32
    """
    # Layer 0: (bt, 32) @ (32, 256), bf16 operands, f32 accumulate.
    h = jnp.dot(x_ref[...], w0_ref[...], preferred_element_type=jnp.float32)
    h = _leaky_relu(h + bh_ref[0:1, :])

    # Hidden layers 1..4: (bt, 256) @ (256, 256).
    for l in range(N_HIDDEN):
        h = jnp.dot(h.astype(jnp.bfloat16), wh_ref[l],
                    preferred_element_type=jnp.float32)
        h = _leaky_relu(h + bh_ref[l + 1:l + 2, :])

    # Output layer: (bt, 256) @ (256, 8).  MLP.forward applies the activation
    # after the last Linear too; output_activation is Identity.
    h = jnp.dot(h.astype(jnp.bfloat16), wout_ref[...],
                preferred_element_type=jnp.float32)
    h = _leaky_relu(h + bout_ref[...])

    out_ref[...] = h  # (bt, 8) f32 store (masked vst; no wasted writeback)


def dqn_forward(x, params, *, batch_tile=512):
    """x: (B, SKI_LENGTH) float32.  params: list of (W, b), W stored (in, out)."""
    B, d_in = x.shape
    H = params[0][0].shape[1]
    out_dim = params[-1][0].shape[1]

    # ---- pack / cast parameters (one-time, host side; no padding needed) ----
    w0 = params[0][0].astype(jnp.bfloat16)                             # (32, H)
    wh = jnp.stack([params[1 + l][0] for l in range(N_HIDDEN)]
                   ).astype(jnp.bfloat16)                              # (4, H, H)
    wout = params[-1][0].astype(jnp.bfloat16)                          # (H, 8)
    bh = jnp.stack([params[0][1]]
                   + [params[1 + l][1] for l in range(N_HIDDEN)])      # (5, H) f32
    bout = params[-1][1].reshape(1, out_dim).astype(jnp.float32)       # (1, 8)

    # ---- activations: just cast to bf16 (no feature padding) ----
    xb = x.astype(jnp.bfloat16)

    # Handle batch sizes not divisible by the tile by padding the batch.
    B_pad = -(-B // batch_tile) * batch_tile
    if B_pad != B:
        xb = jnp.pad(xb, ((0, B_pad - B), (0, 0)))
    grid = (B_pad // batch_tile,)

    # Advisory cost for XLA's scheduler (tiny, latency-dominated kernel).
    flops = 2 * B_pad * (d_in * H + N_HIDDEN * H * H + H * out_dim)
    bytes_accessed = (xb.size * 2 + w0.size * 2 + wh.size * 2 + wout.size * 2
                      + bh.size * 4 + bout.size * 4 + B_pad * out_dim * 4)

    # TODO(synk): weight/bias operands are grid-invariant; if the Mosaic dump
    # shows per-step re-DMA, mark them single-buffered (low priority, <1 MiB).
    out = pl.pallas_call(
        dqn_mlp_kernel,
        out_shape=jax.ShapeDtypeStruct((B_pad, out_dim), jnp.float32),
        grid_spec=pltpu.PrefetchScalarGridSpec(
            num_scalar_prefetch=0,
            grid=grid,
            in_specs=[
                pl.BlockSpec((batch_tile, d_in), lambda i: (i, 0)),
                pl.BlockSpec((d_in, H), lambda i: (0, 0)),
                pl.BlockSpec((N_HIDDEN, H, H), lambda i: (0, 0, 0)),
                pl.BlockSpec((H, out_dim), lambda i: (0, 0)),
                pl.BlockSpec((LAYERS_CNT, H), lambda i: (0, 0)),
                pl.BlockSpec((1, out_dim), lambda i: (0, 0)),
            ],
            out_specs=pl.BlockSpec((batch_tile, out_dim), lambda i: (i, 0)),
        ),
        compiler_params=pltpu.CompilerParams(
            dimension_semantics=("parallel",)),
        cost_estimate=pl.CostEstimate(flops=flops, transcendentals=0,
                                      bytes_accessed=bytes_accessed),
    )(xb, w0, wh, wout, bh, bout)

    return out[:B] if B_pad != B else out


def init_params(key, input_dims, hidden_dims, output_dims, layer_count):
    """Matches the MLP layer structure: Linear(in,h), (layer_count-1) x
    Linear(h,h), Linear(h,out); PyTorch-style U(-1/sqrt(fan_in), ...) init.
    Weights stored as (in, out) = transpose of PyTorch's (out, in)."""
    dims = [input_dims] + [hidden_dims] * layer_count + [output_dims]
    params = []
    for i in range(len(dims) - 1):
        key, kw, kb = jax.random.split(key, 3)
        bound = 1.0 / jnp.sqrt(dims[i])
        w = jax.random.uniform(kw, (dims[i], dims[i + 1]),
                               minval=-bound, maxval=bound, dtype=jnp.float32)
        b = jax.random.uniform(kb, (dims[i + 1],),
                               minval=-bound, maxval=bound, dtype=jnp.float32)
        params.append((w, b))
    return params


def reference_forward(x, params):
    """Pure-JAX reference with the same bf16-operand / f32-accumulate math."""
    h = x
    for (w, b) in params:
        h = jnp.dot(h.astype(jnp.bfloat16), w.astype(jnp.bfloat16),
                    preferred_element_type=jnp.float32) + b
        h = _leaky_relu(h)
    return h  # output_activation = Identity


# TODO(synk): DQN's replay buffer, MSE loss, epsilon-greedy sampling and Adam
# optimizer are host-side training utilities, not part of the forward pass.

if __name__ == "__main__":
    key = jax.random.PRNGKey(0)
    kx, kp = jax.random.split(key)

    B = 1024  # grid=2 at batch_tile=512: one tile per v7x TC, 2 steps on v5e/v6e
    x = jax.random.normal(kx, (B, SKI_LENGTH), dtype=jnp.float32)
    params = init_params(kp, SKI_LENGTH, HIDDEN_DIMS, ACTIONS_COUNT, LAYERS_CNT)

    out = jax.block_until_ready(dqn_forward(x, params, batch_tile=512))

    ref = reference_forward(x, params)
    assert out.shape == (B, ACTIONS_COUNT)
    assert jnp.allclose(out, ref, atol=2e-2, rtol=2e-2), "mismatch vs JAX reference"

    print("KERNEL_OK")
</pallas_src>

<mosaic_0001>
module attributes {stable_mosaic.version = 11 : i64} {
  func.func @dqn_mlp_kernel(%arg0: i32, %arg1: memref<512x32xbf16, #tpu.memory_space<vmem>>, %arg2: memref<32x256xbf16, #tpu.memory_space<vmem>>, %arg3: memref<4x256x256xbf16, #tpu.memory_space<vmem>>, %arg4: memref<256x8xbf16, #tpu.memory_space<vmem>>, %arg5: memref<5x256xf32, #tpu.memory_space<vmem>>, %arg6: memref<1x8xf32, #tpu.memory_space<vmem>>, %arg7: memref<512x8xf32, #tpu.memory_space<vmem>>) attributes {dimension_semantics = [#tpu.dimension_semantics<parallel>], iteration_bounds = array<i64: 2>, scalar_prefetch = 0 : i64, scratch_operands = 0 : i64, tpu.core_type = #tpu.core_type<tc>, window_params = [{transform_indices = @transform_0, window_bounds = array<i64: 512, 32>}, {pipeline_mode = #tpu.pipeline_mode<synchronous>, transform_indices = @transform_1, window_bounds = array<i64: 32, 256>}, {pipeline_mode = #tpu.pipeline_mode<synchronous>, transform_indices = @transform_2, window_bounds = array<i64: 4, 256, 256>}, {pipeline_mode = #tpu.pipeline_mode<synchronous>, transform_indices = @transform_3, window_bounds = array<i64: 256, 8>}, {pipeline_mode = #tpu.pipeline_mode<synchronous>, transform_indices = @transform_4, window_bounds = array<i64: 5, 256>}, {pipeline_mode = #tpu.pipeline_mode<synchronous>, transform_indices = @transform_5, window_bounds = array<i64: 1, 8>}, {transform_indices = @transform_6, window_bounds = array<i64: 512, 8>}]} {
    %c0 = arith.constant 0 : index
    %c0_0 = arith.constant 0 : index
    %0 = vector.load %arg1[%c0, %c0_0] : memref<512x32xbf16, #tpu.memory_space<vmem>>, vector<512x32xbf16>
    %c0_1 = arith.constant 0 : index
    %c0_2 = arith.constant 0 : index
    %1 = vector.load %arg2[%c0_1, %c0_2] : memref<32x256xbf16, #tpu.memory_space<vmem>>, vector<32x256xbf16>
    %cst = arith.constant dense<0.000000e+00> : vector<512x256xf32>
    %2 = tpu.matmul %0, %1, %cst {dimension_numbers = #tpu.dot_dimension_numbers<[1], [0], [0], [1], [0, 0, 1, 1], [], []>} : vector<512x32xbf16>, vector<32x256xbf16>, vector<512x256xf32> -> vector<512x256xf32>
    %c0_3 = arith.constant 0 : index
    %c0_4 = arith.constant 0 : index
    %3 = vector.load %arg5[%c0_3, %c0_4] : memref<5x256xf32, #tpu.memory_space<vmem>>, vector<1x256xf32>
    %4 = vector.broadcast %3 : vector<1x256xf32> to vector<512x256xf32>
    %5 = arith.addf %2, %4 : vector<512x256xf32>
    %cst_5 = arith.constant 0.00999999977 : f32
    %6 = vector.broadcast %cst_5 : f32 to vector<512x256xf32>
    %7 = arith.mulf %6, %5 : vector<512x256xf32>
    %8 = arith.maximumf %5, %7 : vector<512x256xf32>
    %9 = arith.truncf %8 : vector<512x256xf32> to vector<512x256xbf16>
    %c0_6 = arith.constant 0 : index
    %c0_7 = arith.constant 0 : index
    %c0_8 = arith.constant 0 : index
    %10 = vector.load %arg3[%c0_6, %c0_7, %c0_8] : memref<4x256x256xbf16, #tpu.memory_space<vmem>>, vector<1x256x256xbf16>
    %11 = vector.shape_cast %10 : vector<1x256x256xbf16> to vector<256x256xbf16>
    %cst_9 = arith.constant dense<0.000000e+00> : vector<512x256xf32>
    %12 = tpu.matmul %9, %11, %cst_9 {dimension_numbers = #tpu.dot_dimension_numbers<[1], [0], [0], [1], [0, 0, 1, 1], [], []>} : vector<512x256xbf16>, vector<256x256xbf16>, vector<512x256xf32> -> vector<512x256xf32>
    %c1 = arith.constant 1 : index
    %c0_10 = arith.constant 0 : index
    %13 = vector.load %arg5[%c1, %c0_10] : memref<5x256xf32, #tpu.memory_space<vmem>>, vector<1x256xf32>
    %14 = vector.broadcast %13 : vector<1x256xf32> to vector<512x256xf32>
    %15 = arith.addf %12, %14 : vector<512x256xf32>
    %cst_11 = arith.constant 0.00999999977 : f32
    %16 = vector.broadcast %cst_11 : f32 to vector<512x256xf32>
    %17 = arith.mulf %16, %15 : vector<512x256xf32>
    %18 = arith.maximumf %15, %17 : vector<512x256xf32>
    %19 = arith.truncf %18 : vector<512x256xf32> to vector<512x256xbf16>
    %c1_12 = arith.constant 1 : index
    %c0_13 = arith.constant 0 : index
    %c0_14 = arith.constant 0 : index
    %20 = vector.load %arg3[%c1_12, %c0_13, %c0_14] : memref<4x256x256xbf16, #tpu.memory_space<vmem>>, vector<1x256x256xbf16>
    %21 = vector.shape_cast %20 : vector<1x256x256xbf16> to vector<256x256xbf16>
    %cst_15 = arith.constant dense<0.000000e+00> : vector<512x256xf32>
    %22 = tpu.matmul %19, %21, %cst_15 {dimension_numbers = #tpu.dot_dimension_numbers<[1], [0], [0], [1], [0, 0, 1, 1], [], []>} : vector<512x256xbf16>, vector<256x256xbf16>, vector<512x256xf32> -> vector<512x256xf32>
    %c2 = arith.constant 2 : index
    %c0_16 = arith.constant 0 : index
    %23 = vector.load %arg5[%c2, %c0_16] : memref<5x256xf32, #tpu.memory_space<vmem>>, vector<1x256xf32>
    %24 = vector.broadcast %23 : vector<1x256xf32> to vector<512x256xf32>
    %25 = arith.addf %22, %24 : vector<512x256xf32>
    %cst_17 = arith.constant 0.00999999977 : f32
    %26 = vector.broadcast %cst_17 : f32 to vector<512x256xf32>
    %27 = arith.mulf %26, %25 : vector<512x256xf32>
    %28 = arith.maximumf %25, %27 : vector<512x256xf32>
    %29 = arith.truncf %28 : vector<512x256xf32> to vector<512x256xbf16>
    %c2_18 = arith.constant 2 : index
    %c0_19 = arith.constant 0 : index
    %c0_20 = arith.constant 0 : index
    %30 = vector.load %arg3[%c2_18, %c0_19, %c0_20] : memref<4x256x256xbf16, #tpu.memory_space<vmem>>, vector<1x256x256xbf16>
    %31 = vector.shape_cast %30 : vector<1x256x256xbf16> to vector<256x256xbf16>
    %cst_21 = arith.constant dense<0.000000e+00> : vector<512x256xf32>
    %32 = tpu.matmul %29, %31, %cst_21 {dimension_numbers = #tpu.dot_dimension_numbers<[1], [0], [0], [1], [0, 0, 1, 1], [], []>} : vector<512x256xbf16>, vector<256x256xbf16>, vector<512x256xf32> -> vector<512x256xf32>
    %c3 = arith.constant 3 : index
    %c0_22 = arith.constant 0 : index
    %33 = vector.load %arg5[%c3, %c0_22] : memref<5x256xf32, #tpu.memory_space<vmem>>, vector<1x256xf32>
    %34 = vector.broadcast %33 : vector<1x256xf32> to vector<512x256xf32>
    %35 = arith.addf %32, %34 : vector<512x256xf32>
    %cst_23 = arith.constant 0.00999999977 : f32
    %36 = vector.broadcast %cst_23 : f32 to vector<512x256xf32>
    %37 = arith.mulf %36, %35 : vector<512x256xf32>
    %38 = arith.maximumf %35, %37 : vector<512x256xf32>
    %39 = arith.truncf %38 : vector<512x256xf32> to vector<512x256xbf16>
    %c3_24 = arith.constant 3 : index
    %c0_25 = arith.constant 0 : index
    %c0_26 = arith.constant 0 : index
    %40 = vector.load %arg3[%c3_24, %c0_25, %c0_26] : memref<4x256x256xbf16, #tpu.memory_space<vmem>>, vector<1x256x256xbf16>
    %41 = vector.shape_cast %40 : vector<1x256x256xbf16> to vector<256x256xbf16>
    %cst_27 = arith.constant dense<0.000000e+00> : vector<512x256xf32>
    %42 = tpu.matmul %39, %41, %cst_27 {dimension_numbers = #tpu.dot_dimension_numbers<[1], [0], [0], [1], [0, 0, 1, 1], [], []>} : vector<512x256xbf16>, vector<256x256xbf16>, vector<512x256xf32> -> vector<512x256xf32>
    %c4 = arith.constant 4 : index
    %c0_28 = arith.constant 0 : index
    %43 = vector.load %arg5[%c4, %c0_28] : memref<5x256xf32, #tpu.memory_space<vmem>>, vector<1x256xf32>
    %44 = vector.broadcast %43 : vector<1x256xf32> to vector<512x256xf32>
    %45 = arith.addf %42, %44 : vector<512x256xf32>
    %cst_29 = arith.constant 0.00999999977 : f32
    %46 = vector.broadcast %cst_29 : f32 to vector<512x256xf32>
    %47 = arith.mulf %46, %45 : vector<512x256xf32>
    %48 = arith.maximumf %45, %47 : vector<512x256xf32>
    %49 = arith.truncf %48 : vector<512x256xf32> to vector<512x256xbf16>
    %c0_30 = arith.constant 0 : index
    %c0_31 = arith.constant 0 : index
    %50 = vector.load %arg4[%c0_30, %c0_31] : memref<256x8xbf16, #tpu.memory_space<vmem>>, vector<256x8xbf16>
    %cst_32 = arith.constant dense<0.000000e+00> : vector<512x8xf32>
    %51 = tpu.matmul %49, %50, %cst_32 {dimension_numbers = #tpu.dot_dimension_numbers<[1], [0], [0], [1], [0, 0, 1, 1], [], []>} : vector<512x256xbf16>, vector<256x8xbf16>, vector<512x8xf32> -> vector<512x8xf32>
    %c0_33 = arith.constant 0 : index
    %c0_34 = arith.constant 0 : index
    %52 = vector.load %arg6[%c0_33, %c0_34] : memref<1x8xf32, #tpu.memory_space<vmem>>, vector<1x8xf32>
    %53 = vector.broadcast %52 : vector<1x8xf32> to vector<512x8xf32>
    %54 = arith.addf %51, %53 : vector<512x8xf32>
    %cst_35 = arith.constant 0.00999999977 : f32
    %55 = vector.broadcast %cst_35 : f32 to vector<512x8xf32>
    %56 = arith.mulf %55, %54 : vector<512x8xf32>
    %57 = arith.maximumf %54, %56 : vector<512x8xf32>
    %c0_36 = arith.constant 0 : index
    %c0_37 = arith.constant 0 : index
    %58 = vector.load %arg7[%c0_36, %c0_37] : memref<512x8xf32, #tpu.memory_space<vmem>>, vector<512x8xf32>
    tpu.vector_store %arg7[%c0_36, %c0_37], %57 {strides = array<i32>} : memref<512x8xf32, #tpu.memory_space<vmem>>, vector<512x8xf32>,
    return
  }
  func.func @transform_0(%arg0: i32) -> (i32, i32) {
    %c0_i32 = arith.constant 0 : i32
    %c0_i32_0 = arith.constant 0 : i32
    return %arg0, %c0_i32 : i32, i32
  }
  func.func @transform_1(%arg0: i32) -> (i32, i32) {
    %c0_i32 = arith.constant 0 : i32
    %c0_i32_0 = arith.constant 0 : i32
    %c0_i32_1 = arith.constant 0 : i32
    return %c0_i32, %c0_i32_0 : i32, i32
  }
  func.func @transform_2(%arg0: i32) -> (i32, i32, i32) {
    %c0_i32 = arith.constant 0 : i32
    %c0_i32_0 = arith.constant 0 : i32
    %c0_i32_1 = arith.constant 0 : i32
    %c0_i32_2 = arith.constant 0 : i32
    return %c0_i32, %c0_i32_0, %c0_i32_1 : i32, i32, i32
  }
  func.func @transform_3(%arg0: i32) -> (i32, i32) {
    %c0_i32 = arith.constant 0 : i32
    %c0_i32_0 = arith.constant 0 : i32
    %c0_i32_1 = arith.constant 0 : i32
    return %c0_i32, %c0_i32_0 : i32, i32
  }
  func.func @transform_4(%arg0: i32) -> (i32, i32) {
    %c0_i32 = arith.constant 0 : i32
    %c0_i32_0 = arith.constant 0 : i32
    %c0_i32_1 = arith.constant 0 : i32
    return %c0_i32, %c0_i32_0 : i32, i32
  }
  func.func @transform_5(%arg0: i32) -> (i32, i32) {
    %c0_i32 = arith.constant 0 : i32
    %c0_i32_0 = arith.constant 0 : i32
    %c0_i32_1 = arith.constant 0 : i32
    return %c0_i32, %c0_i32_0 : i32, i32
  }
  func.func @transform_6(%arg0: i32) -> (i32, i32) {
    %c0_i32 = arith.constant 0 : i32
    %c0_i32_0 = arith.constant 0 : i32
    return %arg0, %c0_i32 : i32, i32
  }
}

</mosaic_0001>

<bundles_post_ra>
// kernel: tpu_custom_call.1
= control target key start
LH: loop header
LB: loop body
LE: loop exit
PB: predicated region body
PF: predicated region fallthrough
CT: control target
= control target key end

     0   :  { %11 = vsyncpa [#allocation3], 0  ;;  %s6110_s21 = smov 0   ;;  %s7309_s0 = inlined_call_operand.vmem [shape: bf16[1024,32], index: 0, kind: input, shape index: {}]   ;;  %s7310_s1 = inlined_call_operand.vmem [shape: bf16[32,256], index: 1, kind: input, shape index: {}]   ;;  %s7311_s2 = inlined_call_operand.hbm [shape: bf16[4,256,256], index: 2, kind: input, shape index: {}]   ;;  %s7312_s3 = inlined_call_operand.vmem [shape: bf16[256,8], index: 3, kind: input, shape index: {}]   ;;  %s7313_s4 = inlined_call_operand.vmem [shape: f32[5,256], index: 4, kind: input, shape index: {}]   ;;  %s7314_s5 = inlined_call_operand.vmem [shape: f32[1,8], index: 5, kind: input, shape index: {}]   ;;  %s7315_s6 = inlined_call_operand.vmem [shape: f32[1024,8], index: 6, kind: output, shape index: {}]  }
   0x1 LB: > { %s5501_s22 = sadd.s32 4294967295, %s6069_s21   ;;  %p5503_p0 = scmp.ge.s32.totalorder %s6069_s21, 1  ;;  %s6069_s21 = sphi %s6110_s21, %s17_s21  }
   0x2   : > { %p179_p1 = scmp.lt.s32.totalorder %s6069_s21, 3  ;;  %s6071_s23 = smov [#allocation2]  }
   0x3   : > { %s194_s24 = sshll.u32 %s6071_s23, 4  ;;  %p6124_p3 = scmp.eq.s32.totalorder %s5501_s22, 0  ;;  %s195_s24 = int_to_ptr.vmem [resolvable:$true] %s194_s24 }
   0x4   : > { %p6118_p2 = pnand %p5503_p0, %p179_p1  ;;  %s6031_s30 = scalar_lea.hbm %s7311_s2, 16384 }
   0x5   : > { %s7320_s26 = scalar_select %p6124_p3, 1, 0 }
   0x6   : > { %s7319_s25 = scalar_select %p6118_p2, 1, 0 }
   0x7   : > { %p5767_p4 = pneg %p6118_p2  ;;  %p6032_p6 = scmp.ne.s32.totalorder %s7311_s2, %s6031_s30 }
   0x8   : > { %p6038_p10 = scmp.lt.u32.totalorder %s6031_s30, %s7311_s2 }
   0x9   : > { %p6132_p5 = pnand %p6124_p3, %p5767_p4 }
   0xb   : > { %p6033_p7 = pneg %p6132_p5 }
   0xd   : > { %p6034_p8 = pnand %p6033_p7, %p6032_p6 }
   0xf   : > { %p6035_p9 = pneg %p6034_p8 }
  0x11   : > { %p6040_p11 = pnand %p6038_p10, %p6035_p9 }
  0x13   : > { %6043 = shalt.err (!%p6040_p11)
}
  0x14   : > { %s6044_s11 = scalar_lea.vmem %s195_s24, 16384  ;;  %p6052_p1 = scmp.lt.s32.totalorder %s195_s24, %s195_s24 }
  0x15   : > { %p6045_p12 = scmp.ne.s32.totalorder %s195_s24, %s6044_s11  ;;  %p6053_p4 = scmp.lt.s32.totalorder %s6044_s11, %s6044_s11 }
  0x17   : > { %p6047_p13 = pnand %p6045_p12, %p6033_p7  ;;  %p6054_p3 = por %p6053_p4, %p6052_p1 }
  0x19   : > { %p6048_p0 = pneg %p6047_p13 }
  0x1b   : > { %p6055_p2 = pnand %p6054_p3, %p6048_p0 }
  0x1d   : > { %6058 = shalt.err (!%p6055_p2)
}
  0x1e   : > { %s6072_s12 = smov 128   ;;  %s6073_s13 = smov 8  }
  0x1f   : > { %5770 = dma.hbm_to_vmem [thread:$0]  (!%p6132_p5), %s7311_s2, 16384, %s195_s24, [#allocation3], %s6072_s12, %s6072_s12, %s6073_s13  }
  0x20   : > { %p7322_p6 = scmp.ne.s32.totalorder %s7319_s25, 0 }
  0x21   : > { %p7323_p8 = scmp.ne.s32.totalorder (!%p7322_p6), %s7320_s26, 0 }
  0x22   : > { %228 = sbr.rel (%p7322_p6) target bundleno = 1640 (0x668), region = 44 }
  0x29   : > { %6064 = dma.done.wait (%p7323_p8), [#allocation3], 16384  }
  0x2a   : > { %6066 = vsyncadd (%p7323_p8), [#allocation3], 4294950912  ;;  %s5508_s16 = sshll.u32 %s5501_s22, 6  ;;  %v6074_v0 = vmov 0   ;;  %v5785_v1 = vld [vmem:[%s7310_s1 + $0x4] ss:$8 sps:$4 sm:$0xff]  }
  0x2b   : > { %660 = vmatprep.mubr.bf16.mxu0 %v6074_v0  ;;  %p259_p2 = scmp.lt.s32.totalorder %s5508_s16, 127  ;;  %v5787_v2 = vld [vmem:[%s7310_s1] ss:$8 sps:$4 sm:$0xff]   ;;  %628 = vmatprep.subr.bf16.mxu0 %v5785_v1  ;;  %v5788_v3 = vld [vmem:[%s7310_s1 + $0x14] ss:$8 sps:$4 sm:$0xff]   ;;  %vm531_vm0 = vcmask 261120  }
  0x2c   : > { %629 = vmatpush1.bf16.msra.mxu0 %v5787_v2  ;;  %v5790_v4 = vld [vmem:[%s7310_s1 + $0x10] ss:$8 sps:$4 sm:$0xff]   ;;  %v5812_v10 = vld [vmem:[#allocation2 + $0x4] ss:$8 sps:$4 sm:$0xff]   ;;  %v5814_v11 = vld [vmem:[#allocation2] ss:$8 sps:$4 sm:$0xff]  }
  0x2d   : > { %s7325_s16 = smov (!%p259_p2, %s5508_s16), 127  ;;  %630 = vmatprep.subr.bf16.mxu0 %v5788_v3  ;;  %1506 = vmatprep.subr.bf16.mxu1 %v5812_v10  ;;  %v5815_v12 = vld [vmem:[#allocation2 + $0x14] ss:$8 sps:$4 sm:$0xff]   ;;  %v5817_v13 = vld [vmem:[#allocation2 + $0x10] ss:$8 sps:$4 sm:$0xff]   ;;  %vm5368_vm1 = vcmask 64512  }
  0x2e   : > { %s5509_s17 = sshll.u32 %s7325_s16, 2  ;;  %1507 = vmatpush1.bf16.msra.mxu1 %v5814_v11  ;;  %v5819_v15 = vld [vmem:[#allocation2 + $0x24] ss:$8 sps:$4 sm:$0xff]   ;;  %v5821_v16 = vld [vmem:[#allocation2 + $0x20] ss:$8 sps:$4 sm:$0xff]   ;;  %s5511_s30 = sshll.u32 %s7325_s16, 3 }
  0x2f   : > { %s6173_s22 = scalar_lea.vmem %s7309_s0, %s5509_s17  ;;  %1508 = vmatprep.subr.bf16.mxu1 %v5815_v12  ;;  %v5822_v17 = vld [vmem:[#allocation2 + $0x34] ss:$8 sps:$4 sm:$0xff]   ;;  %v5824_v18 = vld [vmem:[#allocation2 + $0x30] ss:$8 sps:$4 sm:$0xff]   ;;  %v5826_v20 = vld [vmem:[#allocation2 + $0x44] ss:$8 sps:$4 sm:$0xff]   ;;  %s7113_s16 = scalar_lea.vmem %s7315_s6, %s5511_s30 }
  0x30   : > { %v5791_v5 = vld [vmem:[%s6173_s22] sm:$0xff]   ;;  %631 = vmatpush1.bf16.msra.mxu0 %v5790_v4  ;;  %v5792_v6 = vld [vmem:[%s6173_s22 + $0x8] sm:$0xff]   ;;  %v5793_v7 = vld [vmem:[%s6173_s22 + $0x10] sm:$0xff]  }
  0x31   : > { %v5794_v8 = vld [vmem:[%s6173_s22 + $0x18] sm:$0xff]   ;;  %v5795_v9 = vld [vmem:[%s6173_s22 + $0x20] sm:$0xff]   ;;  %v5796_v14 = vld [vmem:[%s6173_s22 + $0x28] sm:$0xff]  }
  0x32   : > { %1509 = vmatpush1.bf16.msra.mxu1 %v5817_v13  ;;  %v5797_v19 = vld [vmem:[%s6173_s22 + $0x30] sm:$0xff]   ;;  %v5828_v21 = vld [vmem:[#allocation2 + $0x40] ss:$8 sps:$4 sm:$0xff]   ;;  %v5798_v24 = vld [vmem:[%s6173_s22 + $0x38] sm:$0xff]  }
  0x33   : > { %5548 = vmatmul.mubr.msk.bf16.vlgmr.msra.gmra.mrb[0].mxu0 %vm531_vm0, %v5791_v5  ;;  %1510 = vmatprep.subr.bf16.mxu1 %v5819_v15  ;;  %v5829_v22 = vld [vmem:[#allocation2 + $0x54] ss:$8 sps:$4 sm:$0xff]   ;;  %v5831_v23 = vld [vmem:[#allocation2 + $0x50] ss:$8 sps:$4 sm:$0xff]   ;;  %v5833_v25 = vld [vmem:[#allocation2 + $0x64] ss:$8 sps:$4 sm:$0xff]  }
  0x34   : > { %670 = vmatprep.mubr.bf16.mxu0 %v6074_v0  ;;  %v5835_v26 = vld [vmem:[#allocation2 + $0x60] ss:$8 sps:$4 sm:$0xff]   ;;  %v5836_v27 = vld [vmem:[#allocation2 + $0x74] ss:$8 sps:$4 sm:$0xff]   ;;  %v5838_v28 = vld [vmem:[#allocation2 + $0x70] ss:$8 sps:$4 sm:$0xff]  }
  0x35   : > { %v5839_v29 = vld [vmem:[#allocation2 + $0x100] ss:$8 sps:$4 sm:$0xff]   ;;  %v5841_v30 = vld [vmem:[#allocation2 + $0x104] ss:$8 sps:$4 sm:$0xff]   ;;  %v5846_v34 = vld [vmem:[#allocation2 + $0x94] ss:$8 sps:$4 sm:$0xff]  }
  0x36   : > { %1511 = vmatpush1.bf16.msra.mxu1 %v5821_v16  ;;  %v5799_v31 = vld [vmem:[%s6173_s22 + $0x40] sm:$0xff]   ;;  %2385 = vmatprep.subr.bf16.mxu0 %v5841_v30  ;;  %v5848_v35 = vld [vmem:[#allocation2 + $0x90] ss:$8 sps:$4 sm:$0xff]   ;;  %v5800_v36 = vld [vmem:[%s6173_s22 + $0x48] sm:$0xff]  }
  0x37   : > { %1512 = vmatprep.subr.bf16.mxu1 %v5822_v17  ;;  %2386 = vmatpush1.bf16.msra.mxu0 %v5839_v29  ;;  %v5843_v32 = vld [vmem:[#allocation2 + $0x84] ss:$8 sps:$4 sm:$0xff]   ;;  %v5845_v33 = vld [vmem:[#allocation2 + $0x80] ss:$8 sps:$4 sm:$0xff]   ;;  %v5853_v39 = vld [vmem:[#allocation2 + $0xb4] ss:$8 sps:$4 sm:$0xff]  }
  0x38   : > { %v5850_v37 = vld [vmem:[#allocation2 + $0xa4] ss:$8 sps:$4 sm:$0xff]   ;;  %v5852_v38 = vld [vmem:[#allocation2 + $0xa0] ss:$8 sps:$4 sm:$0xff]   ;;  %v5855_v40 = vld [vmem:[#allocation2 + $0xb0] ss:$8 sps:$4 sm:$0xff]  }
  0x39   : > { %v5856_v41 = vld [vmem:[#allocation2 + $0x110] ss:$8 sps:$4 sm:$0xff]   ;;  %v5858_v42 = vld [vmem:[#allocation2 + $0x114] ss:$8 sps:$4 sm:$0xff]   ;;  %v5860_v44 = vld [vmem:[#allocation2 + $0xc4] ss:$8 sps:$4 sm:$0xff]  }
  0x3a   : > { %1513 = vmatpush1.bf16.msra.mxu1 %v5824_v18  ;;  %v5801_v43 = vld [vmem:[%s6173_s22 + $0x50] sm:$0xff]   ;;  %2387 = vmatprep.subr.bf16.mxu0 %v5858_v42  ;;  %v5862_v45 = vld [vmem:[#allocation2 + $0xc0] ss:$8 sps:$4 sm:$0xff]   ;;  %v5802_v46 = vld [vmem:[%s6173_s22 + $0x58] sm:$0xff]   ;;  %v341_v18 = vlaneseq }
  0x3b   : > { %5549 = vmatmul.mubr.msk.bf16.gmra.mrb[4].mxu0 %vm531_vm0, %v5792_v6  ;;  %1514 = vmatprep.subr.bf16.mxu1 %v5826_v20  ;;  %v5863_v47 = vld [vmem:[#allocation2 + $0xd4] ss:$8 sps:$4 sm:$0xff]   ;;  %v5865_v48 = vld [vmem:[#allocation2 + $0xd0] ss:$8 sps:$4 sm:$0xff]   ;;  %v5867_v49 = vld [vmem:[#allocation2 + $0xe4] ss:$8 sps:$4 sm:$0xff]  }
  0x3c   : > { %680 = vmatprep.mubr.bf16.mxu0 %v6074_v0  ;;  %2388 = vmatpush1.bf16.msra.mxu0 %v5856_v41  ;;  %v5869_v50 = vld [vmem:[#allocation2 + $0xe0] ss:$8 sps:$4 sm:$0xff]   ;;  %v5870_v51 = vld [vmem:[#allocation2 + $0xf4] ss:$8 sps:$4 sm:$0xff]   ;;  %v5872_v52 = vld [vmem:[#allocation2 + $0xf0] ss:$8 sps:$4 sm:$0xff]  }
  0x3d   : > { %v5803_v53 = vld [vmem:[%s6173_s22 + $0x60] sm:$0xff]   ;;  %v5804_v56 = vld [vmem:[%s6173_s22 + $0x68] sm:$0xff]   ;;  %v5805_v57 = vld [vmem:[%s6173_s22 + $0x70] sm:$0xff]  }
  0x3e   : > { %1515 = vmatpush1.bf16.msra.mxu1 %v5828_v21  ;;  %v5873_v54 = vld [vmem:[#allocation2 + $0x120] ss:$8 sps:$4 sm:$0xff]   ;;  %v5875_v55 = vld [vmem:[#allocation2 + $0x124] ss:$8 sps:$4 sm:$0xff]   ;;  %v5878_v58 = vld [vmem:[#allocation2 + $0x130] ss:$8 sps:$4 sm:$0xff]  }
  0x3f   : > { %1516 = vmatprep.subr.bf16.mxu1 %v5829_v22  ;;  %2389 = vmatprep.subr.bf16.mxu0 %v5875_v55  ;;  %v5880_v59 = vld [vmem:[#allocation2 + $0x134] ss:$8 sps:$4 sm:$0xff]   ;;  %v5807_v61 = vld [vmem:[%s6173_s22 + $0x80] sm:$0xff]   ;;  %v5808_v1 = vld [vmem:[%s6173_s22 + $0x88] sm:$0xff]  }
  0x40   : > { %2390 = vmatpush1.bf16.msra.mxu0 %v5873_v54  ;;  %v5806_v60 = vld [vmem:[%s6173_s22 + $0x78] sm:$0xff]   ;;  %v5883_v62 = vld [vmem:[#allocation2 + $0x140] ss:$8 sps:$4 sm:$0xff]   ;;  %v5885_v63 = vld [vmem:[#allocation2 + $0x144] ss:$8 sps:$4 sm:$0xff]  }
  0x41   : > { %2391 = vmatprep.subr.bf16.mxu0 %v5880_v59  ;;  %v5809_v2 = vld [vmem:[%s6173_s22 + $0x90] sm:$0xff]   ;;  %v5810_v5 = vld [vmem:[%s6173_s22 + $0x98] sm:$0xff]   ;;  %v5811_v6 = vld [vmem:[%s6173_s22 + $0xa0] sm:$0xff]  }
  0x42   : > { %1517 = vmatpush1.bf16.msra.mxu1 %v5831_v23  ;;  %v5886_v3 = vld [vmem:[#allocation2 + $0x150] ss:$8 sps:$4 sm:$0xff]   ;;  %v5888_v4 = vld [vmem:[#allocation2 + $0x154] ss:$8 sps:$4 sm:$0xff]   ;;  %v5895_v15 = vld [vmem:[#allocation2 + $0x180] ss:$8 sps:$4 sm:$0xff]  }
  0x43   : > { %5550 = vmatmul.mubr.msk.bf16.gmra.mrb[8].mxu0 %vm531_vm0, %v5793_v7  ;;  %1518 = vmatprep.subr.bf16.mxu1 %v5833_v25  ;;  %v5889_v7 = vld [vmem:[#allocation2 + $0x160] ss:$8 sps:$4 sm:$0xff]   ;;  %v5825_v10 = vld [vmem:[%s6173_s22 + $0xb0] sm:$0xff]   ;;  %v5832_v13 = vld [vmem:[%s6173_s22 + $0xb8] sm:$0xff]  }
  0x44   : > { %690 = vmatprep.mubr.bf16.mxu0 %v6074_v0  ;;  %2392 = vmatpush1.bf16.msra.mxu0 %v5878_v58  ;;  %v5892_v11 = vld [vmem:[#allocation2 + $0x170] ss:$8 sps:$4 sm:$0xff]   ;;  %v5894_v12 = vld [vmem:[#allocation2 + $0x174] ss:$8 sps:$4 sm:$0xff]   ;;  %v5897_v16 = vld [vmem:[#allocation2 + $0x184] ss:$8 sps:$4 sm:$0xff]  }
  0x45   : > { %2393 = vmatprep.subr.bf16.mxu0 %v5885_v63  ;;  %v5849_v17 = vld [vmem:[%s6173_s22 + $0xc8] sm:$0xff]   ;;  %v5859_v20 = vld [vmem:[%s6173_s22 + $0xd0] sm:$0xff]  }
  0x46   : > { %1519 = vmatpush1.bf16.msra.mxu1 %v5835_v26  ;;  %v339_v22 = vld [vmem:[%s7313_s4] ss:$8 sm:$0x3] }
  0x47   : > { %1520 = vmatprep.subr.bf16.mxu1 %v5836_v27  ;;  %v5898_v27 = vld [vmem:[#allocation2 + $0x190] ss:$8 sps:$4 sm:$0xff]  }
  0x48   : > { %2394 = vmatpush1.bf16.msra.mxu0 %v5883_v62 }
  0x49   : > { %2395 = vmatprep.subr.bf16.mxu0 %v5888_v4 }
  0x4a   : > { %1521 = vmatpush1.bf16.msra.mxu1 %v5838_v28  ;;  %v5900_v28 = vld [vmem:[#allocation2 + $0x194] ss:$8 sps:$4 sm:$0xff]  }
  0x4b   : > { %5551 = vmatmul.mubr.msk.bf16.gmra.mrb[12].mxu0 %vm531_vm0, %v5794_v8  ;;  %1522 = vmatprep.subr.bf16.mxu1 %v5843_v32  ;;  %v5891_v8 = vld [vmem:[#allocation2 + $0x164] ss:$8 sps:$4 sm:$0xff]  }
  0x4c   : > { %700 = vmatprep.mubr.bf16.mxu0 %v6074_v0  ;;  %2396 = vmatpush1.bf16.msra.mxu0 %v5886_v3  ;;  %v5903_v3 = vld [vmem:[#allocation2 + $0x1a4] ss:$8 sps:$4 sm:$0xff]  }
  0x4d   : > { %2397 = vmatprep.subr.bf16.mxu0 %v5891_v8 }
  0x4e   : > { %1523 = vmatpush1.bf16.msra.mxu1 %v5845_v33 }
  0x4f   : > { %1524 = vmatprep.subr.bf16.mxu1 %v5846_v34 }
  0x50   : > { %2398 = vmatpush1.bf16.msra.mxu0 %v5889_v7 }
  0x51   : > { %2399 = vmatprep.subr.bf16.mxu0 %v5894_v12 }
  0x52   : > { %1525 = vmatpush1.bf16.msra.mxu1 %v5848_v35 }
  0x53   : > { %5552 = vmatmul.mubr.msk.bf16.gmra.mrb[16].mxu0 %vm531_vm0, %v5795_v9  ;;  %1526 = vmatprep.subr.bf16.mxu1 %v5850_v37  ;;  %v5818_v9 = vld [vmem:[%s6173_s22 + $0xa8] sm:$0xff]  }
  0x54   : > { %710 = vmatprep.mubr.bf16.mxu0 %v6074_v0  ;;  %2400 = vmatpush1.bf16.msra.mxu0 %v5892_v11 }
  0x55   : > { %2401 = vmatprep.subr.bf16.mxu0 %v5897_v16 }
  0x56   : > { %1527 = vmatpush1.bf16.msra.mxu1 %v5852_v38 }
  0x57   : > { %1528 = vmatprep.subr.bf16.mxu1 %v5853_v39 }
  0x58   : > { %2402 = vmatpush1.bf16.msra.mxu0 %v5895_v15 }
  0x59   : > { %2403 = vmatprep.subr.bf16.mxu0 %v5900_v28 }
  0x5a   : > { %1529 = vmatpush1.bf16.msra.mxu1 %v5855_v40 }
  0x5b   : > { %5553 = vmatmul.mubr.msk.bf16.gmra.mrb[20].mxu0 %vm531_vm0, %v5796_v14  ;;  %1530 = vmatprep.subr.bf16.mxu1 %v5860_v44  ;;  %v5842_v14 = vld [vmem:[%s6173_s22 + $0xc0] sm:$0xff]  }
  0x5c   : > { %720 = vmatprep.mubr.bf16.mxu0 %v6074_v0  ;;  %2404 = vmatpush1.bf16.msra.mxu0 %v5898_v27 }
  0x5d   : > { %2405 = vmatprep.subr.bf16.mxu0 %v5903_v3 }
  0x5e   : > { %1531 = vmatpush1.bf16.msra.mxu1 %v5862_v45 }
  0x5f   : > { %1532 = vmatprep.subr.bf16.mxu1 %v5863_v47 }
  0x62   : > { %1533 = vmatpush1.bf16.msra.mxu1 %v5865_v48  ;;  %v5876_v48 = vld [vmem:[%s6173_s22 + $0xe0] sm:$0xff]  }
  0x63   : > { %5554 = vmatmul.mubr.msk.bf16.gmra.mrb[24].mxu0 %vm531_vm0, %v5797_v19  ;;  %1534 = vmatprep.subr.bf16.mxu1 %v5867_v49  ;;  %v342_v19 = vshrl.u32 %v341_v18, 7 }
  0x64   : > { %730 = vmatprep.mubr.bf16.mxu0 %v6074_v0 }
  0x65   : > { %v6260_v21 = vsub.s32 0, %v342_v19  ;;  %v6265_v23 = vsub.s32 1, %v342_v19 }
  0x66   : > { %1535 = vmatpush1.bf16.msra.mxu1 %v5869_v50 }
  0x67   : > { %1536 = vmatprep.subr.bf16.mxu1 %v5870_v51  ;;  %v6272_v25 = vrot.slane %v339_v22, %v6265_v23 }
  0x6a   : > { %1537 = vmatpush1.bf16.msra.mxu1 %v5872_v52 }
  0x6b   : > { %5555 = vmatmul.mubr.msk.bf16.gmra.mrb[28].mxu0 %vm531_vm0, %v5798_v24  ;;  %v6269_v24 = vrot.slane %v339_v22, %v6260_v21 }
  0x6c   : > { %740 = vmatprep.mubr.bf16.mxu0 %v6074_v0 }
  0x73   : > { %5556 = vmatmul.mubr.msk.bf16.gmra.mrb[32].mxu0 %vm531_vm0, %v5799_v31  ;;  %v5866_v31 = vld [vmem:[%s6173_s22 + $0xd8] sm:$0xff]  }
  0x74   : > { %750 = vmatprep.mubr.bf16.mxu0 %v6074_v0 }
  0x7b   : > { %5557 = vmatmul.mubr.msk.bf16.gmra.mrb[36].mxu0 %vm531_vm0, %v5800_v36 }
  0x7c   : > { %760 = vmatprep.mubr.bf16.mxu0 %v6074_v0 }
  0x83   : > { %5558 = vmatmul.mubr.msk.bf16.gmra.mrb[40].mxu0 %vm531_vm0, %v5801_v43 }
  0x84   : > { %770 = vmatprep.mubr.bf16.mxu0 %v6074_v0 }
  0x8b   : > { %5559 = vmatmul.mubr.msk.bf16.gmra.mrb[44].mxu0 %vm531_vm0, %v5802_v46 }
  0x8c   : > { %780 = vmatprep.mubr.bf16.mxu0 %v6074_v0 }
  0x93   : > { %5560 = vmatmul.mubr.msk.bf16.gmra.mrb[48].mxu0 %vm531_vm0, %v5803_v53 }
  0x94   : > { %790 = vmatprep.mubr.bf16.mxu0 %v6074_v0 }
  0x9b   : > { %5561 = vmatmul.mubr.msk.bf16.gmra.mrb[52].mxu0 %vm531_vm0, %v5804_v56 }
  0x9c   : > { %800 = vmatprep.mubr.bf16.mxu0 %v6074_v0 }
  0xa3   : > { %5562 = vmatmul.mubr.msk.bf16.gmra.mrb[56].mxu0 %vm531_vm0, %v5805_v57 }
  0xa4   : > { %810 = vmatprep.mubr.bf16.mxu0 %v6074_v0 }
  0xab   : > { %5563 = vmatmul.mubr.msk.bf16.gmra.mrb[60].mxu0 %vm531_vm0, %v5806_v60 }
  0xac   : > { %820 = vmatprep.mubr.bf16.mxu0 %v6074_v0 }
  0xb3   : > { %5564 = vmatmul.mubr.msk.bf16.gmra.mrb[64].mxu0 %vm531_vm0, %v5807_v61 }
  0xb4   : > { %830 = vmatprep.mubr.bf16.mxu0 %v6074_v0 }
  0xbb   : > { %5565 = vmatmul.mubr.msk.bf16.gmra.mrb[68].mxu0 %vm531_vm0, %v5808_v1 }
  0xbc   : > { %840 = vmatprep.mubr.bf16.mxu0 %v6074_v0 }
  0xc3   : > { %5566 = vmatmul.mubr.msk.bf16.gmra.mrb[72].mxu0 %vm531_vm0, %v5809_v2  ;;  %v5901_v2 = vld [vmem:[#allocation2 + $0x1a0] ss:$8 sps:$4 sm:$0xff]  }
  0xc4   : > { %850 = vmatprep.mubr.bf16.mxu0 %v6074_v0  ;;  %2406 = vmatpush1.bf16.msra.mxu0 %v5901_v2 }
  0xcb   : > { %5567 = vmatmul.mubr.msk.bf16.gmra.mrb[76].mxu0 %vm531_vm0, %v5810_v5 }
  0xcc   : > { %860 = vmatprep.mubr.bf16.mxu0 %v6074_v0 }
  0xd3   : > { %5568 = vmatmul.mubr.msk.bf16.gmra.mrb[80].mxu0 %vm531_vm0, %v5811_v6  ;;  %v5877_v6 = vld [vmem:[%s6173_s22 + $0xe8] sm:$0xff]  }
  0xd4   : > { %870 = vmatprep.mubr.bf16.mxu0 %v6074_v0 }
  0xdb   : > { %5569 = vmatmul.mubr.msk.bf16.gmra.mrb[84].mxu0 %vm531_vm0, %v5818_v9 }
  0xdc   : > { %880 = vmatprep.mubr.bf16.mxu0 %v6074_v0 }
  0xe3   : > { %5570 = vmatmul.mubr.msk.bf16.gmra.mrb[88].mxu0 %vm531_vm0, %v5825_v10 }
  0xe4   : > { %890 = vmatprep.mubr.bf16.mxu0 %v6074_v0 }
  0xeb   : > { %5571 = vmatmul.mubr.msk.bf16.gmra.mrb[92].mxu0 %vm531_vm0, %v5832_v13 }
  0xec   : > { %900 = vmatprep.mubr.bf16.mxu0 %v6074_v0 }
  0xf3   : > { %5572 = vmatmul.mubr.msk.bf16.gmra.mrb[96].mxu0 %vm531_vm0, %v5842_v14 }
  0xf4   : > { %910 = vmatprep.mubr.bf16.mxu0 %v6074_v0 }
  0xfb   : > { %5573 = vmatmul.mubr.msk.bf16.gmra.mrb[100].mxu0 %vm531_vm0, %v5849_v17 }
  0xfc   : > { %920 = vmatprep.mubr.bf16.mxu0 %v6074_v0 }
 0x103   : > { %5574 = vmatmul.mubr.msk.bf16.gmra.mrb[104].mxu0 %vm531_vm0, %v5859_v20 }
 0x104   : > { %930 = vmatprep.mubr.bf16.mxu0 %v6074_v0 }
 0x106   : > { %v662_v26 = vpop.f32.mrb[0].mxu0 }
 0x107   : > { %v663_v29 = vadd.f32 %v662_v26, %v6269_v24  ;;  %v664_v30 = vpop.f32.mrb[1].mxu0 }
 0x108   : > { %v665_v32 = vadd.f32 %v664_v30, %v6272_v25  ;;  %v666_v33 = vpop.f32.mrb[2].mxu0 }
 0x109   : > { %v981_v34 = vmul.f32 0.01, %v663_v29  ;;  %v667_v35 = vadd.f32 %v666_v33, %v6269_v24  ;;  %v668_v36 = vpop.f32.mrb[3].mxu0 }
 0x10a   : > { %v669_v37 = vadd.f32 %v668_v36, %v6272_v25  ;;  %v982_v38 = vmul.f32 0.01, %v665_v32 }
 0x10b   : > { %v983_v39 = vmul.f32 0.01, %v667_v35  ;;  %5575 = vmatmul.mubr.msk.bf16.gmra.mrb[108].mxu0 %vm531_vm0, %v5866_v31  ;;  %v1109_v41 = vmax.f32 %v663_v29, %v981_v34  ;;  %v5881_v29 = vld [vmem:[%s6173_s22 + $0xf0] sm:$0xff]  }
 0x10c   : > { %940 = vmatprep.mubr.bf16.mxu0 %v6074_v0  ;;  %v984_v40 = vmul.f32 0.01, %v669_v37  ;;  %v1110_v44 = vmax.f32 %v665_v32, %v982_v38 }
 0x10d   : > { %v1111_v42 = vmax.f32 %v667_v35, %v983_v39 }
 0x10e   : > { %v672_v43 = vpop.f32.mrb[4].mxu0  ;;  %v1112_v45 = vmax.f32 %v669_v37, %v984_v40 }
 0x10f   : > { %v673_v46 = vadd.f32 %v672_v43, %v6269_v24  ;;  %v674_v47 = vpop.f32.mrb[5].mxu0  ;;  %v1237_v49 = vpack.c.bf16 %v1111_v42, %v1109_v41 }
 0x110   : > { %v675_v50 = vadd.f32 %v674_v47, %v6272_v25  ;;  %v676_v51 = vpop.f32.mrb[6].mxu0  ;;  %v1238_v52 = vpack.c.bf16 %v1112_v45, %v1110_v44  ;;  %v5906_v47 = vld [vmem:[#allocation2 + $0x1b4] ss:$8 sps:$4 sm:$0xff]  }
 0x111   : > { %v985_v53 = vmul.f32 0.01, %v673_v46  ;;  %v677_v54 = vadd.f32 %v676_v51, %v6269_v24  ;;  %v678_v55 = vpop.f32.mrb[7].mxu0  ;;  %2407 = vmatprep.subr.bf16.mxu0 %v5906_v47 }
 0x112   : > { %v986_v56 = vmul.f32 0.01, %v675_v50  ;;  %v679_v57 = vadd.f32 %v678_v55, %v6272_v25  ;;  %1538 = vmatprep.mubr.bf16.mxu1 %v1238_v52 }
 0x113   : > { %v987_v58 = vmul.f32 0.01, %v677_v54  ;;  %5576 = vmatmul.mubr.msk.bf16.gmra.mrb[112].mxu0 %vm531_vm0, %v5876_v48  ;;  %1539 = vmatmul.mubr.bf16.vlgmr.msra.gmra.mrb[0].mxu1 %v1237_v49  ;;  %v1113_v60 = vmax.f32 %v673_v46, %v985_v53  ;;  %v5904_v46 = vld [vmem:[#allocation2 + $0x1b0] ss:$8 sps:$4 sm:$0xff]  }
 0x114   : > { %v988_v59 = vmul.f32 0.01, %v679_v57  ;;  %950 = vmatprep.mubr.bf16.mxu0 %v6074_v0  ;;  %v1114_v62 = vmax.f32 %v675_v50, %v986_v56  ;;  %v5882_v50 = vld [vmem:[%s6173_s22 + $0xf8] sm:$0xff]   ;;  %2408 = vmatpush1.bf16.msra.mxu0 %v5904_v46 }
 0x115   : > { %v1115_v61 = vmax.f32 %v677_v54, %v987_v58 }
 0x116   : > { %v1116_v63 = vmax.f32 %v679_v57, %v988_v59  ;;  %v682_v1 = vpop.f32.mrb[8].mxu0 }
 0x117   : > { %v683_v4 = vadd.f32 %v682_v1, %v6269_v24  ;;  %v684_v5 = vpop.f32.mrb[9].mxu0  ;;  %v1239_v7 = vpack.c.bf16 %v1115_v61, %v1113_v60 }
 0x118   : > { %v685_v8 = vadd.f32 %v684_v5, %v6272_v25  ;;  %v686_v9 = vpop.f32.mrb[10].mxu0  ;;  %v1240_v10 = vpack.c.bf16 %v1116_v63, %v1114_v62 }
 0x119   : > { %v989_v11 = vmul.f32 0.01, %v683_v4  ;;  %v687_v12 = vadd.f32 %v686_v9, %v6269_v24  ;;  %v688_v13 = vpop.f32.mrb[11].mxu0 }
 0x11a   : > { %v990_v14 = vmul.f32 0.01, %v685_v8  ;;  %v689_v15 = vadd.f32 %v688_v13, %v6272_v25  ;;  %1548 = vmatprep.mubr.bf16.mxu1 %v1240_v10 }
 0x11b   : > { %v991_v16 = vmul.f32 0.01, %v687_v12  ;;  %5577 = vmatmul.mubr.msk.bf16.gmra.mrb[116].mxu0 %vm531_vm0, %v5877_v6  ;;  %1549 = vmatmul.mubr.bf16.gmra.mrb[4].mxu1 %v1239_v7  ;;  %v1117_v18 = vmax.f32 %v683_v4, %v989_v11 }
 0x11c   : > { %v992_v17 = vmul.f32 0.01, %v689_v15  ;;  %960 = vmatprep.mubr.bf16.mxu0 %v6074_v0  ;;  %v1118_v20 = vmax.f32 %v685_v8, %v990_v14 }
 0x11d   : > { %v1119_v19 = vmax.f32 %v687_v12, %v991_v16 }
 0x11e   : > { %v1120_v22 = vmax.f32 %v689_v15, %v992_v17  ;;  %v692_v26 = vpop.f32.mrb[12].mxu0 }
 0x11f   : > { %v693_v27 = vadd.f32 %v692_v26, %v6269_v24  ;;  %v694_v28 = vpop.f32.mrb[13].mxu0  ;;  %v1241_v30 = vpack.c.bf16 %v1119_v19, %v1117_v18  ;;  %v5907_v26 = vld [vmem:[#allocation2 + $0x1c0] ss:$8 sps:$4 sm:$0xff]  }
 0x120   : > { %v695_v31 = vadd.f32 %v694_v28, %v6272_v25  ;;  %v696_v32 = vpop.f32.mrb[14].mxu0  ;;  %v1242_v33 = vpack.c.bf16 %v1120_v22, %v1118_v20 }
 0x121   : > { %v993_v34 = vmul.f32 0.01, %v693_v27  ;;  %v697_v35 = vadd.f32 %v696_v32, %v6269_v24  ;;  %v698_v36 = vpop.f32.mrb[15].mxu0 }
 0x122   : > { %v994_v37 = vmul.f32 0.01, %v695_v31  ;;  %v699_v38 = vadd.f32 %v698_v36, %v6272_v25  ;;  %1558 = vmatprep.mubr.bf16.mxu1 %v1242_v33 }
 0x123   : > { %v995_v39 = vmul.f32 0.01, %v697_v35  ;;  %5578 = vmatmul.mubr.msk.bf16.gmra.mrb[120].mxu0 %vm531_vm0, %v5881_v29  ;;  %1559 = vmatmul.mubr.bf16.gmra.mrb[8].mxu1 %v1241_v30  ;;  %v1121_v41 = vmax.f32 %v693_v27, %v993_v34  ;;  %v5909_v27 = vld [vmem:[#allocation2 + $0x1c4] ss:$8 sps:$4 sm:$0xff]  }
 0x124   : > { %v996_v40 = vmul.f32 0.01, %v699_v38  ;;  %970 = vmatprep.mubr.bf16.mxu0 %v6074_v0  ;;  %v1122_v43 = vmax.f32 %v695_v31, %v994_v37  ;;  %2409 = vmatprep.subr.bf16.mxu0 %v5909_v27 }
 0x125   : > { %v1123_v42 = vmax.f32 %v697_v35, %v995_v39  ;;  %2410 = vmatpush1.bf16.msra.mxu0 %v5907_v26 }
 0x126   : > { %v1124_v44 = vmax.f32 %v699_v38, %v996_v40  ;;  %v702_v45 = vpop.f32.mrb[16].mxu0 }
 0x127   : > { %v703_v48 = vadd.f32 %v702_v45, %v6269_v24  ;;  %v704_v49 = vpop.f32.mrb[17].mxu0  ;;  %v1243_v51 = vpack.c.bf16 %v1123_v42, %v1121_v41 }
 0x128   : > { %v705_v52 = vadd.f32 %v704_v49, %v6272_v25  ;;  %v706_v53 = vpop.f32.mrb[18].mxu0  ;;  %v1244_v54 = vpack.c.bf16 %v1124_v44, %v1122_v43 }
 0x129   : > { %v997_v55 = vmul.f32 0.01, %v703_v48  ;;  %v707_v56 = vadd.f32 %v706_v53, %v6269_v24  ;;  %v708_v57 = vpop.f32.mrb[19].mxu0 }
 0x12a   : > { %v998_v58 = vmul.f32 0.01, %v705_v52  ;;  %v709_v59 = vadd.f32 %v708_v57, %v6272_v25  ;;  %1568 = vmatprep.mubr.bf16.mxu1 %v1244_v54 }
 0x12b   : > { %v999_v60 = vmul.f32 0.01, %v707_v56  ;;  %5579 = vmatmul.mubr.msk.bf16.gmra.mrb[124].mxu0 %vm531_vm0, %v5882_v50  ;;  %1569 = vmatmul.mubr.bf16.gmra.mrb[12].mxu1 %v1243_v51  ;;  %v1125_v62 = vmax.f32 %v703_v48, %v997_v55 }
 0x12c   : > { %v1000_v61 = vmul.f32 0.01, %v709_v59  ;;  %v1126_v1 = vmax.f32 %v705_v52, %v998_v58 }
 0x12d   : > { %v1127_v63 = vmax.f32 %v707_v56, %v999_v60 }
 0x12e   : > { %v1128_v2 = vmax.f32 %v709_v59, %v1000_v61  ;;  %v712_v3 = vpop.f32.mrb[20].mxu0 }
 0x12f   : > { %v713_v4 = vadd.f32 %v712_v3, %v6269_v24  ;;  %v714_v5 = vpop.f32.mrb[21].mxu0  ;;  %v1245_v6 = vpack.c.bf16 %v1127_v63, %v1125_v62 }
 0x130   : > { %v715_v7 = vadd.f32 %v714_v5, %v6272_v25  ;;  %v716_v8 = vpop.f32.mrb[22].mxu0  ;;  %v1246_v9 = vpack.c.bf16 %v1128_v2, %v1126_v1  ;;  %v5910_v1 = vld [vmem:[#allocation2 + $0x1d0] ss:$8 sps:$4 sm:$0xff]   ;;  %v5912_v2 = vld [vmem:[#allocation2 + $0x1d4] ss:$8 sps:$4 sm:$0xff]  }
 0x131   : > { %v1001_v10 = vmul.f32 0.01, %v713_v4  ;;  %v717_v11 = vadd.f32 %v716_v8, %v6269_v24  ;;  %v718_v12 = vpop.f32.mrb[23].mxu0  ;;  %2411 = vmatprep.subr.bf16.mxu0 %v5912_v2 }
 0x132   : > { %v1002_v13 = vmul.f32 0.01, %v715_v7  ;;  %v719_v14 = vadd.f32 %v718_v12, %v6272_v25  ;;  %1578 = vmatprep.mubr.bf16.mxu1 %v1246_v9  ;;  %2412 = vmatpush1.bf16.msra.mxu0 %v5910_v1 }
 0x133   : > { %v1003_v15 = vmul.f32 0.01, %v717_v11  ;;  %1579 = vmatmul.mubr.bf16.gmra.mrb[16].mxu1 %v1245_v6  ;;  %v1129_v17 = vmax.f32 %v713_v4, %v1001_v10 }
 0x134   : > { %v1004_v16 = vmul.f32 0.01, %v719_v14  ;;  %v1130_v19 = vmax.f32 %v715_v7, %v1002_v13 }
 0x135   : > { %v1131_v18 = vmax.f32 %v717_v11, %v1003_v15 }
 0x136   : > { %v1132_v20 = vmax.f32 %v719_v14, %v1004_v16  ;;  %v722_v22 = vpop.f32.mrb[24].mxu0 }
 0x137   : > { %v723_v28 = vadd.f32 %v722_v22, %v6269_v24  ;;  %v724_v29 = vpop.f32.mrb[25].mxu0  ;;  %v1247_v30 = vpack.c.bf16 %v1131_v18, %v1129_v17 }
 0x138   : > { %v725_v31 = vadd.f32 %v724_v29, %v6272_v25  ;;  %v726_v32 = vpop.f32.mrb[26].mxu0  ;;  %v1248_v33 = vpack.c.bf16 %v1132_v20, %v1130_v19 }
 0x139   : > { %v1005_v34 = vmul.f32 0.01, %v723_v28  ;;  %v727_v35 = vadd.f32 %v726_v32, %v6269_v24  ;;  %v728_v36 = vpop.f32.mrb[27].mxu0 }
 0x13a   : > { %v1006_v37 = vmul.f32 0.01, %v725_v31  ;;  %v729_v38 = vadd.f32 %v728_v36, %v6272_v25  ;;  %1588 = vmatprep.mubr.bf16.mxu1 %v1248_v33 }
 0x13b   : > { %v1007_v39 = vmul.f32 0.01, %v727_v35  ;;  %1589 = vmatmul.mubr.bf16.gmra.mrb[20].mxu1 %v1247_v30  ;;  %v1133_v41 = vmax.f32 %v723_v28, %v1005_v34 }
 0x13c   : > { %v1008_v40 = vmul.f32 0.01, %v729_v38  ;;  %v1134_v43 = vmax.f32 %v725_v31, %v1006_v37 }
 0x13d   : > { %v1135_v42 = vmax.f32 %v727_v35, %v1007_v39 }
 0x13e   : > { %v1136_v44 = vmax.f32 %v729_v38, %v1008_v40  ;;  %v732_v45 = vpop.f32.mrb[28].mxu0 }
 0x13f   : > { %v733_v46 = vadd.f32 %v732_v45, %v6269_v24  ;;  %v734_v47 = vpop.f32.mrb[29].mxu0  ;;  %v1249_v48 = vpack.c.bf16 %v1135_v42, %v1133_v41 }
 0x140   : > { %v735_v49 = vadd.f32 %v734_v47, %v6272_v25  ;;  %v736_v50 = vpop.f32.mrb[30].mxu0  ;;  %v1250_v51 = vpack.c.bf16 %v1136_v44, %v1134_v43  ;;  %v5913_v43 = vld [vmem:[#allocation2 + $0x1e0] ss:$8 sps:$4 sm:$0xff]   ;;  %v5915_v44 = vld [vmem:[#allocation2 + $0x1e4] ss:$8 sps:$4 sm:$0xff]  }
 0x141   : > { %v1009_v52 = vmul.f32 0.01, %v733_v46  ;;  %v737_v53 = vadd.f32 %v736_v50, %v6269_v24  ;;  %v738_v54 = vpop.f32.mrb[31].mxu0  ;;  %2413 = vmatprep.subr.bf16.mxu0 %v5915_v44 }
 0x142   : > { %v1010_v55 = vmul.f32 0.01, %v735_v49  ;;  %v739_v56 = vadd.f32 %v738_v54, %v6272_v25  ;;  %1598 = vmatprep.mubr.bf16.mxu1 %v1250_v51  ;;  %2414 = vmatpush1.bf16.msra.mxu0 %v5913_v43 }
 0x143   : > { %v1011_v57 = vmul.f32 0.01, %v737_v53  ;;  %1599 = vmatmul.mubr.bf16.gmra.mrb[24].mxu1 %v1249_v48  ;;  %v1137_v59 = vmax.f32 %v733_v46, %v1009_v52  ;;  %v5916_v48 = vld [vmem:[#allocation2 + $0x200] ss:$8 sps:$4 sm:$0xff]  }
 0x144   : > { %v1012_v58 = vmul.f32 0.01, %v739_v56  ;;  %v1138_v61 = vmax.f32 %v735_v49, %v1010_v55  ;;  %v5918_v49 = vld [vmem:[#allocation2 + $0x204] ss:$8 sps:$4 sm:$0xff]  }
 0x145   : > { %v1139_v60 = vmax.f32 %v737_v53, %v1011_v57  ;;  %3264 = vmatprep.subr.bf16.mxu1 %v5918_v49 }
 0x146   : > { %v1140_v62 = vmax.f32 %v739_v56, %v1012_v58  ;;  %v742_v63 = vpop.f32.mrb[32].mxu0  ;;  %3265 = vmatpush1.bf16.msra.mxu1 %v5916_v48 }
 0x147   : > { %v743_v3 = vadd.f32 %v742_v63, %v6269_v24  ;;  %v744_v4 = vpop.f32.mrb[33].mxu0  ;;  %v1251_v5 = vpack.c.bf16 %v1139_v60, %v1137_v59 }
 0x148   : > { %v745_v6 = vadd.f32 %v744_v4, %v6272_v25  ;;  %v746_v7 = vpop.f32.mrb[34].mxu0  ;;  %v1252_v8 = vpack.c.bf16 %v1140_v62, %v1138_v61 }
 0x149   : > { %v1013_v9 = vmul.f32 0.01, %v743_v3  ;;  %v747_v10 = vadd.f32 %v746_v7, %v6269_v24  ;;  %v748_v11 = vpop.f32.mrb[35].mxu0 }
 0x14a   : > { %v1014_v12 = vmul.f32 0.01, %v745_v6  ;;  %v749_v13 = vadd.f32 %v748_v11, %v6272_v25  ;;  %1608 = vmatprep.mubr.bf16.mxu1 %v1252_v8 }
 0x14b   : > { %v1015_v14 = vmul.f32 0.01, %v747_v10  ;;  %1609 = vmatmul.mubr.bf16.gmra.mrb[28].mxu1 %v1251_v5  ;;  %v1141_v16 = vmax.f32 %v743_v3, %v1013_v9 }
 0x14c   : > { %v1016_v15 = vmul.f32 0.01, %v749_v13  ;;  %v1142_v18 = vmax.f32 %v745_v6, %v1014_v12 }
 0x14d   : > { %v1143_v17 = vmax.f32 %v747_v10, %v1015_v14 }
 0x14e   : > { %v1144_v19 = vmax.f32 %v749_v13, %v1016_v15  ;;  %v752_v20 = vpop.f32.mrb[36].mxu0 }
 0x14f   : > { %v753_v22 = vadd.f32 %v752_v20, %v6269_v24  ;;  %v754_v26 = vpop.f32.mrb[37].mxu0  ;;  %v1253_v27 = vpack.c.bf16 %v1143_v17, %v1141_v16  ;;  %v5919_v20 = vld [vmem:[#allocation2 + $0x1f0] ss:$8 sps:$4 sm:$0xff]  }
 0x150   : > { %v755_v28 = vadd.f32 %v754_v26, %v6272_v25  ;;  %v756_v29 = vpop.f32.mrb[38].mxu0  ;;  %v1254_v30 = vpack.c.bf16 %v1144_v19, %v1142_v18 }
 0x151   : > { %v1017_v31 = vmul.f32 0.01, %v753_v22  ;;  %v757_v32 = vadd.f32 %v756_v29, %v6269_v24  ;;  %v758_v33 = vpop.f32.mrb[39].mxu0  ;;  %v5922_v29 = vld [vmem:[#allocation2 + $0x210] ss:$8 sps:$4 sm:$0xff]  }
 0x152   : > { %v1018_v34 = vmul.f32 0.01, %v755_v28  ;;  %v759_v35 = vadd.f32 %v758_v33, %v6272_v25  ;;  %1618 = vmatprep.mubr.bf16.mxu1 %v1254_v30  ;;  %v5924_v30 = vld [vmem:[#allocation2 + $0x214] ss:$8 sps:$4 sm:$0xff]  }
 0x153   : > { %v1019_v36 = vmul.f32 0.01, %v757_v32  ;;  %1619 = vmatmul.mubr.bf16.gmra.mrb[32].mxu1 %v1253_v27  ;;  %v1145_v38 = vmax.f32 %v753_v22, %v1017_v31  ;;  %v5921_v22 = vld [vmem:[#allocation2 + $0x1f4] ss:$8 sps:$4 sm:$0xff]   ;;  %3266 = vmatprep.subr.bf16.mxu1 %v5924_v30 }
 0x154   : > { %v1020_v37 = vmul.f32 0.01, %v759_v35  ;;  %v1146_v40 = vmax.f32 %v755_v28, %v1018_v34  ;;  %2415 = vmatprep.subr.bf16.mxu0 %v5921_v22  ;;  %3267 = vmatpush1.bf16.msra.mxu1 %v5922_v29 }
 0x155   : > { %v1147_v39 = vmax.f32 %v757_v32, %v1019_v36  ;;  %2416 = vmatpush1.bf16.msra.mxu0 %v5919_v20 }
 0x156   : > { %v1148_v41 = vmax.f32 %v759_v35, %v1020_v37  ;;  %v762_v42 = vpop.f32.mrb[40].mxu0 }
 0x157   : > { %v763_v45 = vadd.f32 %v762_v42, %v6269_v24  ;;  %v764_v46 = vpop.f32.mrb[41].mxu0  ;;  %v1255_v47 = vpack.c.bf16 %v1147_v39, %v1145_v38 }
 0x158   : > { %v765_v50 = vadd.f32 %v764_v46, %v6272_v25  ;;  %v766_v51 = vpop.f32.mrb[42].mxu0  ;;  %v1256_v52 = vpack.c.bf16 %v1148_v41, %v1146_v40 }
 0x159   : > { %v1021_v53 = vmul.f32 0.01, %v763_v45  ;;  %v767_v54 = vadd.f32 %v766_v51, %v6269_v24  ;;  %v768_v55 = vpop.f32.mrb[43].mxu0 }
 0x15a   : > { %v1022_v56 = vmul.f32 0.01, %v765_v50  ;;  %v769_v57 = vadd.f32 %v768_v55, %v6272_v25  ;;  %1628 = vmatprep.mubr.bf16.mxu1 %v1256_v52 }
 0x15b   : > { %v1023_v58 = vmul.f32 0.01, %v767_v54  ;;  %1629 = vmatmul.mubr.bf16.gmra.mrb[36].mxu1 %v1255_v47  ;;  %v1149_v60 = vmax.f32 %v763_v45, %v1021_v53 }
 0x15c   : > { %v1024_v59 = vmul.f32 0.01, %v769_v57  ;;  %v1150_v62 = vmax.f32 %v765_v50, %v1022_v56 }
 0x15d   : > { %v1151_v61 = vmax.f32 %v767_v54, %v1023_v58 }
 0x15e   : > { %v1152_v63 = vmax.f32 %v769_v57, %v1024_v59  ;;  %v772_v1 = vpop.f32.mrb[44].mxu0 }
 0x15f   : > { %v773_v2 = vadd.f32 %v772_v1, %v6269_v24  ;;  %v774_v3 = vpop.f32.mrb[45].mxu0  ;;  %v1257_v4 = vpack.c.bf16 %v1151_v61, %v1149_v60  ;;  %v5925_v1 = vld [vmem:[#allocation2 + $0x220] ss:$8 sps:$4 sm:$0xff]  }
 0x160   : > { %v775_v5 = vadd.f32 %v774_v3, %v6272_v25  ;;  %v776_v6 = vpop.f32.mrb[46].mxu0  ;;  %v1258_v7 = vpack.c.bf16 %v1152_v63, %v1150_v62 }
 0x161   : > { %v1025_v8 = vmul.f32 0.01, %v773_v2  ;;  %v777_v9 = vadd.f32 %v776_v6, %v6269_v24  ;;  %v778_v10 = vpop.f32.mrb[47].mxu0 }
 0x162   : > { %v1026_v11 = vmul.f32 0.01, %v775_v5  ;;  %v779_v12 = vadd.f32 %v778_v10, %v6272_v25  ;;  %1638 = vmatprep.mubr.bf16.mxu1 %v1258_v7 }
 0x163   : > { %v1027_v13 = vmul.f32 0.01, %v777_v9  ;;  %1639 = vmatmul.mubr.bf16.gmra.mrb[40].mxu1 %v1257_v4  ;;  %v1153_v15 = vmax.f32 %v773_v2, %v1025_v8  ;;  %v5927_v2 = vld [vmem:[#allocation2 + $0x224] ss:$8 sps:$4 sm:$0xff]  }
 0x164   : > { %v1028_v14 = vmul.f32 0.01, %v779_v12  ;;  %v1154_v17 = vmax.f32 %v775_v5, %v1026_v11  ;;  %3268 = vmatprep.subr.bf16.mxu1 %v5927_v2 }
 0x165   : > { %v1155_v16 = vmax.f32 %v777_v9, %v1027_v13  ;;  %3269 = vmatpush1.bf16.msra.mxu1 %v5925_v1 }
 0x166   : > { %v1156_v18 = vmax.f32 %v779_v12, %v1028_v14  ;;  %v782_v19 = vpop.f32.mrb[48].mxu0 }
 0x167   : > { %v783_v26 = vadd.f32 %v782_v19, %v6269_v24  ;;  %v784_v27 = vpop.f32.mrb[49].mxu0  ;;  %v1259_v28 = vpack.c.bf16 %v1155_v16, %v1153_v15 }
 0x168   : > { %v785_v31 = vadd.f32 %v784_v27, %v6272_v25  ;;  %v786_v32 = vpop.f32.mrb[50].mxu0  ;;  %v1260_v33 = vpack.c.bf16 %v1156_v18, %v1154_v17 }
 0x169   : > { %v1029_v34 = vmul.f32 0.01, %v783_v26  ;;  %v787_v35 = vadd.f32 %v786_v32, %v6269_v24  ;;  %v788_v36 = vpop.f32.mrb[51].mxu0 }
 0x16a   : > { %v1030_v37 = vmul.f32 0.01, %v785_v31  ;;  %v789_v38 = vadd.f32 %v788_v36, %v6272_v25  ;;  %1648 = vmatprep.mubr.bf16.mxu1 %v1260_v33 }
 0x16b   : > { %v1031_v39 = vmul.f32 0.01, %v787_v35  ;;  %1649 = vmatmul.mubr.bf16.gmra.mrb[44].mxu1 %v1259_v28  ;;  %v1157_v41 = vmax.f32 %v783_v26, %v1029_v34 }
 0x16c   : > { %v1032_v40 = vmul.f32 0.01, %v789_v38  ;;  %v1158_v43 = vmax.f32 %v785_v31, %v1030_v37 }
 0x16d   : > { %v1159_v42 = vmax.f32 %v787_v35, %v1031_v39 }
 0x16e   : > { %v1160_v44 = vmax.f32 %v789_v38, %v1032_v40  ;;  %v792_v45 = vpop.f32.mrb[52].mxu0 }
 0x16f   : > { %v793_v46 = vadd.f32 %v792_v45, %v6269_v24  ;;  %v794_v47 = vpop.f32.mrb[53].mxu0  ;;  %v1261_v48 = vpack.c.bf16 %v1159_v42, %v1157_v41 }
 0x170   : > { %v795_v49 = vadd.f32 %v794_v47, %v6272_v25  ;;  %v796_v50 = vpop.f32.mrb[54].mxu0  ;;  %v1262_v51 = vpack.c.bf16 %v1160_v44, %v1158_v43  ;;  %v5928_v43 = vld [vmem:[#allocation2 + $0x230] ss:$8 sps:$4 sm:$0xff]   ;;  %v5930_v44 = vld [vmem:[#allocation2 + $0x234] ss:$8 sps:$4 sm:$0xff]  }
 0x171   : > { %v1033_v52 = vmul.f32 0.01, %v793_v46  ;;  %v797_v53 = vadd.f32 %v796_v50, %v6269_v24  ;;  %v798_v54 = vpop.f32.mrb[55].mxu0  ;;  %3270 = vmatprep.subr.bf16.mxu1 %v5930_v44 }
 0x172   : > { %v1034_v55 = vmul.f32 0.01, %v795_v49  ;;  %v799_v56 = vadd.f32 %v798_v54, %v6272_v25  ;;  %1658 = vmatprep.mubr.bf16.mxu1 %v1262_v51  ;;  %3271 = vmatpush1.bf16.msra.mxu1 %v5928_v43 }
 0x173   : > { %v1035_v57 = vmul.f32 0.01, %v797_v53  ;;  %1659 = vmatmul.mubr.bf16.gmra.mrb[48].mxu1 %v1261_v48  ;;  %v1161_v59 = vmax.f32 %v793_v46, %v1033_v52 }
 0x174   : > { %v1036_v58 = vmul.f32 0.01, %v799_v56  ;;  %v1162_v61 = vmax.f32 %v795_v49, %v1034_v55 }
 0x175   : > { %v1163_v60 = vmax.f32 %v797_v53, %v1035_v57 }
 0x176   : > { %v1164_v62 = vmax.f32 %v799_v56, %v1036_v58  ;;  %v802_v63 = vpop.f32.mrb[56].mxu0 }
 0x177   : > { %v803_v3 = vadd.f32 %v802_v63, %v6269_v24  ;;  %v804_v4 = vpop.f32.mrb[57].mxu0  ;;  %v1263_v5 = vpack.c.bf16 %v1163_v60, %v1161_v59 }
 0x178   : > { %v805_v6 = vadd.f32 %v804_v4, %v6272_v25  ;;  %v806_v7 = vpop.f32.mrb[58].mxu0  ;;  %v1264_v8 = vpack.c.bf16 %v1164_v62, %v1162_v61 }
 0x179   : > { %v1037_v9 = vmul.f32 0.01, %v803_v3  ;;  %v807_v10 = vadd.f32 %v806_v7, %v6269_v24  ;;  %v808_v11 = vpop.f32.mrb[59].mxu0 }
 0x17a   : > { %v1038_v12 = vmul.f32 0.01, %v805_v6  ;;  %v809_v13 = vadd.f32 %v808_v11, %v6272_v25  ;;  %1668 = vmatprep.mubr.bf16.mxu1 %v1264_v8 }
 0x17b   : > { %v1039_v14 = vmul.f32 0.01, %v807_v10  ;;  %1669 = vmatmul.mubr.bf16.gmra.mrb[52].mxu1 %v1263_v5  ;;  %v1165_v16 = vmax.f32 %v803_v3, %v1037_v9 }
 0x17c   : > { %v1040_v15 = vmul.f32 0.01, %v809_v13  ;;  %v1166_v18 = vmax.f32 %v805_v6, %v1038_v12 }
 0x17d   : > { %v1167_v17 = vmax.f32 %v807_v10, %v1039_v14 }
 0x17e   : > { %v1168_v19 = vmax.f32 %v809_v13, %v1040_v15  ;;  %v812_v20 = vpop.f32.mrb[60].mxu0 }
 0x17f   : > { %v813_v22 = vadd.f32 %v812_v20, %v6269_v24  ;;  %v814_v26 = vpop.f32.mrb[61].mxu0  ;;  %v1265_v27 = vpack.c.bf16 %v1167_v17, %v1165_v16 }
 0x180   : > { %v815_v28 = vadd.f32 %v814_v26, %v6272_v25  ;;  %v816_v29 = vpop.f32.mrb[62].mxu0  ;;  %v1266_v30 = vpack.c.bf16 %v1168_v19, %v1166_v18  ;;  %v5931_v18 = vld [vmem:[#allocation2 + $0x240] ss:$8 sps:$4 sm:$0xff]   ;;  %v5933_v19 = vld [vmem:[#allocation2 + $0x244] ss:$8 sps:$4 sm:$0xff]  }
 0x181   : > { %v1041_v31 = vmul.f32 0.01, %v813_v22  ;;  %v817_v32 = vadd.f32 %v816_v29, %v6269_v24  ;;  %v818_v33 = vpop.f32.mrb[63].mxu0  ;;  %3272 = vmatprep.subr.bf16.mxu1 %v5933_v19 }
 0x182   : > { %v1042_v34 = vmul.f32 0.01, %v815_v28  ;;  %v819_v35 = vadd.f32 %v818_v33, %v6272_v25  ;;  %1678 = vmatprep.mubr.bf16.mxu1 %v1266_v30  ;;  %3273 = vmatpush1.bf16.msra.mxu1 %v5931_v18 }
 0x183   : > { %v1043_v36 = vmul.f32 0.01, %v817_v32  ;;  %1679 = vmatmul.mubr.bf16.gmra.mrb[56].mxu1 %v1265_v27  ;;  %v1169_v38 = vmax.f32 %v813_v22, %v1041_v31 }
 0x184   : > { %v1044_v37 = vmul.f32 0.01, %v819_v35  ;;  %v1170_v40 = vmax.f32 %v815_v28, %v1042_v34 }
 0x185   : > { %v1171_v39 = vmax.f32 %v817_v32, %v1043_v36 }
 0x186   : > { %v1172_v41 = vmax.f32 %v819_v35, %v1044_v37  ;;  %v822_v42 = vpop.f32.mrb[64].mxu0 }
 0x187   : > { %v823_v45 = vadd.f32 %v822_v42, %v6269_v24  ;;  %v824_v46 = vpop.f32.mrb[65].mxu0  ;;  %v1267_v47 = vpack.c.bf16 %v1171_v39, %v1169_v38 }
 0x188   : > { %v825_v48 = vadd.f32 %v824_v46, %v6272_v25  ;;  %v826_v49 = vpop.f32.mrb[66].mxu0  ;;  %v1268_v50 = vpack.c.bf16 %v1172_v41, %v1170_v40 }
 0x189   : > { %v1045_v51 = vmul.f32 0.01, %v823_v45  ;;  %v827_v52 = vadd.f32 %v826_v49, %v6269_v24  ;;  %v828_v53 = vpop.f32.mrb[67].mxu0 }
 0x18a   : > { %v1046_v54 = vmul.f32 0.01, %v825_v48  ;;  %v829_v55 = vadd.f32 %v828_v53, %v6272_v25  ;;  %1688 = vmatprep.mubr.bf16.mxu1 %v1268_v50 }
 0x18b   : > { %v1047_v56 = vmul.f32 0.01, %v827_v52  ;;  %1689 = vmatmul.mubr.bf16.gmra.mrb[60].mxu1 %v1267_v47  ;;  %v1173_v58 = vmax.f32 %v823_v45, %v1045_v51 }
 0x18c   : > { %v1048_v57 = vmul.f32 0.01, %v829_v55  ;;  %v1174_v60 = vmax.f32 %v825_v48, %v1046_v54 }
 0x18d   : > { %v1175_v59 = vmax.f32 %v827_v52, %v1047_v56 }
 0x18e   : > { %v1176_v61 = vmax.f32 %v829_v55, %v1048_v57  ;;  %v832_v62 = vpop.f32.mrb[68].mxu0 }
 0x18f   : > { %v833_v63 = vadd.f32 %v832_v62, %v6269_v24  ;;  %v834_v1 = vpop.f32.mrb[69].mxu0  ;;  %v1269_v2 = vpack.c.bf16 %v1175_v59, %v1173_v58 }
 0x190   : > { %v835_v3 = vadd.f32 %v834_v1, %v6272_v25  ;;  %v836_v4 = vpop.f32.mrb[70].mxu0  ;;  %v1270_v5 = vpack.c.bf16 %v1176_v61, %v1174_v60  ;;  %v5934_v60 = vld [vmem:[#allocation2 + $0x250] ss:$8 sps:$4 sm:$0xff]   ;;  %v5936_v61 = vld [vmem:[#allocation2 + $0x254] ss:$8 sps:$4 sm:$0xff]  }
 0x191   : > { %v1049_v6 = vmul.f32 0.01, %v833_v63  ;;  %v837_v7 = vadd.f32 %v836_v4, %v6269_v24  ;;  %v838_v8 = vpop.f32.mrb[71].mxu0  ;;  %3274 = vmatprep.subr.bf16.mxu1 %v5936_v61 }
 0x192   : > { %v1050_v9 = vmul.f32 0.01, %v835_v3  ;;  %v839_v10 = vadd.f32 %v838_v8, %v6272_v25  ;;  %1698 = vmatprep.mubr.bf16.mxu1 %v1270_v5  ;;  %3275 = vmatpush1.bf16.msra.mxu1 %v5934_v60 }
 0x193   : > { %v1051_v11 = vmul.f32 0.01, %v837_v7  ;;  %1699 = vmatmul.mubr.bf16.gmra.mrb[64].mxu1 %v1269_v2  ;;  %v1177_v13 = vmax.f32 %v833_v63, %v1049_v6 }
 0x194   : > { %v1052_v12 = vmul.f32 0.01, %v839_v10  ;;  %v1178_v15 = vmax.f32 %v835_v3, %v1050_v9 }
 0x195   : > { %v1179_v14 = vmax.f32 %v837_v7, %v1051_v11 }
 0x196   : > { %v1180_v16 = vmax.f32 %v839_v10, %v1052_v12  ;;  %v842_v17 = vpop.f32.mrb[72].mxu0 }
 0x197   : > { %v843_v20 = vadd.f32 %v842_v17, %v6269_v24  ;;  %v844_v22 = vpop.f32.mrb[73].mxu0  ;;  %v1271_v26 = vpack.c.bf16 %v1179_v14, %v1177_v13 }
 0x198   : > { %v845_v27 = vadd.f32 %v844_v22, %v6272_v25  ;;  %v846_v28 = vpop.f32.mrb[74].mxu0  ;;  %v1272_v29 = vpack.c.bf16 %v1180_v16, %v1178_v15 }
 0x199   : > { %v1053_v30 = vmul.f32 0.01, %v843_v20  ;;  %v847_v31 = vadd.f32 %v846_v28, %v6269_v24  ;;  %v848_v32 = vpop.f32.mrb[75].mxu0 }
 0x19a   : > { %v1054_v33 = vmul.f32 0.01, %v845_v27  ;;  %v849_v34 = vadd.f32 %v848_v32, %v6272_v25  ;;  %1708 = vmatprep.mubr.bf16.mxu1 %v1272_v29 }
 0x19b   : > { %v1055_v35 = vmul.f32 0.01, %v847_v31  ;;  %1709 = vmatmul.mubr.bf16.gmra.mrb[68].mxu1 %v1271_v26  ;;  %v1181_v37 = vmax.f32 %v843_v20, %v1053_v30 }
 0x19c   : > { %v1056_v36 = vmul.f32 0.01, %v849_v34  ;;  %v1182_v39 = vmax.f32 %v845_v27, %v1054_v33 }
 0x19d   : > { %v1183_v38 = vmax.f32 %v847_v31, %v1055_v35 }
 0x19e   : > { %v1184_v40 = vmax.f32 %v849_v34, %v1056_v36  ;;  %v852_v41 = vpop.f32.mrb[76].mxu0 }
 0x19f   : > { %v853_v42 = vadd.f32 %v852_v41, %v6269_v24  ;;  %v854_v43 = vpop.f32.mrb[77].mxu0  ;;  %v1273_v44 = vpack.c.bf16 %v1183_v38, %v1181_v37 }
 0x1a0   : > { %v855_v45 = vadd.f32 %v854_v43, %v6272_v25  ;;  %v856_v46 = vpop.f32.mrb[78].mxu0  ;;  %v1274_v47 = vpack.c.bf16 %v1184_v40, %v1182_v39  ;;  %v5937_v39 = vld [vmem:[#allocation2 + $0x260] ss:$8 sps:$4 sm:$0xff]   ;;  %v5939_v40 = vld [vmem:[#allocation2 + $0x264] ss:$8 sps:$4 sm:$0xff]  }
 0x1a1   : > { %v1057_v48 = vmul.f32 0.01, %v853_v42  ;;  %v857_v49 = vadd.f32 %v856_v46, %v6269_v24  ;;  %v858_v50 = vpop.f32.mrb[79].mxu0  ;;  %3276 = vmatprep.subr.bf16.mxu1 %v5939_v40 }
 0x1a2   : > { %v1058_v51 = vmul.f32 0.01, %v855_v45  ;;  %v859_v52 = vadd.f32 %v858_v50, %v6272_v25  ;;  %1718 = vmatprep.mubr.bf16.mxu1 %v1274_v47  ;;  %3277 = vmatpush1.bf16.msra.mxu1 %v5937_v39 }
 0x1a3   : > { %v1059_v53 = vmul.f32 0.01, %v857_v49  ;;  %1719 = vmatmul.mubr.bf16.gmra.mrb[72].mxu1 %v1273_v44  ;;  %v1185_v55 = vmax.f32 %v853_v42, %v1057_v48 }
 0x1a4   : > { %v1060_v54 = vmul.f32 0.01, %v859_v52  ;;  %v1186_v57 = vmax.f32 %v855_v45, %v1058_v51 }
 0x1a5   : > { %v1187_v56 = vmax.f32 %v857_v49, %v1059_v53 }
 0x1a6   : > { %v1188_v58 = vmax.f32 %v859_v52, %v1060_v54  ;;  %v862_v59 = vpop.f32.mrb[80].mxu0 }
 0x1a7   : > { %v863_v62 = vadd.f32 %v862_v59, %v6269_v24  ;;  %v864_v63 = vpop.f32.mrb[81].mxu0  ;;  %v1275_v1 = vpack.c.bf16 %v1187_v56, %v1185_v55 }
 0x1a8   : > { %v865_v2 = vadd.f32 %v864_v63, %v6272_v25  ;;  %v866_v3 = vpop.f32.mrb[82].mxu0  ;;  %v1276_v4 = vpack.c.bf16 %v1188_v58, %v1186_v57 }
 0x1a9   : > { %v1061_v5 = vmul.f32 0.01, %v863_v62  ;;  %v867_v6 = vadd.f32 %v866_v3, %v6269_v24  ;;  %v868_v7 = vpop.f32.mrb[83].mxu0 }
 0x1aa   : > { %v1062_v8 = vmul.f32 0.01, %v865_v2  ;;  %v869_v9 = vadd.f32 %v868_v7, %v6272_v25  ;;  %1728 = vmatprep.mubr.bf16.mxu1 %v1276_v4 }
 0x1ab   : > { %v1063_v10 = vmul.f32 0.01, %v867_v6  ;;  %1729 = vmatmul.mubr.bf16.gmra.mrb[76].mxu1 %v1275_v1  ;;  %v1189_v12 = vmax.f32 %v863_v62, %v1061_v5 }
 0x1ac   : > { %v1064_v11 = vmul.f32 0.01, %v869_v9  ;;  %v1190_v14 = vmax.f32 %v865_v2, %v1062_v8 }
 0x1ad   : > { %v1191_v13 = vmax.f32 %v867_v6, %v1063_v10 }
 0x1ae   : > { %v1192_v15 = vmax.f32 %v869_v9, %v1064_v11  ;;  %v872_v16 = vpop.f32.mrb[84].mxu0 }
 0x1af   : > { %v873_v17 = vadd.f32 %v872_v16, %v6269_v24  ;;  %v874_v18 = vpop.f32.mrb[85].mxu0  ;;  %v1277_v19 = vpack.c.bf16 %v1191_v13, %v1189_v12 }
 0x1b0   : > { %v875_v20 = vadd.f32 %v874_v18, %v6272_v25  ;;  %v876_v22 = vpop.f32.mrb[86].mxu0  ;;  %v1278_v26 = vpack.c.bf16 %v1192_v15, %v1190_v14  ;;  %v5940_v14 = vld [vmem:[#allocation2 + $0x270] ss:$8 sps:$4 sm:$0xff]   ;;  %v5942_v15 = vld [vmem:[#allocation2 + $0x274] ss:$8 sps:$4 sm:$0xff]  }
 0x1b1   : > { %v1065_v27 = vmul.f32 0.01, %v873_v17  ;;  %v877_v28 = vadd.f32 %v876_v22, %v6269_v24  ;;  %v878_v29 = vpop.f32.mrb[87].mxu0  ;;  %3278 = vmatprep.subr.bf16.mxu1 %v5942_v15 }
 0x1b2   : > { %v1066_v30 = vmul.f32 0.01, %v875_v20  ;;  %v879_v31 = vadd.f32 %v878_v29, %v6272_v25  ;;  %1738 = vmatprep.mubr.bf16.mxu1 %v1278_v26  ;;  %3279 = vmatpush1.bf16.msra.mxu1 %v5940_v14 }
 0x1b3   : > { %v1067_v32 = vmul.f32 0.01, %v877_v28  ;;  %1739 = vmatmul.mubr.bf16.gmra.mrb[80].mxu1 %v1277_v19  ;;  %v1193_v34 = vmax.f32 %v873_v17, %v1065_v27 }
 0x1b4   : > { %v1068_v33 = vmul.f32 0.01, %v879_v31  ;;  %v1194_v36 = vmax.f32 %v875_v20, %v1066_v30 }
 0x1b5   : > { %v1195_v35 = vmax.f32 %v877_v28, %v1067_v32 }
 0x1b6   : > { %v1196_v37 = vmax.f32 %v879_v31, %v1068_v33  ;;  %v882_v38 = vpop.f32.mrb[88].mxu0 }
 0x1b7   : > { %v883_v41 = vadd.f32 %v882_v38, %v6269_v24  ;;  %v884_v42 = vpop.f32.mrb[89].mxu0  ;;  %v1279_v43 = vpack.c.bf16 %v1195_v35, %v1193_v34 }
 0x1b8   : > { %v885_v44 = vadd.f32 %v884_v42, %v6272_v25  ;;  %v886_v45 = vpop.f32.mrb[90].mxu0  ;;  %v1280_v46 = vpack.c.bf16 %v1196_v37, %v1194_v36 }
 0x1b9   : > { %v1069_v47 = vmul.f32 0.01, %v883_v41  ;;  %v887_v48 = vadd.f32 %v886_v45, %v6269_v24  ;;  %v888_v49 = vpop.f32.mrb[91].mxu0 }
 0x1ba   : > { %v1070_v50 = vmul.f32 0.01, %v885_v44  ;;  %v889_v51 = vadd.f32 %v888_v49, %v6272_v25  ;;  %1748 = vmatprep.mubr.bf16.mxu1 %v1280_v46 }
 0x1bb   : > { %v1071_v52 = vmul.f32 0.01, %v887_v48  ;;  %1749 = vmatmul.mubr.bf16.gmra.mrb[84].mxu1 %v1279_v43  ;;  %v1197_v54 = vmax.f32 %v883_v41, %v1069_v47 }
 0x1bc   : > { %v1072_v53 = vmul.f32 0.01, %v889_v51  ;;  %v1198_v56 = vmax.f32 %v885_v44, %v1070_v50 }
 0x1bd   : > { %v1199_v55 = vmax.f32 %v887_v48, %v1071_v52 }
 0x1be   : > { %v1200_v57 = vmax.f32 %v889_v51, %v1072_v53  ;;  %v892_v58 = vpop.f32.mrb[92].mxu0 }
 0x1bf   : > { %v893_v59 = vadd.f32 %v892_v58, %v6269_v24  ;;  %v894_v60 = vpop.f32.mrb[93].mxu0  ;;  %v1281_v61 = vpack.c.bf16 %v1199_v55, %v1197_v54 }
 0x1c0   : > { %v895_v62 = vadd.f32 %v894_v60, %v6272_v25  ;;  %v896_v63 = vpop.f32.mrb[94].mxu0  ;;  %v1282_v1 = vpack.c.bf16 %v1200_v57, %v1198_v56  ;;  %v5943_v56 = vld [vmem:[#allocation2 + $0x280] ss:$8 sps:$4 sm:$0xff]   ;;  %v5945_v57 = vld [vmem:[#allocation2 + $0x284] ss:$8 sps:$4 sm:$0xff]  }
 0x1c1   : > { %v1073_v2 = vmul.f32 0.01, %v893_v59  ;;  %v897_v3 = vadd.f32 %v896_v63, %v6269_v24  ;;  %v898_v4 = vpop.f32.mrb[95].mxu0  ;;  %3280 = vmatprep.subr.bf16.mxu1 %v5945_v57 }
 0x1c2   : > { %v1074_v5 = vmul.f32 0.01, %v895_v62  ;;  %v899_v6 = vadd.f32 %v898_v4, %v6272_v25  ;;  %1758 = vmatprep.mubr.bf16.mxu1 %v1282_v1  ;;  %3281 = vmatpush1.bf16.msra.mxu1 %v5943_v56 }
 0x1c3   : > { %v1075_v7 = vmul.f32 0.01, %v897_v3  ;;  %1759 = vmatmul.mubr.bf16.gmra.mrb[88].mxu1 %v1281_v61  ;;  %v1201_v9 = vmax.f32 %v893_v59, %v1073_v2 }
 0x1c4   : > { %v1076_v8 = vmul.f32 0.01, %v899_v6  ;;  %v1202_v11 = vmax.f32 %v895_v62, %v1074_v5 }
 0x1c5   : > { %v1203_v10 = vmax.f32 %v897_v3, %v1075_v7 }
 0x1c6   : > { %v1204_v12 = vmax.f32 %v899_v6, %v1076_v8  ;;  %v902_v13 = vpop.f32.mrb[96].mxu0 }
 0x1c7   : > { %v903_v16 = vadd.f32 %v902_v13, %v6269_v24  ;;  %v904_v17 = vpop.f32.mrb[97].mxu0  ;;  %v1283_v18 = vpack.c.bf16 %v1203_v10, %v1201_v9 }
 0x1c8   : > { %v905_v19 = vadd.f32 %v904_v17, %v6272_v25  ;;  %v906_v20 = vpop.f32.mrb[98].mxu0  ;;  %v1284_v22 = vpack.c.bf16 %v1204_v12, %v1202_v11 }
 0x1c9   : > { %v1077_v26 = vmul.f32 0.01, %v903_v16  ;;  %v907_v27 = vadd.f32 %v906_v20, %v6269_v24  ;;  %v908_v28 = vpop.f32.mrb[99].mxu0 }
 0x1ca   : > { %v1078_v29 = vmul.f32 0.01, %v905_v19  ;;  %v909_v30 = vadd.f32 %v908_v28, %v6272_v25  ;;  %1768 = vmatprep.mubr.bf16.mxu1 %v1284_v22 }
 0x1cb   : > { %v1079_v31 = vmul.f32 0.01, %v907_v27  ;;  %1769 = vmatmul.mubr.bf16.gmra.mrb[92].mxu1 %v1283_v18  ;;  %v1205_v33 = vmax.f32 %v903_v16, %v1077_v26 }
 0x1cc   : > { %v1080_v32 = vmul.f32 0.01, %v909_v30  ;;  %v1206_v35 = vmax.f32 %v905_v19, %v1078_v29  ;;  %v5580_v19 = vld [vmem:[%s7313_s4 + $0x1] ss:$8 sm:$0x3] }
 0x1cd   : > { %v1207_v34 = vmax.f32 %v907_v27, %v1079_v31 }
 0x1ce   : > { %v1208_v36 = vmax.f32 %v909_v30, %v1080_v32  ;;  %v912_v37 = vpop.f32.mrb[100].mxu0  ;;  %v6405_v30 = vrot.slane %v5580_v19, %v6260_v21  ;;  %v6408_v32 = vrot.slane %v5580_v19, %v6265_v23 }
 0x1cf   : > { %v913_v38 = vadd.f32 %v912_v37, %v6269_v24  ;;  %v914_v39 = vpop.f32.mrb[101].mxu0  ;;  %v1285_v40 = vpack.c.bf16 %v1207_v34, %v1205_v33 }
 0x1d0   : > { %v915_v41 = vadd.f32 %v914_v39, %v6272_v25  ;;  %v916_v42 = vpop.f32.mrb[102].mxu0  ;;  %v1286_v43 = vpack.c.bf16 %v1208_v36, %v1206_v35  ;;  %v5946_v39 = vld [vmem:[#allocation2 + $0x290] ss:$8 sps:$4 sm:$0xff]  }
 0x1d1   : > { %v1081_v44 = vmul.f32 0.01, %v913_v38  ;;  %v917_v45 = vadd.f32 %v916_v42, %v6269_v24  ;;  %v918_v46 = vpop.f32.mrb[103].mxu0 }
 0x1d2   : > { %v1082_v47 = vmul.f32 0.01, %v915_v41  ;;  %v919_v48 = vadd.f32 %v918_v46, %v6272_v25  ;;  %1778 = vmatprep.mubr.bf16.mxu1 %v1286_v43 }
 0x1d3   : > { %v1083_v49 = vmul.f32 0.01, %v917_v45  ;;  %1779 = vmatmul.mubr.bf16.gmra.mrb[96].mxu1 %v1285_v40  ;;  %v1209_v51 = vmax.f32 %v913_v38, %v1081_v44  ;;  %v5948_v40 = vld [vmem:[#allocation2 + $0x294] ss:$8 sps:$4 sm:$0xff]  }
 0x1d4   : > { %v1084_v50 = vmul.f32 0.01, %v919_v48  ;;  %v1210_v53 = vmax.f32 %v915_v41, %v1082_v47  ;;  %3282 = vmatprep.subr.bf16.mxu1 %v5948_v40 }
 0x1d5   : > { %v1211_v52 = vmax.f32 %v917_v45, %v1083_v49  ;;  %3283 = vmatpush1.bf16.msra.mxu1 %v5946_v39 }
 0x1d6   : > { %v1212_v54 = vmax.f32 %v919_v48, %v1084_v50  ;;  %v922_v55 = vpop.f32.mrb[104].mxu0 }
 0x1d7   : > { %v923_v58 = vadd.f32 %v922_v55, %v6269_v24  ;;  %v924_v59 = vpop.f32.mrb[105].mxu0  ;;  %v1287_v60 = vpack.c.bf16 %v1211_v52, %v1209_v51 }
 0x1d8   : > { %v925_v61 = vadd.f32 %v924_v59, %v6272_v25  ;;  %v926_v62 = vpop.f32.mrb[106].mxu0  ;;  %v1288_v63 = vpack.c.bf16 %v1212_v54, %v1210_v53 }
 0x1d9   : > { %v1085_v1 = vmul.f32 0.01, %v923_v58  ;;  %v927_v2 = vadd.f32 %v926_v62, %v6269_v24  ;;  %v928_v3 = vpop.f32.mrb[107].mxu0 }
 0x1da   : > { %v1086_v4 = vmul.f32 0.01, %v925_v61  ;;  %v929_v5 = vadd.f32 %v928_v3, %v6272_v25  ;;  %1788 = vmatprep.mubr.bf16.mxu1 %v1288_v63 }
 0x1db   : > { %v1087_v6 = vmul.f32 0.01, %v927_v2  ;;  %1789 = vmatmul.mubr.bf16.gmra.mrb[100].mxu1 %v1287_v60  ;;  %v1213_v8 = vmax.f32 %v923_v58, %v1085_v1 }
 0x1dc   : > { %v1088_v7 = vmul.f32 0.01, %v929_v5  ;;  %v1214_v10 = vmax.f32 %v925_v61, %v1086_v4 }
 0x1dd   : > { %v1215_v9 = vmax.f32 %v927_v2, %v1087_v6 }
 0x1de   : > { %v1216_v11 = vmax.f32 %v929_v5, %v1088_v7  ;;  %v932_v12 = vpop.f32.mrb[108].mxu0 }
 0x1df   : > { %v933_v13 = vadd.f32 %v932_v12, %v6269_v24  ;;  %v934_v14 = vpop.f32.mrb[109].mxu0  ;;  %v1289_v15 = vpack.c.bf16 %v1215_v9, %v1213_v8 }
 0x1e0   : > { %v935_v16 = vadd.f32 %v934_v14, %v6272_v25  ;;  %v936_v17 = vpop.f32.mrb[110].mxu0  ;;  %v1290_v18 = vpack.c.bf16 %v1216_v11, %v1214_v10 }
 0x1e1   : > { %v1089_v20 = vmul.f32 0.01, %v933_v13  ;;  %v937_v22 = vadd.f32 %v936_v17, %v6269_v24  ;;  %v938_v26 = vpop.f32.mrb[111].mxu0 }
 0x1e2   : > { %v1090_v27 = vmul.f32 0.01, %v935_v16  ;;  %v939_v28 = vadd.f32 %v938_v26, %v6272_v25  ;;  %1798 = vmatprep.mubr.bf16.mxu1 %v1290_v18 }
 0x1e3   : > { %v1091_v29 = vmul.f32 0.01, %v937_v22  ;;  %1799 = vmatmul.mubr.bf16.gmra.mrb[104].mxu1 %v1289_v15  ;;  %v1217_v33 = vmax.f32 %v933_v13, %v1089_v20 }
 0x1e4   : > { %v1092_v31 = vmul.f32 0.01, %v939_v28  ;;  %v1218_v35 = vmax.f32 %v935_v16, %v1090_v27 }
 0x1e5   : > { %v1219_v34 = vmax.f32 %v937_v22, %v1091_v29 }
 0x1e6   : > { %v1220_v36 = vmax.f32 %v939_v28, %v1092_v31  ;;  %v942_v37 = vpop.f32.mrb[112].mxu0  ;;  %v1540_v38 = vpop.f32.mrb[0].mxu1 }
 0x1e7   : > { %v943_v41 = vadd.f32 %v942_v37, %v6269_v24  ;;  %v1541_v42 = vadd.f32 %v1540_v38, %v6405_v30  ;;  %v944_v43 = vpop.f32.mrb[113].mxu0  ;;  %v1542_v44 = vpop.f32.mrb[1].mxu1  ;;  %v1291_v45 = vpack.c.bf16 %v1219_v34, %v1217_v33 }
 0x1e8   : > { %v945_v46 = vadd.f32 %v944_v43, %v6272_v25  ;;  %v1543_v47 = vadd.f32 %v1542_v44, %v6408_v32  ;;  %v946_v48 = vpop.f32.mrb[114].mxu0  ;;  %v1544_v49 = vpop.f32.mrb[2].mxu1  ;;  %v1292_v50 = vpack.c.bf16 %v1220_v36, %v1218_v35 }
 0x1e9   : > { %v1093_v51 = vmul.f32 0.01, %v943_v41  ;;  %v1859_v52 = vmul.f32 0.01, %v1541_v42  ;;  %v947_v53 = vadd.f32 %v946_v48, %v6269_v24  ;;  %v1545_v54 = vadd.f32 %v1544_v49, %v6405_v30  ;;  %v948_v55 = vpop.f32.mrb[115].mxu0  ;;  %v1546_v56 = vpop.f32.mrb[3].mxu1 }
 0x1ea   : > { %v1094_v57 = vmul.f32 0.01, %v945_v46  ;;  %v1860_v58 = vmul.f32 0.01, %v1543_v47  ;;  %v949_v59 = vadd.f32 %v948_v55, %v6272_v25  ;;  %v1547_v60 = vadd.f32 %v1546_v56, %v6408_v32  ;;  %1808 = vmatprep.mubr.bf16.mxu1 %v1292_v50  ;;  %v5951_v55 = vld [vmem:[#allocation2 + $0x2a4] ss:$8 sps:$4 sm:$0xff]  }
 0x1eb   : > { %v1095_v61 = vmul.f32 0.01, %v947_v53  ;;  %v1861_v62 = vmul.f32 0.01, %v1545_v54  ;;  %1809 = vmatmul.mubr.bf16.gmra.mrb[108].mxu1 %v1291_v45  ;;  %v1221_v2 = vmax.f32 %v943_v41, %v1093_v51  ;;  %v1987_v3 = vmax.f32 %v1541_v42, %v1859_v52  ;;  %3284 = vmatprep.subr.bf16.mxu1 %v5951_v55 }
 0x1ec   : > { %v1096_v63 = vmul.f32 0.01, %v949_v59  ;;  %v1862_v1 = vmul.f32 0.01, %v1547_v60  ;;  %v1222_v6 = vmax.f32 %v945_v46, %v1094_v57  ;;  %v1988_v7 = vmax.f32 %v1543_v47, %v1860_v58 }
 0x1ed   : > { %v1223_v4 = vmax.f32 %v947_v53, %v1095_v61  ;;  %v1989_v5 = vmax.f32 %v1545_v54, %v1861_v62  ;;  %v5949_v54 = vld [vmem:[#allocation2 + $0x2a0] ss:$8 sps:$4 sm:$0xff]  }
 0x1ee   : > { %v1224_v8 = vmax.f32 %v949_v59, %v1096_v63  ;;  %v1990_v9 = vmax.f32 %v1547_v60, %v1862_v1  ;;  %v952_v10 = vpop.f32.mrb[116].mxu0  ;;  %v1550_v11 = vpop.f32.mrb[4].mxu1  ;;  %3285 = vmatpush1.bf16.msra.mxu1 %v5949_v54 }
 0x1ef   : > { %v2115_v12 = vpack.c.bf16 %v1989_v5, %v1987_v3  ;;  %v953_v13 = vadd.f32 %v952_v10, %v6269_v24  ;;  %v1551_v14 = vadd.f32 %v1550_v11, %v6405_v30  ;;  %v954_v15 = vpop.f32.mrb[117].mxu0  ;;  %v1552_v16 = vpop.f32.mrb[5].mxu1  ;;  %v1293_v17 = vpack.c.bf16 %v1223_v4, %v1221_v2 }
 0x1f0   : > { %v955_v18 = vadd.f32 %v954_v15, %v6272_v25  ;;  %v1553_v19 = vadd.f32 %v1552_v16, %v6408_v32  ;;  %v956_v20 = vpop.f32.mrb[118].mxu0  ;;  %v1554_v22 = vpop.f32.mrb[6].mxu1  ;;  %v1294_v26 = vpack.c.bf16 %v1224_v8, %v1222_v6  ;;  %v2116_v27 = vpack.c.bf16 %v1990_v9, %v1988_v7 }
 0x1f1   : > { %v1097_v28 = vmul.f32 0.01, %v953_v13  ;;  %v1863_v29 = vmul.f32 0.01, %v1551_v14  ;;  %v957_v31 = vadd.f32 %v956_v20, %v6269_v24  ;;  %v1555_v33 = vadd.f32 %v1554_v22, %v6405_v30  ;;  %v958_v34 = vpop.f32.mrb[119].mxu0  ;;  %v1556_v35 = vpop.f32.mrb[7].mxu1 }
 0x1f2   : > { %v1098_v36 = vmul.f32 0.01, %v955_v18  ;;  %v1864_v37 = vmul.f32 0.01, %v1553_v19  ;;  %v959_v38 = vadd.f32 %v958_v34, %v6272_v25  ;;  %v1557_v39 = vadd.f32 %v1556_v35, %v6408_v32  ;;  %1818 = vmatprep.mubr.bf16.mxu1 %v1294_v26  ;;  %2417 = vmatprep.mubr.bf16.mxu0 %v2116_v27 }
 0x1f3   : > { %v1099_v40 = vmul.f32 0.01, %v957_v31  ;;  %v1865_v41 = vmul.f32 0.01, %v1555_v33  ;;  %1819 = vmatmul.mubr.bf16.gmra.mrb[112].mxu1 %v1293_v17  ;;  %2418 = vmatmul.mubr.bf16.vlgmr.msra.gmra.mrb[128].mxu0 %v2115_v12  ;;  %v1225_v44 = vmax.f32 %v953_v13, %v1097_v28  ;;  %v1991_v45 = vmax.f32 %v1551_v14, %v1863_v29 }
 0x1f4   : > { %v1100_v42 = vmul.f32 0.01, %v959_v38  ;;  %v1866_v43 = vmul.f32 0.01, %v1557_v39  ;;  %v1226_v48 = vmax.f32 %v955_v18, %v1098_v36  ;;  %v1992_v49 = vmax.f32 %v1553_v19, %v1864_v37 }
 0x1f5   : > { %v1227_v46 = vmax.f32 %v957_v31, %v1099_v40  ;;  %v1993_v47 = vmax.f32 %v1555_v33, %v1865_v41 }
 0x1f6   : > { %v1228_v50 = vmax.f32 %v959_v38, %v1100_v42  ;;  %v1994_v51 = vmax.f32 %v1557_v39, %v1866_v43  ;;  %v962_v52 = vpop.f32.mrb[120].mxu0  ;;  %v1560_v53 = vpop.f32.mrb[8].mxu1 }
 0x1f7   : > { %v963_v56 = vadd.f32 %v962_v52, %v6269_v24  ;;  %v1561_v57 = vadd.f32 %v1560_v53, %v6405_v30  ;;  %v964_v58 = vpop.f32.mrb[121].mxu0  ;;  %v1562_v59 = vpop.f32.mrb[9].mxu1  ;;  %v1295_v60 = vpack.c.bf16 %v1227_v46, %v1225_v44  ;;  %v2117_v61 = vpack.c.bf16 %v1993_v47, %v1991_v45 }
 0x1f8   : > { %v965_v62 = vadd.f32 %v964_v58, %v6272_v25  ;;  %v1563_v63 = vadd.f32 %v1562_v59, %v6408_v32  ;;  %v966_v1 = vpop.f32.mrb[122].mxu0  ;;  %v1564_v2 = vpop.f32.mrb[10].mxu1  ;;  %v1296_v3 = vpack.c.bf16 %v1228_v50, %v1226_v48  ;;  %v2118_v4 = vpack.c.bf16 %v1994_v51, %v1992_v49 }
 0x1f9   : > { %v1101_v5 = vmul.f32 0.01, %v963_v56  ;;  %v1867_v6 = vmul.f32 0.01, %v1561_v57  ;;  %v967_v7 = vadd.f32 %v966_v1, %v6269_v24  ;;  %v1565_v8 = vadd.f32 %v1564_v2, %v6405_v30  ;;  %v968_v9 = vpop.f32.mrb[123].mxu0  ;;  %v1566_v10 = vpop.f32.mrb[11].mxu1 }
 0x1fa   : > { %v1102_v11 = vmul.f32 0.01, %v965_v62  ;;  %v1868_v12 = vmul.f32 0.01, %v1563_v63  ;;  %v969_v13 = vadd.f32 %v968_v9, %v6272_v25  ;;  %v1567_v14 = vadd.f32 %v1566_v10, %v6408_v32  ;;  %1828 = vmatprep.mubr.bf16.mxu1 %v1296_v3  ;;  %2427 = vmatprep.mubr.bf16.mxu0 %v2118_v4 }
 0x1fb   : > { %v1103_v15 = vmul.f32 0.01, %v967_v7  ;;  %v1869_v16 = vmul.f32 0.01, %v1565_v8  ;;  %1829 = vmatmul.mubr.bf16.gmra.mrb[116].mxu1 %v1295_v60  ;;  %2428 = vmatmul.mubr.bf16.gmra.mrb[132].mxu0 %v2117_v61  ;;  %v1229_v19 = vmax.f32 %v963_v56, %v1101_v5  ;;  %v1995_v20 = vmax.f32 %v1561_v57, %v1867_v6  ;;  %v5954_v6 = vld [vmem:[#allocation2 + $0x2b4] ss:$8 sps:$4 sm:$0xff]  }
 0x1fc   : > { %v1104_v17 = vmul.f32 0.01, %v969_v13  ;;  %v1870_v18 = vmul.f32 0.01, %v1567_v14  ;;  %v1230_v27 = vmax.f32 %v965_v62, %v1102_v11  ;;  %v1996_v28 = vmax.f32 %v1563_v63, %v1868_v12  ;;  %3286 = vmatprep.subr.bf16.mxu1 %v5954_v6 }
 0x1fd   : > { %v1231_v22 = vmax.f32 %v967_v7, %v1103_v15  ;;  %v1997_v26 = vmax.f32 %v1565_v8, %v1869_v16 }
 0x1fe   : > { %v1232_v29 = vmax.f32 %v969_v13, %v1104_v17  ;;  %v1998_v31 = vmax.f32 %v1567_v14, %v1870_v18  ;;  %v972_v33 = vpop.f32.mrb[124].mxu0  ;;  %v1570_v34 = vpop.f32.mrb[12].mxu1 }
 0x1ff   : > { %v973_v35 = vadd.f32 %v972_v33, %v6269_v24  ;;  %v1571_v36 = vadd.f32 %v1570_v34, %v6405_v30  ;;  %v974_v37 = vpop.f32.mrb[125].mxu0  ;;  %v1572_v38 = vpop.f32.mrb[13].mxu1  ;;  %v1297_v39 = vpack.c.bf16 %v1231_v22, %v1229_v19  ;;  %v2119_v40 = vpack.c.bf16 %v1997_v26, %v1995_v20 }
 0x200   : > { %v975_v41 = vadd.f32 %v974_v37, %v6272_v25  ;;  %v1573_v42 = vadd.f32 %v1572_v38, %v6408_v32  ;;  %v976_v43 = vpop.f32.mrb[126].mxu0  ;;  %v1574_v44 = vpop.f32.mrb[14].mxu1  ;;  %v1298_v45 = vpack.c.bf16 %v1232_v29, %v1230_v27  ;;  %v2120_v46 = vpack.c.bf16 %v1998_v31, %v1996_v28 }
 0x201   : > { %v1105_v47 = vmul.f32 0.01, %v973_v35  ;;  %v1871_v48 = vmul.f32 0.01, %v1571_v36  ;;  %v977_v49 = vadd.f32 %v976_v43, %v6269_v24  ;;  %v1575_v50 = vadd.f32 %v1574_v44, %v6405_v30  ;;  %v978_v51 = vpop.f32.mrb[127].mxu0  ;;  %v1576_v52 = vpop.f32.mrb[15].mxu1 }
 0x202   : > { %v1106_v53 = vmul.f32 0.01, %v975_v41  ;;  %v1872_v54 = vmul.f32 0.01, %v1573_v42  ;;  %v979_v55 = vadd.f32 %v978_v51, %v6272_v25  ;;  %v1577_v56 = vadd.f32 %v1576_v52, %v6408_v32  ;;  %1838 = vmatprep.mubr.bf16.mxu1 %v1298_v45  ;;  %2437 = vmatprep.mubr.bf16.mxu0 %v2120_v46  ;;  %v5952_v25 = vld [vmem:[#allocation2 + $0x2b0] ss:$8 sps:$4 sm:$0xff]  }
 0x203   : > { %v1107_v57 = vmul.f32 0.01, %v977_v49  ;;  %v1873_v58 = vmul.f32 0.01, %v1575_v50  ;;  %1839 = vmatmul.mubr.bf16.gmra.mrb[120].mxu1 %v1297_v39  ;;  %2438 = vmatmul.mubr.bf16.gmra.mrb[136].mxu0 %v2119_v40  ;;  %v1233_v61 = vmax.f32 %v973_v35, %v1105_v47  ;;  %v1999_v24 = vmax.f32 %v1571_v36, %v1871_v48  ;;  %v5955_v51 = vld [vmem:[#allocation2 + $0x2c0] ss:$8 sps:$4 sm:$0xff]  }
 0x204   : > { %v1108_v59 = vmul.f32 0.01, %v979_v55  ;;  %v1874_v60 = vmul.f32 0.01, %v1577_v56  ;;  %v1234_v1 = vmax.f32 %v975_v41, %v1106_v53  ;;  %v2000_v2 = vmax.f32 %v1573_v42, %v1872_v54  ;;  %3287 = vmatpush1.bf16.msra.mxu1 %v5952_v25  ;;  %v5957_v52 = vld [vmem:[#allocation2 + $0x2c4] ss:$8 sps:$4 sm:$0xff]  }
 0x205   : > { %v1235_v62 = vmax.f32 %v977_v49, %v1107_v57  ;;  %v2001_v63 = vmax.f32 %v1575_v50, %v1873_v58  ;;  %3288 = vmatprep.subr.bf16.mxu1 %v5957_v52 }
 0x206   : > { %v1236_v3 = vmax.f32 %v979_v55, %v1108_v59  ;;  %v2002_v4 = vmax.f32 %v1577_v56, %v1874_v60  ;;  %v1580_v5 = vpop.f32.mrb[16].mxu1 }
 0x207   : > { %v1581_v7 = vadd.f32 %v1580_v5, %v6405_v30  ;;  %v1582_v8 = vpop.f32.mrb[17].mxu1  ;;  %v1299_v9 = vpack.c.bf16 %v1235_v62, %v1233_v61  ;;  %v2121_v10 = vpack.c.bf16 %v2001_v63, %v1999_v24 }
 0x208   : > { %v1583_v11 = vadd.f32 %v1582_v8, %v6408_v32  ;;  %v1584_v12 = vpop.f32.mrb[18].mxu1  ;;  %v1300_v13 = vpack.c.bf16 %v1236_v3, %v1234_v1  ;;  %v2122_v14 = vpack.c.bf16 %v2002_v4, %v2000_v2  ;;  %3289 = vmatpush1.bf16.msra.mxu1 %v5955_v51 }
 0x209   : > { %v1875_v15 = vmul.f32 0.01, %v1581_v7  ;;  %v1585_v16 = vadd.f32 %v1584_v12, %v6405_v30  ;;  %v1586_v17 = vpop.f32.mrb[19].mxu1 }
 0x20a   : > { %v1876_v18 = vmul.f32 0.01, %v1583_v11  ;;  %v1587_v19 = vadd.f32 %v1586_v17, %v6408_v32  ;;  %1848 = vmatprep.mubr.bf16.mxu1 %v1300_v13  ;;  %2447 = vmatprep.mubr.bf16.mxu0 %v2122_v14 }
 0x20b   : > { %v1877_v20 = vmul.f32 0.01, %v1585_v16  ;;  %1849 = vmatmul.mubr.bf16.gmra.mrb[124].mxu1 %v1299_v9  ;;  %2448 = vmatmul.mubr.bf16.gmra.mrb[140].mxu0 %v2121_v10  ;;  %v2003_v26 = vmax.f32 %v1581_v7, %v1875_v15 }
 0x20c   : > { %v1878_v22 = vmul.f32 0.01, %v1587_v19  ;;  %v2004_v28 = vmax.f32 %v1583_v11, %v1876_v18 }
 0x20d   : > { %v2005_v27 = vmax.f32 %v1585_v16, %v1877_v20 }
 0x20e   : > { %v2006_v29 = vmax.f32 %v1587_v19, %v1878_v22  ;;  %v1590_v31 = vpop.f32.mrb[20].mxu1 }
 0x20f   : > { %v1591_v33 = vadd.f32 %v1590_v31, %v6405_v30  ;;  %v1592_v34 = vpop.f32.mrb[21].mxu1  ;;  %v2123_v35 = vpack.c.bf16 %v2005_v27, %v2003_v26 }
 0x210   : > { %v1593_v36 = vadd.f32 %v1592_v34, %v6408_v32  ;;  %v1594_v37 = vpop.f32.mrb[22].mxu1  ;;  %v2124_v38 = vpack.c.bf16 %v2006_v29, %v2004_v28  ;;  %v5958_v28 = vld [vmem:[#allocation2 + $0x2d0] ss:$8 sps:$4 sm:$0xff]   ;;  %v5960_v29 = vld [vmem:[#allocation2 + $0x2d4] ss:$8 sps:$4 sm:$0xff]  }
 0x211   : > { %v1879_v39 = vmul.f32 0.01, %v1591_v33  ;;  %v1595_v40 = vadd.f32 %v1594_v37, %v6405_v30  ;;  %v1596_v41 = vpop.f32.mrb[23].mxu1  ;;  %3290 = vmatprep.subr.bf16.mxu1 %v5960_v29 }
 0x212   : > { %v1880_v42 = vmul.f32 0.01, %v1593_v36  ;;  %v1597_v43 = vadd.f32 %v1596_v41, %v6408_v32  ;;  %2457 = vmatprep.mubr.bf16.mxu0 %v2124_v38  ;;  %3291 = vmatpush1.bf16.msra.mxu1 %v5958_v28 }
 0x213   : > { %v1881_v44 = vmul.f32 0.01, %v1595_v40  ;;  %2458 = vmatmul.mubr.bf16.gmra.mrb[144].mxu0 %v2123_v35  ;;  %v2007_v46 = vmax.f32 %v1591_v33, %v1879_v39 }
 0x214   : > { %v1882_v45 = vmul.f32 0.01, %v1597_v43  ;;  %v2008_v48 = vmax.f32 %v1593_v36, %v1880_v42 }
 0x215   : > { %v2009_v47 = vmax.f32 %v1595_v40, %v1881_v44 }
 0x216   : > { %v2010_v49 = vmax.f32 %v1597_v43, %v1882_v45  ;;  %v1600_v50 = vpop.f32.mrb[24].mxu1 }
 0x217   : > { %v1601_v53 = vadd.f32 %v1600_v50, %v6405_v30  ;;  %v1602_v54 = vpop.f32.mrb[25].mxu1  ;;  %v2125_v55 = vpack.c.bf16 %v2009_v47, %v2007_v46 }
 0x218   : > { %v1603_v56 = vadd.f32 %v1602_v54, %v6408_v32  ;;  %v1604_v57 = vpop.f32.mrb[26].mxu1  ;;  %v2126_v58 = vpack.c.bf16 %v2010_v49, %v2008_v48 }
 0x219   : > { %v1883_v59 = vmul.f32 0.01, %v1601_v53  ;;  %v1605_v60 = vadd.f32 %v1604_v57, %v6405_v30  ;;  %v1606_v61 = vpop.f32.mrb[27].mxu1 }
 0x21a   : > { %v1884_v24 = vmul.f32 0.01, %v1603_v56  ;;  %v1607_v62 = vadd.f32 %v1606_v61, %v6408_v32  ;;  %2467 = vmatprep.mubr.bf16.mxu0 %v2126_v58 }
 0x21b   : > { %v1885_v63 = vmul.f32 0.01, %v1605_v60  ;;  %2468 = vmatmul.mubr.bf16.gmra.mrb[148].mxu0 %v2125_v55  ;;  %v2011_v2 = vmax.f32 %v1601_v53, %v1883_v59 }
 0x21c   : > { %v1886_v1 = vmul.f32 0.01, %v1607_v62  ;;  %v2012_v4 = vmax.f32 %v1603_v56, %v1884_v24 }
 0x21d   : > { %v2013_v3 = vmax.f32 %v1605_v60, %v1885_v63 }
 0x21e   : > { %v2014_v5 = vmax.f32 %v1607_v62, %v1886_v1  ;;  %v1610_v25 = vpop.f32.mrb[28].mxu1 }
 0x21f   : > { %v1611_v6 = vadd.f32 %v1610_v25, %v6405_v30  ;;  %v1612_v7 = vpop.f32.mrb[29].mxu1  ;;  %v2127_v8 = vpack.c.bf16 %v2013_v3, %v2011_v2 }
 0x220   : > { %v1613_v9 = vadd.f32 %v1612_v7, %v6408_v32  ;;  %v1614_v10 = vpop.f32.mrb[30].mxu1  ;;  %v2128_v11 = vpack.c.bf16 %v2014_v5, %v2012_v4  ;;  %v5961_v4 = vld [vmem:[#allocation2 + $0x2e0] ss:$8 sps:$4 sm:$0xff]   ;;  %v5963_v5 = vld [vmem:[#allocation2 + $0x2e4] ss:$8 sps:$4 sm:$0xff]  }
 0x221   : > { %v1887_v12 = vmul.f32 0.01, %v1611_v6  ;;  %v1615_v13 = vadd.f32 %v1614_v10, %v6405_v30  ;;  %v1616_v14 = vpop.f32.mrb[31].mxu1  ;;  %3292 = vmatprep.subr.bf16.mxu1 %v5963_v5 }
 0x222   : > { %v1888_v15 = vmul.f32 0.01, %v1613_v9  ;;  %v1617_v16 = vadd.f32 %v1616_v14, %v6408_v32  ;;  %2477 = vmatprep.mubr.bf16.mxu0 %v2128_v11  ;;  %3293 = vmatpush1.bf16.msra.mxu1 %v5961_v4 }
 0x223   : > { %v1889_v17 = vmul.f32 0.01, %v1615_v13  ;;  %2478 = vmatmul.mubr.bf16.gmra.mrb[152].mxu0 %v2127_v8  ;;  %v2015_v19 = vmax.f32 %v1611_v6, %v1887_v12  ;;  %v5964_v8 = vld [vmem:[#allocation2 + $0x300] ss:$8 sps:$4 sm:$0xff]  }
 0x224   : > { %v1890_v18 = vmul.f32 0.01, %v1617_v16  ;;  %v2016_v22 = vmax.f32 %v1613_v9, %v1888_v15  ;;  %v5966_v9 = vld [vmem:[#allocation2 + $0x304] ss:$8 sps:$4 sm:$0xff]  }
 0x225   : > { %v2017_v20 = vmax.f32 %v1615_v13, %v1889_v17  ;;  %4143 = vmatprep.subr.bf16.mxu0 %v5966_v9 }
 0x226   : > { %v2018_v26 = vmax.f32 %v1617_v16, %v1890_v18  ;;  %v1620_v27 = vpop.f32.mrb[32].mxu1  ;;  %4144 = vmatpush1.bf16.msra.mxu0 %v5964_v8 }
 0x227   : > { %v1621_v31 = vadd.f32 %v1620_v27, %v6405_v30  ;;  %v1622_v33 = vpop.f32.mrb[33].mxu1  ;;  %v2129_v34 = vpack.c.bf16 %v2017_v20, %v2015_v19 }
 0x228   : > { %v1623_v35 = vadd.f32 %v1622_v33, %v6408_v32  ;;  %v1624_v36 = vpop.f32.mrb[34].mxu1  ;;  %v2130_v37 = vpack.c.bf16 %v2018_v26, %v2016_v22 }
 0x229   : > { %v1891_v38 = vmul.f32 0.01, %v1621_v31  ;;  %v1625_v39 = vadd.f32 %v1624_v36, %v6405_v30  ;;  %v1626_v40 = vpop.f32.mrb[35].mxu1 }
 0x22a   : > { %v1892_v41 = vmul.f32 0.01, %v1623_v35  ;;  %v1627_v42 = vadd.f32 %v1626_v40, %v6408_v32  ;;  %2487 = vmatprep.mubr.bf16.mxu0 %v2130_v37 }
 0x22b   : > { %v1893_v43 = vmul.f32 0.01, %v1625_v39  ;;  %2488 = vmatmul.mubr.bf16.gmra.mrb[156].mxu0 %v2129_v34  ;;  %v2019_v45 = vmax.f32 %v1621_v31, %v1891_v38 }
 0x22c   : > { %v1894_v44 = vmul.f32 0.01, %v1627_v42  ;;  %v2020_v47 = vmax.f32 %v1623_v35, %v1892_v41 }
 0x22d   : > { %v2021_v46 = vmax.f32 %v1625_v39, %v1893_v43 }
 0x22e   : > { %v2022_v48 = vmax.f32 %v1627_v42, %v1894_v44  ;;  %v1630_v49 = vpop.f32.mrb[36].mxu1 }
 0x22f   : > { %v1631_v50 = vadd.f32 %v1630_v49, %v6405_v30  ;;  %v1632_v51 = vpop.f32.mrb[37].mxu1  ;;  %v2131_v52 = vpack.c.bf16 %v2021_v46, %v2019_v45  ;;  %v5967_v49 = vld [vmem:[#allocation2 + $0x2f0] ss:$8 sps:$4 sm:$0xff]  }
 0x230   : > { %v1633_v53 = vadd.f32 %v1632_v51, %v6408_v32  ;;  %v1634_v54 = vpop.f32.mrb[38].mxu1  ;;  %v2132_v55 = vpack.c.bf16 %v2022_v48, %v2020_v47 }
 0x231   : > { %v1895_v56 = vmul.f32 0.01, %v1631_v50  ;;  %v1635_v57 = vadd.f32 %v1634_v54, %v6405_v30  ;;  %v1636_v58 = vpop.f32.mrb[39].mxu1  ;;  %v5970_v54 = vld [vmem:[#allocation2 + $0x310] ss:$8 sps:$4 sm:$0xff]  }
 0x232   : > { %v1896_v59 = vmul.f32 0.01, %v1633_v53  ;;  %v1637_v60 = vadd.f32 %v1636_v58, %v6408_v32  ;;  %2497 = vmatprep.mubr.bf16.mxu0 %v2132_v55  ;;  %v5972_v55 = vld [vmem:[#allocation2 + $0x314] ss:$8 sps:$4 sm:$0xff]  }
 0x233   : > { %v1897_v61 = vmul.f32 0.01, %v1635_v57  ;;  %2498 = vmatmul.mubr.bf16.gmra.mrb[160].mxu0 %v2131_v52  ;;  %v2023_v62 = vmax.f32 %v1631_v50, %v1895_v56  ;;  %v5969_v50 = vld [vmem:[#allocation2 + $0x2f4] ss:$8 sps:$4 sm:$0xff]   ;;  %4145 = vmatprep.subr.bf16.mxu0 %v5972_v55 }
 0x234   : > { %v1898_v24 = vmul.f32 0.01, %v1637_v60  ;;  %v2024_v1 = vmax.f32 %v1633_v53, %v1896_v59  ;;  %3294 = vmatprep.subr.bf16.mxu1 %v5969_v50  ;;  %4146 = vmatpush1.bf16.msra.mxu0 %v5970_v54 }
 0x235   : > { %v2025_v63 = vmax.f32 %v1635_v57, %v1897_v61  ;;  %3295 = vmatpush1.bf16.msra.mxu1 %v5967_v49 }
 0x236   : > { %v2026_v2 = vmax.f32 %v1637_v60, %v1898_v24  ;;  %v1640_v3 = vpop.f32.mrb[40].mxu1  ;;  %5731 = vmatprep.subr.bf16.mxu1 %v6074_v0 }
 0x237   : > { %v1641_v25 = vadd.f32 %v1640_v3, %v6405_v30  ;;  %v1642_v6 = vpop.f32.mrb[41].mxu1  ;;  %v2133_v7 = vpack.c.bf16 %v2025_v63, %v2023_v62 }
 0x238   : > { %v1643_v10 = vadd.f32 %v1642_v6, %v6408_v32  ;;  %v1644_v11 = vpop.f32.mrb[42].mxu1  ;;  %v2134_v12 = vpack.c.bf16 %v2026_v2, %v2024_v1 }
 0x239   : > { %v1899_v13 = vmul.f32 0.01, %v1641_v25  ;;  %v1645_v14 = vadd.f32 %v1644_v11, %v6405_v30  ;;  %v1646_v15 = vpop.f32.mrb[43].mxu1 }
 0x23a   : > { %v1900_v16 = vmul.f32 0.01, %v1643_v10  ;;  %v1647_v17 = vadd.f32 %v1646_v15, %v6408_v32  ;;  %2507 = vmatprep.mubr.bf16.mxu0 %v2134_v12 }
 0x23b   : > { %v1901_v18 = vmul.f32 0.01, %v1645_v14  ;;  %2508 = vmatmul.mubr.bf16.gmra.mrb[164].mxu0 %v2133_v7  ;;  %v2027_v20 = vmax.f32 %v1641_v25, %v1899_v13 }
 0x23c   : > { %v1902_v19 = vmul.f32 0.01, %v1647_v17  ;;  %v2028_v26 = vmax.f32 %v1643_v10, %v1900_v16 }
 0x23d   : > { %v2029_v22 = vmax.f32 %v1645_v14, %v1901_v18 }
 0x23e   : > { %v2030_v27 = vmax.f32 %v1647_v17, %v1902_v19  ;;  %v1650_v28 = vpop.f32.mrb[44].mxu1 }
 0x23f   : > { %v1651_v29 = vadd.f32 %v1650_v28, %v6405_v30  ;;  %v1652_v31 = vpop.f32.mrb[45].mxu1  ;;  %v2135_v33 = vpack.c.bf16 %v2029_v22, %v2027_v20  ;;  %v5973_v28 = vld [vmem:[#allocation2 + $0x320] ss:$8 sps:$4 sm:$0xff]  }
 0x240   : > { %v1653_v34 = vadd.f32 %v1652_v31, %v6408_v32  ;;  %v1654_v35 = vpop.f32.mrb[46].mxu1  ;;  %v2136_v36 = vpack.c.bf16 %v2030_v27, %v2028_v26 }
 0x241   : > { %v1903_v37 = vmul.f32 0.01, %v1651_v29  ;;  %v1655_v38 = vadd.f32 %v1654_v35, %v6405_v30  ;;  %v1656_v39 = vpop.f32.mrb[47].mxu1 }
 0x242   : > { %v1904_v40 = vmul.f32 0.01, %v1653_v34  ;;  %v1657_v41 = vadd.f32 %v1656_v39, %v6408_v32  ;;  %2517 = vmatprep.mubr.bf16.mxu0 %v2136_v36 }
 0x243   : > { %v1905_v42 = vmul.f32 0.01, %v1655_v38  ;;  %2518 = vmatmul.mubr.bf16.gmra.mrb[168].mxu0 %v2135_v33  ;;  %v2031_v44 = vmax.f32 %v1651_v29, %v1903_v37  ;;  %v5975_v29 = vld [vmem:[#allocation2 + $0x324] ss:$8 sps:$4 sm:$0xff]  }
 0x244   : > { %v1906_v43 = vmul.f32 0.01, %v1657_v41  ;;  %v2032_v46 = vmax.f32 %v1653_v34, %v1904_v40  ;;  %4147 = vmatprep.subr.bf16.mxu0 %v5975_v29 }
 0x245   : > { %v2033_v45 = vmax.f32 %v1655_v38, %v1905_v42  ;;  %4148 = vmatpush1.bf16.msra.mxu0 %v5973_v28 }
 0x246   : > { %v2034_v47 = vmax.f32 %v1657_v41, %v1906_v43  ;;  %v1660_v48 = vpop.f32.mrb[48].mxu1 }
 0x247   : > { %v1661_v51 = vadd.f32 %v1660_v48, %v6405_v30  ;;  %v1662_v52 = vpop.f32.mrb[49].mxu1  ;;  %v2137_v53 = vpack.c.bf16 %v2033_v45, %v2031_v44 }
 0x248   : > { %v1663_v56 = vadd.f32 %v1662_v52, %v6408_v32  ;;  %v1664_v57 = vpop.f32.mrb[50].mxu1  ;;  %v2138_v58 = vpack.c.bf16 %v2034_v47, %v2032_v46 }
 0x249   : > { %v1907_v59 = vmul.f32 0.01, %v1661_v51  ;;  %v1665_v60 = vadd.f32 %v1664_v57, %v6405_v30  ;;  %v1666_v61 = vpop.f32.mrb[51].mxu1 }
 0x24a   : > { %v1908_v24 = vmul.f32 0.01, %v1663_v56  ;;  %v1667_v62 = vadd.f32 %v1666_v61, %v6408_v32  ;;  %2527 = vmatprep.mubr.bf16.mxu0 %v2138_v58 }
 0x24b   : > { %v1909_v63 = vmul.f32 0.01, %v1665_v60  ;;  %2528 = vmatmul.mubr.bf16.gmra.mrb[172].mxu0 %v2137_v53  ;;  %v2035_v2 = vmax.f32 %v1661_v51, %v1907_v59 }
 0x24c   : > { %v1910_v1 = vmul.f32 0.01, %v1667_v62  ;;  %v2036_v4 = vmax.f32 %v1663_v56, %v1908_v24 }
 0x24d   : > { %v2037_v3 = vmax.f32 %v1665_v60, %v1909_v63 }
 0x24e   : > { %v2038_v5 = vmax.f32 %v1667_v62, %v1910_v1  ;;  %v1670_v25 = vpop.f32.mrb[52].mxu1 }
 0x24f   : > { %v1671_v6 = vadd.f32 %v1670_v25, %v6405_v30  ;;  %v1672_v7 = vpop.f32.mrb[53].mxu1  ;;  %v2139_v8 = vpack.c.bf16 %v2037_v3, %v2035_v2 }
 0x250   : > { %v1673_v9 = vadd.f32 %v1672_v7, %v6408_v32  ;;  %v1674_v10 = vpop.f32.mrb[54].mxu1  ;;  %v2140_v11 = vpack.c.bf16 %v2038_v5, %v2036_v4  ;;  %v5976_v4 = vld [vmem:[#allocation2 + $0x330] ss:$8 sps:$4 sm:$0xff]   ;;  %v5978_v5 = vld [vmem:[#allocation2 + $0x334] ss:$8 sps:$4 sm:$0xff]  }
 0x251   : > { %v1911_v12 = vmul.f32 0.01, %v1671_v6  ;;  %v1675_v13 = vadd.f32 %v1674_v10, %v6405_v30  ;;  %v1676_v14 = vpop.f32.mrb[55].mxu1  ;;  %4149 = vmatprep.subr.bf16.mxu0 %v5978_v5 }
 0x252   : > { %v1912_v15 = vmul.f32 0.01, %v1673_v9  ;;  %v1677_v16 = vadd.f32 %v1676_v14, %v6408_v32  ;;  %2537 = vmatprep.mubr.bf16.mxu0 %v2140_v11  ;;  %4150 = vmatpush1.bf16.msra.mxu0 %v5976_v4 }
 0x253   : > { %v1913_v17 = vmul.f32 0.01, %v1675_v13  ;;  %2538 = vmatmul.mubr.bf16.gmra.mrb[176].mxu0 %v2139_v8  ;;  %v2039_v19 = vmax.f32 %v1671_v6, %v1911_v12 }
 0x254   : > { %v1914_v18 = vmul.f32 0.01, %v1677_v16  ;;  %v2040_v22 = vmax.f32 %v1673_v9, %v1912_v15 }
 0x255   : > { %v2041_v20 = vmax.f32 %v1675_v13, %v1913_v17 }
 0x256   : > { %v2042_v26 = vmax.f32 %v1677_v16, %v1914_v18  ;;  %v1680_v27 = vpop.f32.mrb[56].mxu1 }
 0x257   : > { %v1681_v31 = vadd.f32 %v1680_v27, %v6405_v30  ;;  %v1682_v33 = vpop.f32.mrb[57].mxu1  ;;  %v2141_v34 = vpack.c.bf16 %v2041_v20, %v2039_v19 }
 0x258   : > { %v1683_v35 = vadd.f32 %v1682_v33, %v6408_v32  ;;  %v1684_v36 = vpop.f32.mrb[58].mxu1  ;;  %v2142_v37 = vpack.c.bf16 %v2042_v26, %v2040_v22 }
 0x259   : > { %v1915_v38 = vmul.f32 0.01, %v1681_v31  ;;  %v1685_v39 = vadd.f32 %v1684_v36, %v6405_v30  ;;  %v1686_v40 = vpop.f32.mrb[59].mxu1 }
 0x25a   : > { %v1916_v41 = vmul.f32 0.01, %v1683_v35  ;;  %v1687_v42 = vadd.f32 %v1686_v40, %v6408_v32  ;;  %2547 = vmatprep.mubr.bf16.mxu0 %v2142_v37 }
 0x25b   : > { %v1917_v43 = vmul.f32 0.01, %v1685_v39  ;;  %2548 = vmatmul.mubr.bf16.gmra.mrb[180].mxu0 %v2141_v34  ;;  %v2043_v45 = vmax.f32 %v1681_v31, %v1915_v38 }
 0x25c   : > { %v1918_v44 = vmul.f32 0.01, %v1687_v42  ;;  %v2044_v47 = vmax.f32 %v1683_v35, %v1916_v41 }
 0x25d   : > { %v2045_v46 = vmax.f32 %v1685_v39, %v1917_v43 }
 0x25e   : > { %v2046_v48 = vmax.f32 %v1687_v42, %v1918_v44  ;;  %v1690_v49 = vpop.f32.mrb[60].mxu1 }
 0x25f   : > { %v1691_v50 = vadd.f32 %v1690_v49, %v6405_v30  ;;  %v1692_v51 = vpop.f32.mrb[61].mxu1  ;;  %v2143_v52 = vpack.c.bf16 %v2045_v46, %v2043_v45 }
 0x260   : > { %v1693_v53 = vadd.f32 %v1692_v51, %v6408_v32  ;;  %v1694_v54 = vpop.f32.mrb[62].mxu1  ;;  %v2144_v55 = vpack.c.bf16 %v2046_v48, %v2044_v47  ;;  %v5979_v47 = vld [vmem:[#allocation2 + $0x340] ss:$8 sps:$4 sm:$0xff]   ;;  %v5981_v48 = vld [vmem:[#allocation2 + $0x344] ss:$8 sps:$4 sm:$0xff]  }
 0x261   : > { %v1919_v56 = vmul.f32 0.01, %v1691_v50  ;;  %v1695_v57 = vadd.f32 %v1694_v54, %v6405_v30  ;;  %v1696_v58 = vpop.f32.mrb[63].mxu1  ;;  %4151 = vmatprep.subr.bf16.mxu0 %v5981_v48 }
 0x262   : > { %v1920_v59 = vmul.f32 0.01, %v1693_v53  ;;  %v1697_v60 = vadd.f32 %v1696_v58, %v6408_v32  ;;  %2557 = vmatprep.mubr.bf16.mxu0 %v2144_v55  ;;  %4152 = vmatpush1.bf16.msra.mxu0 %v5979_v47 }
 0x263   : > { %v1921_v61 = vmul.f32 0.01, %v1695_v57  ;;  %2558 = vmatmul.mubr.bf16.gmra.mrb[184].mxu0 %v2143_v52  ;;  %v2047_v62 = vmax.f32 %v1691_v50, %v1919_v56 }
 0x264   : > { %v1922_v24 = vmul.f32 0.01, %v1697_v60  ;;  %v2048_v1 = vmax.f32 %v1693_v53, %v1920_v59 }
 0x265   : > { %v2049_v63 = vmax.f32 %v1695_v57, %v1921_v61 }
 0x266   : > { %v2050_v2 = vmax.f32 %v1697_v60, %v1922_v24  ;;  %v1700_v3 = vpop.f32.mrb[64].mxu1 }
 0x267   : > { %v1701_v25 = vadd.f32 %v1700_v3, %v6405_v30  ;;  %v1702_v6 = vpop.f32.mrb[65].mxu1  ;;  %v2145_v7 = vpack.c.bf16 %v2049_v63, %v2047_v62 }
 0x268   : > { %v1703_v8 = vadd.f32 %v1702_v6, %v6408_v32  ;;  %v1704_v9 = vpop.f32.mrb[66].mxu1  ;;  %v2146_v10 = vpack.c.bf16 %v2050_v2, %v2048_v1 }
 0x269   : > { %v1923_v11 = vmul.f32 0.01, %v1701_v25  ;;  %v1705_v12 = vadd.f32 %v1704_v9, %v6405_v30  ;;  %v1706_v13 = vpop.f32.mrb[67].mxu1 }
 0x26a   : > { %v1924_v14 = vmul.f32 0.01, %v1703_v8  ;;  %v1707_v15 = vadd.f32 %v1706_v13, %v6408_v32  ;;  %2567 = vmatprep.mubr.bf16.mxu0 %v2146_v10 }
 0x26b   : > { %v1925_v16 = vmul.f32 0.01, %v1705_v12  ;;  %2568 = vmatmul.mubr.bf16.gmra.mrb[188].mxu0 %v2145_v7  ;;  %v2051_v18 = vmax.f32 %v1701_v25, %v1923_v11 }
 0x26c   : > { %v1926_v17 = vmul.f32 0.01, %v1707_v15  ;;  %v2052_v20 = vmax.f32 %v1703_v8, %v1924_v14 }
 0x26d   : > { %v2053_v19 = vmax.f32 %v1705_v12, %v1925_v16 }
 0x26e   : > { %v2054_v22 = vmax.f32 %v1707_v15, %v1926_v17  ;;  %v1710_v26 = vpop.f32.mrb[68].mxu1 }
 0x26f   : > { %v1711_v27 = vadd.f32 %v1710_v26, %v6405_v30  ;;  %v1712_v28 = vpop.f32.mrb[69].mxu1  ;;  %v2147_v29 = vpack.c.bf16 %v2053_v19, %v2051_v18 }
 0x270   : > { %v1713_v31 = vadd.f32 %v1712_v28, %v6408_v32  ;;  %v1714_v33 = vpop.f32.mrb[70].mxu1  ;;  %v2148_v34 = vpack.c.bf16 %v2054_v22, %v2052_v20  ;;  %v5982_v20 = vld [vmem:[#allocation2 + $0x350] ss:$8 sps:$4 sm:$0xff]   ;;  %v5984_v22 = vld [vmem:[#allocation2 + $0x354] ss:$8 sps:$4 sm:$0xff]  }
 0x271   : > { %v1927_v35 = vmul.f32 0.01, %v1711_v27  ;;  %v1715_v36 = vadd.f32 %v1714_v33, %v6405_v30  ;;  %v1716_v37 = vpop.f32.mrb[71].mxu1  ;;  %4153 = vmatprep.subr.bf16.mxu0 %v5984_v22 }
 0x272   : > { %v1928_v38 = vmul.f32 0.01, %v1713_v31  ;;  %v1717_v39 = vadd.f32 %v1716_v37, %v6408_v32  ;;  %2577 = vmatprep.mubr.bf16.mxu0 %v2148_v34  ;;  %4154 = vmatpush1.bf16.msra.mxu0 %v5982_v20 }
 0x273   : > { %v1929_v40 = vmul.f32 0.01, %v1715_v36  ;;  %2578 = vmatmul.mubr.bf16.gmra.mrb[192].mxu0 %v2147_v29  ;;  %v2055_v42 = vmax.f32 %v1711_v27, %v1927_v35 }
 0x274   : > { %v1930_v41 = vmul.f32 0.01, %v1717_v39  ;;  %v2056_v44 = vmax.f32 %v1713_v31, %v1928_v38 }
 0x275   : > { %v2057_v43 = vmax.f32 %v1715_v36, %v1929_v40 }
 0x276   : > { %v2058_v45 = vmax.f32 %v1717_v39, %v1930_v41  ;;  %v1720_v46 = vpop.f32.mrb[72].mxu1 }
 0x277   : > { %v1721_v49 = vadd.f32 %v1720_v46, %v6405_v30  ;;  %v1722_v50 = vpop.f32.mrb[73].mxu1  ;;  %v2149_v51 = vpack.c.bf16 %v2057_v43, %v2055_v42 }
 0x278   : > { %v1723_v52 = vadd.f32 %v1722_v50, %v6408_v32  ;;  %v1724_v53 = vpop.f32.mrb[74].mxu1  ;;  %v2150_v54 = vpack.c.bf16 %v2058_v45, %v2056_v44 }
 0x279   : > { %v1931_v55 = vmul.f32 0.01, %v1721_v49  ;;  %v1725_v56 = vadd.f32 %v1724_v53, %v6405_v30  ;;  %v1726_v57 = vpop.f32.mrb[75].mxu1 }
 0x27a   : > { %v1932_v58 = vmul.f32 0.01, %v1723_v52  ;;  %v1727_v59 = vadd.f32 %v1726_v57, %v6408_v32  ;;  %2587 = vmatprep.mubr.bf16.mxu0 %v2150_v54 }
 0x27b   : > { %v1933_v60 = vmul.f32 0.01, %v1725_v56  ;;  %2588 = vmatmul.mubr.bf16.gmra.mrb[196].mxu0 %v2149_v51  ;;  %v2059_v24 = vmax.f32 %v1721_v49, %v1931_v55 }
 0x27c   : > { %v1934_v61 = vmul.f32 0.01, %v1727_v59  ;;  %v2060_v63 = vmax.f32 %v1723_v52, %v1932_v58 }
 0x27d   : > { %v2061_v62 = vmax.f32 %v1725_v56, %v1933_v60 }
 0x27e   : > { %v2062_v1 = vmax.f32 %v1727_v59, %v1934_v61  ;;  %v1730_v2 = vpop.f32.mrb[76].mxu1 }
 0x27f   : > { %v1731_v3 = vadd.f32 %v1730_v2, %v6405_v30  ;;  %v1732_v4 = vpop.f32.mrb[77].mxu1  ;;  %v2151_v5 = vpack.c.bf16 %v2061_v62, %v2059_v24 }
 0x280   : > { %v1733_v25 = vadd.f32 %v1732_v4, %v6408_v32  ;;  %v1734_v6 = vpop.f32.mrb[78].mxu1  ;;  %v2152_v7 = vpack.c.bf16 %v2062_v1, %v2060_v63  ;;  %v5985_v63 = vld [vmem:[#allocation2 + $0x360] ss:$8 sps:$4 sm:$0xff]   ;;  %v5987_v1 = vld [vmem:[#allocation2 + $0x364] ss:$8 sps:$4 sm:$0xff]  }
 0x281   : > { %v1935_v8 = vmul.f32 0.01, %v1731_v3  ;;  %v1735_v9 = vadd.f32 %v1734_v6, %v6405_v30  ;;  %v1736_v10 = vpop.f32.mrb[79].mxu1  ;;  %4155 = vmatprep.subr.bf16.mxu0 %v5987_v1 }
 0x282   : > { %v1936_v11 = vmul.f32 0.01, %v1733_v25  ;;  %v1737_v12 = vadd.f32 %v1736_v10, %v6408_v32  ;;  %2597 = vmatprep.mubr.bf16.mxu0 %v2152_v7  ;;  %4156 = vmatpush1.bf16.msra.mxu0 %v5985_v63 }
 0x283   : > { %v1937_v13 = vmul.f32 0.01, %v1735_v9  ;;  %2598 = vmatmul.mubr.bf16.gmra.mrb[200].mxu0 %v2151_v5  ;;  %v2063_v15 = vmax.f32 %v1731_v3, %v1935_v8 }
 0x284   : > { %v1938_v14 = vmul.f32 0.01, %v1737_v12  ;;  %v2064_v17 = vmax.f32 %v1733_v25, %v1936_v11 }
 0x285   : > { %v2065_v16 = vmax.f32 %v1735_v9, %v1937_v13 }
 0x286   : > { %v2066_v18 = vmax.f32 %v1737_v12, %v1938_v14  ;;  %v1740_v19 = vpop.f32.mrb[80].mxu1 }
 0x287   : > { %v1741_v26 = vadd.f32 %v1740_v19, %v6405_v30  ;;  %v1742_v27 = vpop.f32.mrb[81].mxu1  ;;  %v2153_v28 = vpack.c.bf16 %v2065_v16, %v2063_v15 }
 0x288   : > { %v1743_v29 = vadd.f32 %v1742_v27, %v6408_v32  ;;  %v1744_v31 = vpop.f32.mrb[82].mxu1  ;;  %v2154_v33 = vpack.c.bf16 %v2066_v18, %v2064_v17 }
 0x289   : > { %v1939_v34 = vmul.f32 0.01, %v1741_v26  ;;  %v1745_v35 = vadd.f32 %v1744_v31, %v6405_v30  ;;  %v1746_v36 = vpop.f32.mrb[83].mxu1 }
 0x28a   : > { %v1940_v37 = vmul.f32 0.01, %v1743_v29  ;;  %v1747_v38 = vadd.f32 %v1746_v36, %v6408_v32  ;;  %2607 = vmatprep.mubr.bf16.mxu0 %v2154_v33 }
 0x28b   : > { %v1941_v39 = vmul.f32 0.01, %v1745_v35  ;;  %2608 = vmatmul.mubr.bf16.gmra.mrb[204].mxu0 %v2153_v28  ;;  %v2067_v41 = vmax.f32 %v1741_v26, %v1939_v34 }
 0x28c   : > { %v1942_v40 = vmul.f32 0.01, %v1747_v38  ;;  %v2068_v43 = vmax.f32 %v1743_v29, %v1940_v37 }
 0x28d   : > { %v2069_v42 = vmax.f32 %v1745_v35, %v1941_v39 }
 0x28e   : > { %v2070_v44 = vmax.f32 %v1747_v38, %v1942_v40  ;;  %v1750_v45 = vpop.f32.mrb[84].mxu1 }
 0x28f   : > { %v1751_v46 = vadd.f32 %v1750_v45, %v6405_v30  ;;  %v1752_v47 = vpop.f32.mrb[85].mxu1  ;;  %v2155_v48 = vpack.c.bf16 %v2069_v42, %v2067_v41 }
 0x290   : > { %v1753_v49 = vadd.f32 %v1752_v47, %v6408_v32  ;;  %v1754_v50 = vpop.f32.mrb[86].mxu1  ;;  %v2156_v51 = vpack.c.bf16 %v2070_v44, %v2068_v43  ;;  %v5988_v43 = vld [vmem:[#allocation2 + $0x370] ss:$8 sps:$4 sm:$0xff]   ;;  %v5990_v44 = vld [vmem:[#allocation2 + $0x374] ss:$8 sps:$4 sm:$0xff]  }
 0x291   : > { %v1943_v52 = vmul.f32 0.01, %v1751_v46  ;;  %v1755_v53 = vadd.f32 %v1754_v50, %v6405_v30  ;;  %v1756_v54 = vpop.f32.mrb[87].mxu1  ;;  %4157 = vmatprep.subr.bf16.mxu0 %v5990_v44 }
 0x292   : > { %v1944_v55 = vmul.f32 0.01, %v1753_v49  ;;  %v1757_v56 = vadd.f32 %v1756_v54, %v6408_v32  ;;  %2617 = vmatprep.mubr.bf16.mxu0 %v2156_v51  ;;  %4158 = vmatpush1.bf16.msra.mxu0 %v5988_v43 }
 0x293   : > { %v1945_v57 = vmul.f32 0.01, %v1755_v53  ;;  %2618 = vmatmul.mubr.bf16.gmra.mrb[208].mxu0 %v2155_v48  ;;  %v2071_v59 = vmax.f32 %v1751_v46, %v1943_v52 }
 0x294   : > { %v1946_v58 = vmul.f32 0.01, %v1757_v56  ;;  %v2072_v61 = vmax.f32 %v1753_v49, %v1944_v55 }
 0x295   : > { %v2073_v60 = vmax.f32 %v1755_v53, %v1945_v57 }
 0x296   : > { %v2074_v24 = vmax.f32 %v1757_v56, %v1946_v58  ;;  %v1760_v62 = vpop.f32.mrb[88].mxu1 }
 0x297   : > { %v1761_v2 = vadd.f32 %v1760_v62, %v6405_v30  ;;  %v1762_v3 = vpop.f32.mrb[89].mxu1  ;;  %v2157_v4 = vpack.c.bf16 %v2073_v60, %v2071_v59 }
 0x298   : > { %v1763_v5 = vadd.f32 %v1762_v3, %v6408_v32  ;;  %v1764_v25 = vpop.f32.mrb[90].mxu1  ;;  %v2158_v6 = vpack.c.bf16 %v2074_v24, %v2072_v61 }
 0x299   : > { %v1947_v7 = vmul.f32 0.01, %v1761_v2  ;;  %v1765_v8 = vadd.f32 %v1764_v25, %v6405_v30  ;;  %v1766_v9 = vpop.f32.mrb[91].mxu1 }
 0x29a   : > { %v1948_v10 = vmul.f32 0.01, %v1763_v5  ;;  %v1767_v11 = vadd.f32 %v1766_v9, %v6408_v32  ;;  %2627 = vmatprep.mubr.bf16.mxu0 %v2158_v6 }
 0x29b   : > { %v1949_v12 = vmul.f32 0.01, %v1765_v8  ;;  %2628 = vmatmul.mubr.bf16.gmra.mrb[212].mxu0 %v2157_v4  ;;  %v2075_v14 = vmax.f32 %v1761_v2, %v1947_v7 }
 0x29c   : > { %v1950_v13 = vmul.f32 0.01, %v1767_v11  ;;  %v2076_v16 = vmax.f32 %v1763_v5, %v1948_v10 }
 0x29d   : > { %v2077_v15 = vmax.f32 %v1765_v8, %v1949_v12 }
 0x29e   : > { %v2078_v17 = vmax.f32 %v1767_v11, %v1950_v13  ;;  %v1770_v18 = vpop.f32.mrb[92].mxu1 }
 0x29f   : > { %v1771_v19 = vadd.f32 %v1770_v18, %v6405_v30  ;;  %v1772_v20 = vpop.f32.mrb[93].mxu1  ;;  %v2159_v22 = vpack.c.bf16 %v2077_v15, %v2075_v14 }
 0x2a0   : > { %v1773_v26 = vadd.f32 %v1772_v20, %v6408_v32  ;;  %v1774_v27 = vpop.f32.mrb[94].mxu1  ;;  %v2160_v28 = vpack.c.bf16 %v2078_v17, %v2076_v16  ;;  %v5991_v16 = vld [vmem:[#allocation2 + $0x380] ss:$8 sps:$4 sm:$0xff]   ;;  %v5993_v17 = vld [vmem:[#allocation2 + $0x384] ss:$8 sps:$4 sm:$0xff]  }
 0x2a1   : > { %v1951_v29 = vmul.f32 0.01, %v1771_v19  ;;  %v1775_v31 = vadd.f32 %v1774_v27, %v6405_v30  ;;  %v1776_v33 = vpop.f32.mrb[95].mxu1  ;;  %4159 = vmatprep.subr.bf16.mxu0 %v5993_v17 }
 0x2a2   : > { %v1952_v34 = vmul.f32 0.01, %v1773_v26  ;;  %v1777_v35 = vadd.f32 %v1776_v33, %v6408_v32  ;;  %2637 = vmatprep.mubr.bf16.mxu0 %v2160_v28  ;;  %4160 = vmatpush1.bf16.msra.mxu0 %v5991_v16 }
 0x2a3   : > { %v1953_v36 = vmul.f32 0.01, %v1775_v31  ;;  %2638 = vmatmul.mubr.bf16.gmra.mrb[216].mxu0 %v2159_v22  ;;  %v2079_v38 = vmax.f32 %v1771_v19, %v1951_v29 }
 0x2a4   : > { %v1954_v37 = vmul.f32 0.01, %v1777_v35  ;;  %v2080_v40 = vmax.f32 %v1773_v26, %v1952_v34 }
 0x2a5   : > { %v2081_v39 = vmax.f32 %v1775_v31, %v1953_v36 }
 0x2a6   : > { %v2082_v41 = vmax.f32 %v1777_v35, %v1954_v37  ;;  %v1780_v42 = vpop.f32.mrb[96].mxu1 }
 0x2a7   : > { %v1781_v45 = vadd.f32 %v1780_v42, %v6405_v30  ;;  %v1782_v46 = vpop.f32.mrb[97].mxu1  ;;  %v2161_v47 = vpack.c.bf16 %v2081_v39, %v2079_v38 }
 0x2a8   : > { %v1783_v48 = vadd.f32 %v1782_v46, %v6408_v32  ;;  %v1784_v49 = vpop.f32.mrb[98].mxu1  ;;  %v2162_v50 = vpack.c.bf16 %v2082_v41, %v2080_v40 }
 0x2a9   : > { %v1955_v51 = vmul.f32 0.01, %v1781_v45  ;;  %v1785_v52 = vadd.f32 %v1784_v49, %v6405_v30  ;;  %v1786_v53 = vpop.f32.mrb[99].mxu1 }
 0x2aa   : > { %v1956_v54 = vmul.f32 0.01, %v1783_v48  ;;  %v1787_v55 = vadd.f32 %v1786_v53, %v6408_v32  ;;  %2647 = vmatprep.mubr.bf16.mxu0 %v2162_v50 }
 0x2ab   : > { %v1957_v56 = vmul.f32 0.01, %v1785_v52  ;;  %2648 = vmatmul.mubr.bf16.gmra.mrb[220].mxu0 %v2161_v47  ;;  %v2083_v58 = vmax.f32 %v1781_v45, %v1955_v51 }
 0x2ac   : > { %v1958_v57 = vmul.f32 0.01, %v1787_v55  ;;  %v2084_v60 = vmax.f32 %v1783_v48, %v1956_v54  ;;  %v5613_v48 = vld [vmem:[%s7313_s4 + $0x2] ss:$8 sm:$0x3] }
 0x2ad   : > { %v2085_v59 = vmax.f32 %v1785_v52, %v1957_v56 }
 0x2ae   : > { %v2086_v61 = vmax.f32 %v1787_v55, %v1958_v57  ;;  %v1790_v24 = vpop.f32.mrb[100].mxu1  ;;  %v6543_v55 = vrot.slane %v5613_v48, %v6260_v21  ;;  %v6546_v57 = vrot.slane %v5613_v48, %v6265_v23 }
 0x2af   : > { %v1791_v62 = vadd.f32 %v1790_v24, %v6405_v30  ;;  %v1792_v63 = vpop.f32.mrb[101].mxu1  ;;  %v2163_v1 = vpack.c.bf16 %v2085_v59, %v2083_v58 }
 0x2b0   : > { %v1793_v2 = vadd.f32 %v1792_v63, %v6408_v32  ;;  %v1794_v3 = vpop.f32.mrb[102].mxu1  ;;  %v2164_v4 = vpack.c.bf16 %v2086_v61, %v2084_v60  ;;  %v5994_v63 = vld [vmem:[#allocation2 + $0x390] ss:$8 sps:$4 sm:$0xff]  }
 0x2b1   : > { %v1959_v5 = vmul.f32 0.01, %v1791_v62  ;;  %v1795_v25 = vadd.f32 %v1794_v3, %v6405_v30  ;;  %v1796_v6 = vpop.f32.mrb[103].mxu1 }
 0x2b2   : > { %v1960_v7 = vmul.f32 0.01, %v1793_v2  ;;  %v1797_v8 = vadd.f32 %v1796_v6, %v6408_v32  ;;  %2657 = vmatprep.mubr.bf16.mxu0 %v2164_v4 }
 0x2b3   : > { %v1961_v9 = vmul.f32 0.01, %v1795_v25  ;;  %2658 = vmatmul.mubr.bf16.gmra.mrb[224].mxu0 %v2163_v1  ;;  %v2087_v11 = vmax.f32 %v1791_v62, %v1959_v5  ;;  %v5996_v1 = vld [vmem:[#allocation2 + $0x394] ss:$8 sps:$4 sm:$0xff]  }
 0x2b4   : > { %v1962_v10 = vmul.f32 0.01, %v1797_v8  ;;  %v2088_v13 = vmax.f32 %v1793_v2, %v1960_v7  ;;  %4161 = vmatprep.subr.bf16.mxu0 %v5996_v1 }
 0x2b5   : > { %v2089_v12 = vmax.f32 %v1795_v25, %v1961_v9  ;;  %4162 = vmatpush1.bf16.msra.mxu0 %v5994_v63 }
 0x2b6   : > { %v2090_v14 = vmax.f32 %v1797_v8, %v1962_v10  ;;  %v1800_v15 = vpop.f32.mrb[104].mxu1 }
 0x2b7   : > { %v1801_v18 = vadd.f32 %v1800_v15, %v6405_v30  ;;  %v1802_v19 = vpop.f32.mrb[105].mxu1  ;;  %v2165_v20 = vpack.c.bf16 %v2089_v12, %v2087_v11 }
 0x2b8   : > { %v1803_v22 = vadd.f32 %v1802_v19, %v6408_v32  ;;  %v1804_v26 = vpop.f32.mrb[106].mxu1  ;;  %v2166_v27 = vpack.c.bf16 %v2090_v14, %v2088_v13 }
 0x2b9   : > { %v1963_v28 = vmul.f32 0.01, %v1801_v18  ;;  %v1805_v29 = vadd.f32 %v1804_v26, %v6405_v30  ;;  %v1806_v31 = vpop.f32.mrb[107].mxu1 }
 0x2ba   : > { %v1964_v33 = vmul.f32 0.01, %v1803_v22  ;;  %v1807_v34 = vadd.f32 %v1806_v31, %v6408_v32  ;;  %2667 = vmatprep.mubr.bf16.mxu0 %v2166_v27 }
 0x2bb   : > { %v1965_v35 = vmul.f32 0.01, %v1805_v29  ;;  %2668 = vmatmul.mubr.bf16.gmra.mrb[228].mxu0 %v2165_v20  ;;  %v2091_v37 = vmax.f32 %v1801_v18, %v1963_v28 }
 0x2bc   : > { %v1966_v36 = vmul.f32 0.01, %v1807_v34  ;;  %v2092_v39 = vmax.f32 %v1803_v22, %v1964_v33 }
 0x2bd   : > { %v2093_v38 = vmax.f32 %v1805_v29, %v1965_v35 }
 0x2be   : > { %v2094_v40 = vmax.f32 %v1807_v34, %v1966_v36  ;;  %v1810_v41 = vpop.f32.mrb[108].mxu1 }
 0x2bf   : > { %v1811_v42 = vadd.f32 %v1810_v41, %v6405_v30  ;;  %v1812_v43 = vpop.f32.mrb[109].mxu1  ;;  %v2167_v44 = vpack.c.bf16 %v2093_v38, %v2091_v37 }
 0x2c0   : > { %v1813_v45 = vadd.f32 %v1812_v43, %v6408_v32  ;;  %v1814_v46 = vpop.f32.mrb[110].mxu1  ;;  %v2168_v47 = vpack.c.bf16 %v2094_v40, %v2092_v39 }
 0x2c1   : > { %v1967_v49 = vmul.f32 0.01, %v1811_v42  ;;  %v1815_v50 = vadd.f32 %v1814_v46, %v6405_v30  ;;  %v1816_v51 = vpop.f32.mrb[111].mxu1 }
 0x2c2   : > { %v1968_v52 = vmul.f32 0.01, %v1813_v45  ;;  %v1817_v53 = vadd.f32 %v1816_v51, %v6408_v32  ;;  %2677 = vmatprep.mubr.bf16.mxu0 %v2168_v47 }
 0x2c3   : > { %v1969_v54 = vmul.f32 0.01, %v1815_v50  ;;  %2678 = vmatmul.mubr.bf16.gmra.mrb[232].mxu0 %v2167_v44  ;;  %v2095_v58 = vmax.f32 %v1811_v42, %v1967_v49 }
 0x2c4   : > { %v1970_v56 = vmul.f32 0.01, %v1817_v53  ;;  %v2096_v60 = vmax.f32 %v1813_v45, %v1968_v52 }
 0x2c5   : > { %v2097_v59 = vmax.f32 %v1815_v50, %v1969_v54 }
 0x2c6   : > { %v2098_v61 = vmax.f32 %v1817_v53, %v1970_v56  ;;  %v1820_v24 = vpop.f32.mrb[112].mxu1  ;;  %v2419_v62 = vpop.f32.mrb[128].mxu0 }
 0x2c7   : > { %v1821_v2 = vadd.f32 %v1820_v24, %v6405_v30  ;;  %v2420_v3 = vadd.f32 %v2419_v62, %v6543_v55  ;;  %v1822_v4 = vpop.f32.mrb[113].mxu1  ;;  %v2421_v5 = vpop.f32.mrb[129].mxu0  ;;  %v2169_v25 = vpack.c.bf16 %v2097_v59, %v2095_v58 }
 0x2c8   : > { %v1823_v6 = vadd.f32 %v1822_v4, %v6408_v32  ;;  %v2422_v7 = vadd.f32 %v2421_v5, %v6546_v57  ;;  %v1824_v8 = vpop.f32.mrb[114].mxu1  ;;  %v2423_v9 = vpop.f32.mrb[130].mxu0  ;;  %v2170_v10 = vpack.c.bf16 %v2098_v61, %v2096_v60 }
 0x2c9   : > { %v1971_v11 = vmul.f32 0.01, %v1821_v2  ;;  %v2738_v12 = vmul.f32 0.01, %v2420_v3  ;;  %v1825_v13 = vadd.f32 %v1824_v8, %v6405_v30  ;;  %v2424_v14 = vadd.f32 %v2423_v9, %v6543_v55  ;;  %v1826_v15 = vpop.f32.mrb[115].mxu1  ;;  %v2425_v16 = vpop.f32.mrb[131].mxu0 }
 0x2ca   : > { %v1972_v17 = vmul.f32 0.01, %v1823_v6  ;;  %v2739_v18 = vmul.f32 0.01, %v2422_v7  ;;  %v1827_v19 = vadd.f32 %v1826_v15, %v6408_v32  ;;  %v2426_v20 = vadd.f32 %v2425_v16, %v6546_v57  ;;  %2687 = vmatprep.mubr.bf16.mxu0 %v2170_v10  ;;  %v5999_v15 = vld [vmem:[#allocation2 + $0x3a4] ss:$8 sps:$4 sm:$0xff]  }
 0x2cb   : > { %v1973_v22 = vmul.f32 0.01, %v1825_v13  ;;  %v2740_v26 = vmul.f32 0.01, %v2424_v14  ;;  %2688 = vmatmul.mubr.bf16.gmra.mrb[236].mxu0 %v2169_v25  ;;  %v2099_v29 = vmax.f32 %v1821_v2, %v1971_v11  ;;  %v2866_v31 = vmax.f32 %v2420_v3, %v2738_v12  ;;  %4163 = vmatprep.subr.bf16.mxu0 %v5999_v15 }
 0x2cc   : > { %v1974_v27 = vmul.f32 0.01, %v1827_v19  ;;  %v2741_v28 = vmul.f32 0.01, %v2426_v20  ;;  %v2100_v35 = vmax.f32 %v1823_v6, %v1972_v17  ;;  %v2867_v36 = vmax.f32 %v2422_v7, %v2739_v18 }
 0x2cd   : > { %v2101_v33 = vmax.f32 %v1825_v13, %v1973_v22  ;;  %v2868_v34 = vmax.f32 %v2424_v14, %v2740_v26  ;;  %v5997_v14 = vld [vmem:[#allocation2 + $0x3a0] ss:$8 sps:$4 sm:$0xff]  }
 0x2ce   : > { %v2102_v37 = vmax.f32 %v1827_v19, %v1974_v27  ;;  %v2869_v38 = vmax.f32 %v2426_v20, %v2741_v28  ;;  %v1830_v39 = vpop.f32.mrb[116].mxu1  ;;  %v2429_v40 = vpop.f32.mrb[132].mxu0  ;;  %4164 = vmatpush1.bf16.msra.mxu0 %v5997_v14 }
 0x2cf   : > { %v2994_v41 = vpack.c.bf16 %v2868_v34, %v2866_v31  ;;  %v1831_v42 = vadd.f32 %v1830_v39, %v6405_v30  ;;  %v2430_v43 = vadd.f32 %v2429_v40, %v6543_v55  ;;  %v1832_v44 = vpop.f32.mrb[117].mxu1  ;;  %v2431_v45 = vpop.f32.mrb[133].mxu0  ;;  %v2171_v46 = vpack.c.bf16 %v2101_v33, %v2099_v29 }
 0x2d0   : > { %v1833_v47 = vadd.f32 %v1832_v44, %v6408_v32  ;;  %v2432_v48 = vadd.f32 %v2431_v45, %v6546_v57  ;;  %v1834_v49 = vpop.f32.mrb[118].mxu1  ;;  %v2433_v50 = vpop.f32.mrb[134].mxu0  ;;  %v2172_v51 = vpack.c.bf16 %v2102_v37, %v2100_v35  ;;  %v2995_v52 = vpack.c.bf16 %v2869_v38, %v2867_v36 }
 0x2d1   : > { %v1975_v53 = vmul.f32 0.01, %v1831_v42  ;;  %v2742_v54 = vmul.f32 0.01, %v2430_v43  ;;  %v1835_v56 = vadd.f32 %v1834_v49, %v6405_v30  ;;  %v2434_v58 = vadd.f32 %v2433_v50, %v6543_v55  ;;  %v1836_v59 = vpop.f32.mrb[119].mxu1  ;;  %v2435_v60 = vpop.f32.mrb[135].mxu0 }
 0x2d2   : > { %v1976_v61 = vmul.f32 0.01, %v1833_v47  ;;  %v2743_v24 = vmul.f32 0.01, %v2432_v48  ;;  %v1837_v62 = vadd.f32 %v1836_v59, %v6408_v32  ;;  %v2436_v63 = vadd.f32 %v2435_v60, %v6546_v57  ;;  %2697 = vmatprep.mubr.bf16.mxu0 %v2172_v51  ;;  %3296 = vmatprep.mubr.bf16.mxu1 %v2995_v52 }
 0x2d3   : > { %v1977_v1 = vmul.f32 0.01, %v1835_v56  ;;  %v2744_v2 = vmul.f32 0.01, %v2434_v58  ;;  %2698 = vmatmul.mubr.bf16.gmra.mrb[240].mxu0 %v2171_v46  ;;  %3297 = vmatmul.mubr.bf16.vlgmr.msra.gmra.mrb[128].mxu1 %v2994_v41  ;;  %v2103_v5 = vmax.f32 %v1831_v42, %v1975_v53  ;;  %v2870_v25 = vmax.f32 %v2430_v43, %v2742_v54 }
 0x2d4   : > { %v1978_v3 = vmul.f32 0.01, %v1837_v62  ;;  %v2745_v4 = vmul.f32 0.01, %v2436_v63  ;;  %v2104_v8 = vmax.f32 %v1833_v47, %v1976_v61  ;;  %v2871_v9 = vmax.f32 %v2432_v48, %v2743_v24 }
 0x2d5   : > { %v2105_v6 = vmax.f32 %v1835_v56, %v1977_v1  ;;  %v2872_v7 = vmax.f32 %v2434_v58, %v2744_v2 }
 0x2d6   : > { %v2106_v10 = vmax.f32 %v1837_v62, %v1978_v3  ;;  %v2873_v11 = vmax.f32 %v2436_v63, %v2745_v4  ;;  %v1840_v12 = vpop.f32.mrb[120].mxu1  ;;  %v2439_v13 = vpop.f32.mrb[136].mxu0 }
 0x2d7   : > { %v1841_v16 = vadd.f32 %v1840_v12, %v6405_v30  ;;  %v2440_v17 = vadd.f32 %v2439_v13, %v6543_v55  ;;  %v1842_v18 = vpop.f32.mrb[121].mxu1  ;;  %v2441_v19 = vpop.f32.mrb[137].mxu0  ;;  %v2173_v20 = vpack.c.bf16 %v2105_v6, %v2103_v5  ;;  %v2996_v22 = vpack.c.bf16 %v2872_v7, %v2870_v25 }
 0x2d8   : > { %v1843_v26 = vadd.f32 %v1842_v18, %v6408_v32  ;;  %v2442_v27 = vadd.f32 %v2441_v19, %v6546_v57  ;;  %v1844_v28 = vpop.f32.mrb[122].mxu1  ;;  %v2443_v29 = vpop.f32.mrb[138].mxu0  ;;  %v2174_v31 = vpack.c.bf16 %v2106_v10, %v2104_v8  ;;  %v2997_v33 = vpack.c.bf16 %v2873_v11, %v2871_v9 }
 0x2d9   : > { %v1979_v34 = vmul.f32 0.01, %v1841_v16  ;;  %v2746_v35 = vmul.f32 0.01, %v2440_v17  ;;  %v1845_v36 = vadd.f32 %v1844_v28, %v6405_v30  ;;  %v2444_v37 = vadd.f32 %v2443_v29, %v6543_v55  ;;  %v1846_v38 = vpop.f32.mrb[123].mxu1  ;;  %v2445_v39 = vpop.f32.mrb[139].mxu0 }
 0x2da   : > { %v1980_v40 = vmul.f32 0.01, %v1843_v26  ;;  %v2747_v41 = vmul.f32 0.01, %v2442_v27  ;;  %v1847_v42 = vadd.f32 %v1846_v38, %v6408_v32  ;;  %v2446_v43 = vadd.f32 %v2445_v39, %v6546_v57  ;;  %2707 = vmatprep.mubr.bf16.mxu0 %v2174_v31  ;;  %3306 = vmatprep.mubr.bf16.mxu1 %v2997_v33 }
 0x2db   : > { %v1981_v44 = vmul.f32 0.01, %v1845_v36  ;;  %v2748_v45 = vmul.f32 0.01, %v2444_v37  ;;  %2708 = vmatmul.mubr.bf16.gmra.mrb[244].mxu0 %v2173_v20  ;;  %3307 = vmatmul.mubr.bf16.gmra.mrb[132].mxu1 %v2996_v22  ;;  %v2107_v48 = vmax.f32 %v1841_v16, %v1979_v34  ;;  %v2874_v49 = vmax.f32 %v2440_v17, %v2746_v35  ;;  %v6002_v35 = vld [vmem:[#allocation2 + $0x3b4] ss:$8 sps:$4 sm:$0xff]  }
 0x2dc   : > { %v1982_v46 = vmul.f32 0.01, %v1847_v42  ;;  %v2749_v47 = vmul.f32 0.01, %v2446_v43  ;;  %v2108_v52 = vmax.f32 %v1843_v26, %v1980_v40  ;;  %v2875_v53 = vmax.f32 %v2442_v27, %v2747_v41  ;;  %4165 = vmatprep.subr.bf16.mxu0 %v6002_v35 }
 0x2dd   : > { %v2109_v50 = vmax.f32 %v1845_v36, %v1981_v44  ;;  %v2876_v51 = vmax.f32 %v2444_v37, %v2748_v45 }
 0x2de   : > { %v2110_v54 = vmax.f32 %v1847_v42, %v1982_v46  ;;  %v2877_v56 = vmax.f32 %v2446_v43, %v2749_v47  ;;  %v1850_v58 = vpop.f32.mrb[124].mxu1  ;;  %v2449_v59 = vpop.f32.mrb[140].mxu0 }
 0x2df   : > { %v1851_v60 = vadd.f32 %v1850_v58, %v6405_v30  ;;  %v2450_v61 = vadd.f32 %v2449_v59, %v6543_v55  ;;  %v1852_v24 = vpop.f32.mrb[125].mxu1  ;;  %v2451_v62 = vpop.f32.mrb[141].mxu0  ;;  %v2175_v63 = vpack.c.bf16 %v2109_v50, %v2107_v48  ;;  %v2998_v1 = vpack.c.bf16 %v2876_v51, %v2874_v49 }
 0x2e0   : > { %v1853_v2 = vadd.f32 %v1852_v24, %v6408_v32  ;;  %v2452_v3 = vadd.f32 %v2451_v62, %v6546_v57  ;;  %v1854_v4 = vpop.f32.mrb[126].mxu1  ;;  %v2453_v5 = vpop.f32.mrb[142].mxu0  ;;  %v2176_v25 = vpack.c.bf16 %v2110_v54, %v2108_v52  ;;  %v2999_v6 = vpack.c.bf16 %v2877_v56, %v2875_v53 }
 0x2e1   : > { %v1983_v7 = vmul.f32 0.01, %v1851_v60  ;;  %v2750_v8 = vmul.f32 0.01, %v2450_v61  ;;  %v1855_v9 = vadd.f32 %v1854_v4, %v6405_v30  ;;  %v2454_v10 = vadd.f32 %v2453_v5, %v6543_v55  ;;  %v1856_v11 = vpop.f32.mrb[127].mxu1  ;;  %v2455_v12 = vpop.f32.mrb[143].mxu0 }
 0x2e2   : > { %v1984_v13 = vmul.f32 0.01, %v1853_v2  ;;  %v2751_v14 = vmul.f32 0.01, %v2452_v3  ;;  %v1857_v15 = vadd.f32 %v1856_v11, %v6408_v32  ;;  %v2456_v16 = vadd.f32 %v2455_v12, %v6546_v57  ;;  %2717 = vmatprep.mubr.bf16.mxu0 %v2176_v25  ;;  %3316 = vmatprep.mubr.bf16.mxu1 %v2999_v6  ;;  %v6000_v32 = vld [vmem:[#allocation2 + $0x3b0] ss:$8 sps:$4 sm:$0xff]  }
 0x2e3   : > { %v1985_v17 = vmul.f32 0.01, %v1855_v9  ;;  %v2752_v18 = vmul.f32 0.01, %v2454_v10  ;;  %2718 = vmatmul.mubr.bf16.gmra.mrb[248].mxu0 %v2175_v63  ;;  %3317 = vmatmul.mubr.bf16.gmra.mrb[136].mxu1 %v2998_v1  ;;  %v2111_v22 = vmax.f32 %v1851_v60, %v1983_v7  ;;  %v2878_v30 = vmax.f32 %v2450_v61, %v2750_v8  ;;  %v6003_v11 = vld [vmem:[#allocation2 + $0x3c0] ss:$8 sps:$4 sm:$0xff]  }
 0x2e4   : > { %v1986_v19 = vmul.f32 0.01, %v1857_v15  ;;  %v2753_v20 = vmul.f32 0.01, %v2456_v16  ;;  %v2112_v28 = vmax.f32 %v1853_v2, %v1984_v13  ;;  %v2879_v29 = vmax.f32 %v2452_v3, %v2751_v14  ;;  %4166 = vmatpush1.bf16.msra.mxu0 %v6000_v32  ;;  %v6005_v12 = vld [vmem:[#allocation2 + $0x3c4] ss:$8 sps:$4 sm:$0xff]  }
 0x2e5   : > { %v2113_v26 = vmax.f32 %v1855_v9, %v1985_v17  ;;  %v2880_v27 = vmax.f32 %v2454_v10, %v2752_v18  ;;  %4167 = vmatprep.subr.bf16.mxu0 %v6005_v12 }
 0x2e6   : > { %v2114_v31 = vmax.f32 %v1857_v15, %v1986_v19  ;;  %v2881_v33 = vmax.f32 %v2456_v16, %v2753_v20  ;;  %v2459_v34 = vpop.f32.mrb[144].mxu0 }
 0x2e7   : > { %v2460_v36 = vadd.f32 %v2459_v34, %v6543_v55  ;;  %v2461_v37 = vpop.f32.mrb[145].mxu0  ;;  %v2177_v38 = vpack.c.bf16 %v2113_v26, %v2111_v22  ;;  %v3000_v39 = vpack.c.bf16 %v2880_v27, %v2878_v30 }
 0x2e8   : > { %v2462_v40 = vadd.f32 %v2461_v37, %v6546_v57  ;;  %v2463_v41 = vpop.f32.mrb[146].mxu0  ;;  %v2178_v42 = vpack.c.bf16 %v2114_v31, %v2112_v28  ;;  %v3001_v43 = vpack.c.bf16 %v2881_v33, %v2879_v29  ;;  %4168 = vmatpush1.bf16.msra.mxu0 %v6003_v11 }
 0x2e9   : > { %v2754_v44 = vmul.f32 0.01, %v2460_v36  ;;  %v2464_v45 = vadd.f32 %v2463_v41, %v6543_v55  ;;  %v2465_v46 = vpop.f32.mrb[147].mxu0 }
 0x2ea   : > { %v2755_v47 = vmul.f32 0.01, %v2462_v40  ;;  %v2466_v48 = vadd.f32 %v2465_v46, %v6546_v57  ;;  %2727 = vmatprep.mubr.bf16.mxu0 %v2178_v42  ;;  %3326 = vmatprep.mubr.bf16.mxu1 %v3001_v43 }
 0x2eb   : > { %v2756_v49 = vmul.f32 0.01, %v2464_v45  ;;  %2728 = vmatmul.mubr.bf16.gmra.mrb[252].mxu0 %v2177_v38  ;;  %3327 = vmatmul.mubr.bf16.gmra.mrb[140].mxu1 %v3000_v39  ;;  %v2882_v51 = vmax.f32 %v2460_v36, %v2754_v44 }
 0x2ec   : > { %v2757_v50 = vmul.f32 0.01, %v2466_v48  ;;  %v2883_v53 = vmax.f32 %v2462_v40, %v2755_v47 }
 0x2ed   : > { %v2884_v52 = vmax.f32 %v2464_v45, %v2756_v49 }
 0x2ee   : > { %v2885_v54 = vmax.f32 %v2466_v48, %v2757_v50  ;;  %v2469_v56 = vpop.f32.mrb[148].mxu0 }
 0x2ef   : > { %v2470_v58 = vadd.f32 %v2469_v56, %v6543_v55  ;;  %v2471_v59 = vpop.f32.mrb[149].mxu0  ;;  %v3002_v60 = vpack.c.bf16 %v2884_v52, %v2882_v51 }
 0x2f0   : > { %v2472_v61 = vadd.f32 %v2471_v59, %v6546_v57  ;;  %v2473_v24 = vpop.f32.mrb[150].mxu0  ;;  %v3003_v62 = vpack.c.bf16 %v2885_v54, %v2883_v53  ;;  %v6006_v53 = vld [vmem:[#allocation2 + $0x3d0] ss:$8 sps:$4 sm:$0xff]   ;;  %v6008_v54 = vld [vmem:[#allocation2 + $0x3d4] ss:$8 sps:$4 sm:$0xff]  }
 0x2f1   : > { %v2758_v63 = vmul.f32 0.01, %v2470_v58  ;;  %v2474_v1 = vadd.f32 %v2473_v24, %v6543_v55  ;;  %v2475_v2 = vpop.f32.mrb[151].mxu0  ;;  %4169 = vmatprep.subr.bf16.mxu0 %v6008_v54 }
 0x2f2   : > { %v2759_v3 = vmul.f32 0.01, %v2472_v61  ;;  %v2476_v4 = vadd.f32 %v2475_v2, %v6546_v57  ;;  %3336 = vmatprep.mubr.bf16.mxu1 %v3003_v62  ;;  %4170 = vmatpush1.bf16.msra.mxu0 %v6006_v53 }
 0x2f3   : > { %v2760_v5 = vmul.f32 0.01, %v2474_v1  ;;  %3337 = vmatmul.mubr.bf16.gmra.mrb[144].mxu1 %v3002_v60  ;;  %v2886_v6 = vmax.f32 %v2470_v58, %v2758_v63 }
 0x2f4   : > { %v2761_v25 = vmul.f32 0.01, %v2476_v4  ;;  %v2887_v8 = vmax.f32 %v2472_v61, %v2759_v3 }
 0x2f5   : > { %v2888_v7 = vmax.f32 %v2474_v1, %v2760_v5 }
 0x2f6   : > { %v2889_v9 = vmax.f32 %v2476_v4, %v2761_v25  ;;  %v2479_v10 = vpop.f32.mrb[152].mxu0 }
 0x2f7   : > { %v2480_v13 = vadd.f32 %v2479_v10, %v6543_v55  ;;  %v2481_v14 = vpop.f32.mrb[153].mxu0  ;;  %v3004_v15 = vpack.c.bf16 %v2888_v7, %v2886_v6 }
 0x2f8   : > { %v2482_v16 = vadd.f32 %v2481_v14, %v6546_v57  ;;  %v2483_v17 = vpop.f32.mrb[154].mxu0  ;;  %v3005_v18 = vpack.c.bf16 %v2889_v9, %v2887_v8 }
 0x2f9   : > { %v2762_v19 = vmul.f32 0.01, %v2480_v13  ;;  %v2484_v20 = vadd.f32 %v2483_v17, %v6543_v55  ;;  %v2485_v22 = vpop.f32.mrb[155].mxu0 }
 0x2fa   : > { %v2763_v30 = vmul.f32 0.01, %v2482_v16  ;;  %v2486_v26 = vadd.f32 %v2485_v22, %v6546_v57  ;;  %3346 = vmatprep.mubr.bf16.mxu1 %v3005_v18 }
 0x2fb   : > { %v2764_v27 = vmul.f32 0.01, %v2484_v20  ;;  %3347 = vmatmul.mubr.bf16.gmra.mrb[148].mxu1 %v3004_v15  ;;  %v2890_v29 = vmax.f32 %v2480_v13, %v2762_v19 }
 0x2fc   : > { %v2765_v28 = vmul.f32 0.01, %v2486_v26  ;;  %v2891_v33 = vmax.f32 %v2482_v16, %v2763_v30 }
 0x2fd   : > { %v2892_v31 = vmax.f32 %v2484_v20, %v2764_v27 }
 0x2fe   : > { %v2893_v34 = vmax.f32 %v2486_v26, %v2765_v28  ;;  %v2489_v32 = vpop.f32.mrb[156].mxu0 }
 0x2ff   : > { %v2490_v35 = vadd.f32 %v2489_v32, %v6543_v55  ;;  %v2491_v36 = vpop.f32.mrb[157].mxu0  ;;  %v3006_v37 = vpack.c.bf16 %v2892_v31, %v2890_v29 }
 0x300   : > { %v2492_v38 = vadd.f32 %v2491_v36, %v6546_v57  ;;  %v2493_v39 = vpop.f32.mrb[158].mxu0  ;;  %v3007_v40 = vpack.c.bf16 %v2893_v34, %v2891_v33  ;;  %v6009_v33 = vld [vmem:[#allocation2 + $0x3e0] ss:$8 sps:$4 sm:$0xff]   ;;  %v6011_v34 = vld [vmem:[#allocation2 + $0x3e4] ss:$8 sps:$4 sm:$0xff]  }
 0x301   : > { %v2766_v41 = vmul.f32 0.01, %v2490_v35  ;;  %v2494_v42 = vadd.f32 %v2493_v39, %v6543_v55  ;;  %v2495_v43 = vpop.f32.mrb[159].mxu0  ;;  %4171 = vmatprep.subr.bf16.mxu0 %v6011_v34 }
 0x302   : > { %v2767_v44 = vmul.f32 0.01, %v2492_v38  ;;  %v2496_v45 = vadd.f32 %v2495_v43, %v6546_v57  ;;  %3356 = vmatprep.mubr.bf16.mxu1 %v3007_v40  ;;  %4172 = vmatpush1.bf16.msra.mxu0 %v6009_v33 }
 0x303   : > { %v2768_v46 = vmul.f32 0.01, %v2494_v42  ;;  %3357 = vmatmul.mubr.bf16.gmra.mrb[152].mxu1 %v3006_v37  ;;  %v2894_v48 = vmax.f32 %v2490_v35, %v2766_v41 }
 0x304   : > { %v2769_v47 = vmul.f32 0.01, %v2496_v45  ;;  %v2895_v50 = vmax.f32 %v2492_v38, %v2767_v44 }
 0x305   : > { %v2896_v49 = vmax.f32 %v2494_v42, %v2768_v46 }
 0x306   : > { %v2897_v51 = vmax.f32 %v2496_v45, %v2769_v47  ;;  %v2499_v52 = vpop.f32.mrb[160].mxu0 }
 0x307   : > { %v2500_v56 = vadd.f32 %v2499_v52, %v6543_v55  ;;  %v2501_v58 = vpop.f32.mrb[161].mxu0  ;;  %v3008_v59 = vpack.c.bf16 %v2896_v49, %v2894_v48 }
 0x308   : > { %v2502_v60 = vadd.f32 %v2501_v58, %v6546_v57  ;;  %v2503_v61 = vpop.f32.mrb[162].mxu0  ;;  %v3009_v24 = vpack.c.bf16 %v2897_v51, %v2895_v50 }
 0x309   : > { %v2770_v62 = vmul.f32 0.01, %v2500_v56  ;;  %v2504_v63 = vadd.f32 %v2503_v61, %v6543_v55  ;;  %v2505_v1 = vpop.f32.mrb[163].mxu0 }
 0x30a   : > { %v2771_v2 = vmul.f32 0.01, %v2502_v60  ;;  %v2506_v3 = vadd.f32 %v2505_v1, %v6546_v57  ;;  %3366 = vmatprep.mubr.bf16.mxu1 %v3009_v24 }
 0x30b   : > { %v2772_v4 = vmul.f32 0.01, %v2504_v63  ;;  %3367 = vmatmul.mubr.bf16.gmra.mrb[156].mxu1 %v3008_v59  ;;  %v2898_v25 = vmax.f32 %v2500_v56, %v2770_v62 }
 0x30c   : > { %v2773_v5 = vmul.f32 0.01, %v2506_v3  ;;  %v2899_v7 = vmax.f32 %v2502_v60, %v2771_v2 }
 0x30d   : > { %v2900_v6 = vmax.f32 %v2504_v63, %v2772_v4 }
 0x30e   : > { %v2901_v8 = vmax.f32 %v2506_v3, %v2773_v5  ;;  %v2509_v9 = vpop.f32.mrb[164].mxu0 }
 0x30f   : > { %v2510_v10 = vadd.f32 %v2509_v9, %v6543_v55  ;;  %v2511_v11 = vpop.f32.mrb[165].mxu0  ;;  %v3010_v12 = vpack.c.bf16 %v2900_v6, %v2898_v25 }
 0x310   : > { %v2512_v13 = vadd.f32 %v2511_v11, %v6546_v57  ;;  %v2513_v14 = vpop.f32.mrb[166].mxu0  ;;  %v3011_v15 = vpack.c.bf16 %v2901_v8, %v2899_v7  ;;  %v6012_v7 = vld [vmem:[#allocation2 + $0x3f0] ss:$8 sps:$4 sm:$0xff]   ;;  %v6014_v8 = vld [vmem:[#allocation2 + $0x3f4] ss:$8 sps:$4 sm:$0xff]  }
 0x311   : > { %v2774_v16 = vmul.f32 0.01, %v2510_v10  ;;  %v2514_v17 = vadd.f32 %v2513_v14, %v6543_v55  ;;  %v2515_v18 = vpop.f32.mrb[167].mxu0  ;;  %4173 = vmatprep.subr.bf16.mxu0 %v6014_v8  ;;  %v6636_v8 = vld [vmem:[%s7312_s3 + $0x8] sm:$0xff]  }
 0x312   : > { %v2775_v19 = vmul.f32 0.01, %v2512_v13  ;;  %v2516_v20 = vadd.f32 %v2515_v18, %v6546_v57  ;;  %3376 = vmatprep.mubr.bf16.mxu1 %v3011_v15  ;;  %4174 = vmatpush1.bf16.msra.mxu0 %v6012_v7 }
 0x313   : > { %v2776_v22 = vmul.f32 0.01, %v2514_v17  ;;  %3377 = vmatmul.mubr.bf16.gmra.mrb[160].mxu1 %v3010_v12  ;;  %v2902_v26 = vmax.f32 %v2510_v10, %v2774_v16  ;;  %4951 = vmatprep.subr.bf16.mxu0 %v6074_v0 }
 0x314   : > { %v2777_v30 = vmul.f32 0.01, %v2516_v20  ;;  %v2903_v28 = vmax.f32 %v2512_v13, %v2775_v19 }
 0x315   : > { %v2904_v27 = vmax.f32 %v2514_v17, %v2776_v22 }
 0x316   : > { %v2905_v29 = vmax.f32 %v2516_v20, %v2777_v30  ;;  %v2519_v31 = vpop.f32.mrb[168].mxu0 }
 0x317   : > { %v2520_v32 = vadd.f32 %v2519_v31, %v6543_v55  ;;  %v2521_v35 = vpop.f32.mrb[169].mxu0  ;;  %v3012_v36 = vpack.c.bf16 %v2904_v27, %v2902_v26 }
 0x318   : > { %v2522_v37 = vadd.f32 %v2521_v35, %v6546_v57  ;;  %v2523_v38 = vpop.f32.mrb[170].mxu0  ;;  %v3013_v39 = vpack.c.bf16 %v2905_v29, %v2903_v28 }
 0x319   : > { %v2778_v40 = vmul.f32 0.01, %v2520_v32  ;;  %v2524_v41 = vadd.f32 %v2523_v38, %v6543_v55  ;;  %v2525_v42 = vpop.f32.mrb[171].mxu0 }
 0x31a   : > { %v2779_v43 = vmul.f32 0.01, %v2522_v37  ;;  %v2526_v44 = vadd.f32 %v2525_v42, %v6546_v57  ;;  %3386 = vmatprep.mubr.bf16.mxu1 %v3013_v39 }
 0x31b   : > { %v2780_v45 = vmul.f32 0.01, %v2524_v41  ;;  %3387 = vmatmul.mubr.bf16.gmra.mrb[164].mxu1 %v3012_v36  ;;  %v2906_v47 = vmax.f32 %v2520_v32, %v2778_v40  ;;  %v6621_v32 = vld [vmem:[%s7312_s3] sm:$0xff]  }
 0x31c   : > { %v2781_v46 = vmul.f32 0.01, %v2526_v44  ;;  %v2907_v49 = vmax.f32 %v2522_v37, %v2779_v43  ;;  %5747 = vmatpush1.bf16.msra.mxu1 %v6621_v32 }
 0x31d   : > { %v2908_v48 = vmax.f32 %v2524_v41, %v2780_v45  ;;  %5732 = vmatprep.subr.bf16.mxu1 %v6074_v0 }
 0x31e   : > { %v2909_v50 = vmax.f32 %v2526_v44, %v2781_v46  ;;  %v2529_v51 = vpop.f32.mrb[172].mxu0 }
 0x31f   : > { %v2530_v52 = vadd.f32 %v2529_v51, %v6543_v55  ;;  %v2531_v53 = vpop.f32.mrb[173].mxu0  ;;  %v3014_v54 = vpack.c.bf16 %v2908_v48, %v2906_v47 }
 0x320   : > { %v2532_v56 = vadd.f32 %v2531_v53, %v6546_v57  ;;  %v2533_v58 = vpop.f32.mrb[174].mxu0  ;;  %v3015_v59 = vpack.c.bf16 %v2909_v50, %v2907_v49  ;;  %5748 = vmatpush1.bf16.msra.mxu1 %v6636_v8 }
 0x321   : > { %v2782_v60 = vmul.f32 0.01, %v2530_v52  ;;  %v2534_v61 = vadd.f32 %v2533_v58, %v6543_v55  ;;  %v2535_v24 = vpop.f32.mrb[175].mxu0  ;;  %5733 = vmatprep.subr.bf16.mxu1 %v6074_v0 }
 0x322   : > { %v2783_v62 = vmul.f32 0.01, %v2532_v56  ;;  %v2536_v63 = vadd.f32 %v2535_v24, %v6546_v57  ;;  %3396 = vmatprep.mubr.bf16.mxu1 %v3015_v59 }
 0x323   : > { %v2784_v1 = vmul.f32 0.01, %v2534_v61  ;;  %3397 = vmatmul.mubr.bf16.gmra.mrb[168].mxu1 %v3014_v54  ;;  %v2910_v3 = vmax.f32 %v2530_v52, %v2782_v60 }
 0x324   : > { %v2785_v2 = vmul.f32 0.01, %v2536_v63  ;;  %v2911_v5 = vmax.f32 %v2532_v56, %v2783_v62 }
 0x325   : > { %v2912_v4 = vmax.f32 %v2534_v61, %v2784_v1 }
 0x326   : > { %v2913_v25 = vmax.f32 %v2536_v63, %v2785_v2  ;;  %v2539_v6 = vpop.f32.mrb[176].mxu0 }
 0x327   : > { %v2540_v9 = vadd.f32 %v2539_v6, %v6543_v55  ;;  %v2541_v10 = vpop.f32.mrb[177].mxu0  ;;  %v3016_v11 = vpack.c.bf16 %v2912_v4, %v2910_v3 }
 0x328   : > { %v2542_v12 = vadd.f32 %v2541_v10, %v6546_v57  ;;  %v2543_v13 = vpop.f32.mrb[178].mxu0  ;;  %v3017_v14 = vpack.c.bf16 %v2913_v25, %v2911_v5 }
 0x329   : > { %v2786_v15 = vmul.f32 0.01, %v2540_v9  ;;  %v2544_v16 = vadd.f32 %v2543_v13, %v6543_v55  ;;  %v2545_v17 = vpop.f32.mrb[179].mxu0 }
 0x32a   : > { %v2787_v18 = vmul.f32 0.01, %v2542_v12  ;;  %v2546_v19 = vadd.f32 %v2545_v17, %v6546_v57  ;;  %3406 = vmatprep.mubr.bf16.mxu1 %v3017_v14 }
 0x32b   : > { %v2788_v20 = vmul.f32 0.01, %v2544_v16  ;;  %3407 = vmatmul.mubr.bf16.gmra.mrb[172].mxu1 %v3016_v11  ;;  %v2914_v30 = vmax.f32 %v2540_v9, %v2786_v15 }
 0x32c   : > { %v2789_v22 = vmul.f32 0.01, %v2546_v19  ;;  %v2915_v27 = vmax.f32 %v2542_v12, %v2787_v18 }
 0x32d   : > { %v2916_v26 = vmax.f32 %v2544_v16, %v2788_v20 }
 0x32e   : > { %v2917_v28 = vmax.f32 %v2546_v19, %v2789_v22  ;;  %v2549_v29 = vpop.f32.mrb[180].mxu0 }
 0x32f   : > { %v2550_v31 = vadd.f32 %v2549_v29, %v6543_v55  ;;  %v2551_v33 = vpop.f32.mrb[181].mxu0  ;;  %v3018_v34 = vpack.c.bf16 %v2916_v26, %v2914_v30 }
 0x330   : > { %v2552_v35 = vadd.f32 %v2551_v33, %v6546_v57  ;;  %v2553_v36 = vpop.f32.mrb[182].mxu0  ;;  %v3019_v37 = vpack.c.bf16 %v2917_v28, %v2915_v27 }
 0x331   : > { %v2790_v38 = vmul.f32 0.01, %v2550_v31  ;;  %v2554_v39 = vadd.f32 %v2553_v36, %v6543_v55  ;;  %v2555_v40 = vpop.f32.mrb[183].mxu0 }
 0x332   : > { %v2791_v41 = vmul.f32 0.01, %v2552_v35  ;;  %v2556_v42 = vadd.f32 %v2555_v40, %v6546_v57  ;;  %3416 = vmatprep.mubr.bf16.mxu1 %v3019_v37 }
 0x333   : > { %v2792_v43 = vmul.f32 0.01, %v2554_v39  ;;  %3417 = vmatmul.mubr.bf16.gmra.mrb[176].mxu1 %v3018_v34  ;;  %v2918_v45 = vmax.f32 %v2550_v31, %v2790_v38 }
 0x334   : > { %v2793_v44 = vmul.f32 0.01, %v2556_v42  ;;  %v2919_v47 = vmax.f32 %v2552_v35, %v2791_v41 }
 0x335   : > { %v2920_v46 = vmax.f32 %v2554_v39, %v2792_v43 }
 0x336   : > { %v2921_v48 = vmax.f32 %v2556_v42, %v2793_v44  ;;  %v2559_v49 = vpop.f32.mrb[184].mxu0 }
 0x337   : > { %v2560_v50 = vadd.f32 %v2559_v49, %v6543_v55  ;;  %v2561_v51 = vpop.f32.mrb[185].mxu0  ;;  %v3020_v52 = vpack.c.bf16 %v2920_v46, %v2918_v45 }
 0x338   : > { %v2562_v53 = vadd.f32 %v2561_v51, %v6546_v57  ;;  %v2563_v54 = vpop.f32.mrb[186].mxu0  ;;  %v3021_v56 = vpack.c.bf16 %v2921_v48, %v2919_v47 }
 0x339   : > { %v2794_v58 = vmul.f32 0.01, %v2560_v50  ;;  %v2564_v59 = vadd.f32 %v2563_v54, %v6543_v55  ;;  %v2565_v60 = vpop.f32.mrb[187].mxu0 }
 0x33a   : > { %v2795_v61 = vmul.f32 0.01, %v2562_v53  ;;  %v2566_v24 = vadd.f32 %v2565_v60, %v6546_v57  ;;  %3426 = vmatprep.mubr.bf16.mxu1 %v3021_v56 }
 0x33b   : > { %v2796_v62 = vmul.f32 0.01, %v2564_v59  ;;  %3427 = vmatmul.mubr.bf16.gmra.mrb[180].mxu1 %v3020_v52  ;;  %v2922_v1 = vmax.f32 %v2560_v50, %v2794_v58  ;;  %v6651_v50 = vld [vmem:[%s7312_s3 + $0x10] sm:$0xff]  }
 0x33c   : > { %v2797_v63 = vmul.f32 0.01, %v2566_v24  ;;  %v2923_v3 = vmax.f32 %v2562_v53, %v2795_v61  ;;  %5749 = vmatpush1.bf16.msra.mxu1 %v6651_v50 }
 0x33d   : > { %v2924_v2 = vmax.f32 %v2564_v59, %v2796_v62  ;;  %5734 = vmatprep.subr.bf16.mxu1 %v6074_v0 }
 0x33e   : > { %v2925_v4 = vmax.f32 %v2566_v24, %v2797_v63  ;;  %v2569_v5 = vpop.f32.mrb[188].mxu0 }
 0x33f   : > { %v2570_v25 = vadd.f32 %v2569_v5, %v6543_v55  ;;  %v2571_v6 = vpop.f32.mrb[189].mxu0  ;;  %v3022_v7 = vpack.c.bf16 %v2924_v2, %v2922_v1 }
 0x340   : > { %v2572_v9 = vadd.f32 %v2571_v6, %v6546_v57  ;;  %v2573_v10 = vpop.f32.mrb[190].mxu0  ;;  %v3023_v11 = vpack.c.bf16 %v2925_v4, %v2923_v3 }
 0x341   : > { %v2798_v12 = vmul.f32 0.01, %v2570_v25  ;;  %v2574_v13 = vadd.f32 %v2573_v10, %v6543_v55  ;;  %v2575_v14 = vpop.f32.mrb[191].mxu0 }
 0x342   : > { %v2799_v15 = vmul.f32 0.01, %v2572_v9  ;;  %v2576_v16 = vadd.f32 %v2575_v14, %v6546_v57  ;;  %3436 = vmatprep.mubr.bf16.mxu1 %v3023_v11 }
 0x343   : > { %v2800_v17 = vmul.f32 0.01, %v2574_v13  ;;  %3437 = vmatmul.mubr.bf16.gmra.mrb[184].mxu1 %v3022_v7  ;;  %v2926_v19 = vmax.f32 %v2570_v25, %v2798_v12 }
 0x344   : > { %v2801_v18 = vmul.f32 0.01, %v2576_v16  ;;  %v2927_v22 = vmax.f32 %v2572_v9, %v2799_v15 }
 0x345   : > { %v2928_v20 = vmax.f32 %v2574_v13, %v2800_v17 }
 0x346   : > { %v2929_v30 = vmax.f32 %v2576_v16, %v2801_v18  ;;  %v2579_v26 = vpop.f32.mrb[192].mxu0 }
 0x347   : > { %v2580_v27 = vadd.f32 %v2579_v26, %v6543_v55  ;;  %v2581_v28 = vpop.f32.mrb[193].mxu0  ;;  %v3024_v29 = vpack.c.bf16 %v2928_v20, %v2926_v19 }
 0x348   : > { %v2582_v31 = vadd.f32 %v2581_v28, %v6546_v57  ;;  %v2583_v33 = vpop.f32.mrb[194].mxu0  ;;  %v3025_v34 = vpack.c.bf16 %v2929_v30, %v2927_v22  ;;  %v6666_v28 = vld [vmem:[%s7312_s3 + $0x18] sm:$0xff]  }
 0x349   : > { %v2802_v35 = vmul.f32 0.01, %v2580_v27  ;;  %v2584_v36 = vadd.f32 %v2583_v33, %v6543_v55  ;;  %v2585_v37 = vpop.f32.mrb[195].mxu0  ;;  %5750 = vmatpush1.bf16.msra.mxu1 %v6666_v28 }
 0x34a   : > { %v2803_v38 = vmul.f32 0.01, %v2582_v31  ;;  %v2586_v39 = vadd.f32 %v2585_v37, %v6546_v57  ;;  %3446 = vmatprep.mubr.bf16.mxu1 %v3025_v34  ;;  %5735 = vmatprep.subr.bf16.mxu1 %v6074_v0 }
 0x34b   : > { %v2804_v40 = vmul.f32 0.01, %v2584_v36  ;;  %3447 = vmatmul.mubr.bf16.gmra.mrb[188].mxu1 %v3024_v29  ;;  %v2930_v42 = vmax.f32 %v2580_v27, %v2802_v35 }
 0x34c   : > { %v2805_v41 = vmul.f32 0.01, %v2586_v39  ;;  %v2931_v44 = vmax.f32 %v2582_v31, %v2803_v38 }
 0x34d   : > { %v2932_v43 = vmax.f32 %v2584_v36, %v2804_v40 }
 0x34e   : > { %v2933_v45 = vmax.f32 %v2586_v39, %v2805_v41  ;;  %v2589_v46 = vpop.f32.mrb[196].mxu0 }
 0x34f   : > { %v2590_v47 = vadd.f32 %v2589_v46, %v6543_v55  ;;  %v2591_v48 = vpop.f32.mrb[197].mxu0  ;;  %v3026_v49 = vpack.c.bf16 %v2932_v43, %v2930_v42 }
 0x350   : > { %v2592_v51 = vadd.f32 %v2591_v48, %v6546_v57  ;;  %v2593_v52 = vpop.f32.mrb[198].mxu0  ;;  %v3027_v53 = vpack.c.bf16 %v2933_v45, %v2931_v44 }
 0x351   : > { %v2806_v54 = vmul.f32 0.01, %v2590_v47  ;;  %v2594_v56 = vadd.f32 %v2593_v52, %v6543_v55  ;;  %v2595_v58 = vpop.f32.mrb[199].mxu0 }
 0x352   : > { %v2807_v59 = vmul.f32 0.01, %v2592_v51  ;;  %v2596_v60 = vadd.f32 %v2595_v58, %v6546_v57  ;;  %3456 = vmatprep.mubr.bf16.mxu1 %v3027_v53 }
 0x353   : > { %v2808_v61 = vmul.f32 0.01, %v2594_v56  ;;  %3457 = vmatmul.mubr.bf16.gmra.mrb[192].mxu1 %v3026_v49  ;;  %v2934_v62 = vmax.f32 %v2590_v47, %v2806_v54 }
 0x354   : > { %v2809_v24 = vmul.f32 0.01, %v2596_v60  ;;  %v2935_v1 = vmax.f32 %v2592_v51, %v2807_v59 }
 0x355   : > { %v2936_v63 = vmax.f32 %v2594_v56, %v2808_v61 }
 0x356   : > { %v2937_v2 = vmax.f32 %v2596_v60, %v2809_v24  ;;  %v2599_v3 = vpop.f32.mrb[200].mxu0 }
 0x357   : > { %v2600_v4 = vadd.f32 %v2599_v3, %v6543_v55  ;;  %v2601_v5 = vpop.f32.mrb[201].mxu0  ;;  %v3028_v25 = vpack.c.bf16 %v2936_v63, %v2934_v62 }
 0x358   : > { %v2602_v6 = vadd.f32 %v2601_v5, %v6546_v57  ;;  %v2603_v7 = vpop.f32.mrb[202].mxu0  ;;  %v3029_v9 = vpack.c.bf16 %v2937_v2, %v2935_v1 }
 0x359   : > { %v2810_v10 = vmul.f32 0.01, %v2600_v4  ;;  %v2604_v11 = vadd.f32 %v2603_v7, %v6543_v55  ;;  %v2605_v12 = vpop.f32.mrb[203].mxu0 }
 0x35a   : > { %v2811_v13 = vmul.f32 0.01, %v2602_v6  ;;  %v2606_v14 = vadd.f32 %v2605_v12, %v6546_v57  ;;  %3466 = vmatprep.mubr.bf16.mxu1 %v3029_v9 }
 0x35b   : > { %v2812_v15 = vmul.f32 0.01, %v2604_v11  ;;  %3467 = vmatmul.mubr.bf16.gmra.mrb[196].mxu1 %v3028_v25  ;;  %v2938_v17 = vmax.f32 %v2600_v4, %v2810_v10  ;;  %v6681_v25 = vld [vmem:[%s7312_s3 + $0x20] sm:$0xff]  }
 0x35c   : > { %v2813_v16 = vmul.f32 0.01, %v2606_v14  ;;  %v2939_v19 = vmax.f32 %v2602_v6, %v2811_v13  ;;  %5751 = vmatpush1.bf16.msra.mxu1 %v6681_v25 }
 0x35d   : > { %v2940_v18 = vmax.f32 %v2604_v11, %v2812_v15  ;;  %5736 = vmatprep.subr.bf16.mxu1 %v6074_v0 }
 0x35e   : > { %v2941_v20 = vmax.f32 %v2606_v14, %v2813_v16  ;;  %v2609_v22 = vpop.f32.mrb[204].mxu0 }
 0x35f   : > { %v2610_v30 = vadd.f32 %v2609_v22, %v6543_v55  ;;  %v2611_v26 = vpop.f32.mrb[205].mxu0  ;;  %v3030_v27 = vpack.c.bf16 %v2940_v18, %v2938_v17 }
 0x360   : > { %v2612_v29 = vadd.f32 %v2611_v26, %v6546_v57  ;;  %v2613_v31 = vpop.f32.mrb[206].mxu0  ;;  %v3031_v33 = vpack.c.bf16 %v2941_v20, %v2939_v19 }
 0x361   : > { %v2814_v34 = vmul.f32 0.01, %v2610_v30  ;;  %v2614_v35 = vadd.f32 %v2613_v31, %v6543_v55  ;;  %v2615_v36 = vpop.f32.mrb[207].mxu0 }
 0x362   : > { %v2815_v37 = vmul.f32 0.01, %v2612_v29  ;;  %v2616_v38 = vadd.f32 %v2615_v36, %v6546_v57  ;;  %3476 = vmatprep.mubr.bf16.mxu1 %v3031_v33 }
 0x363   : > { %v2816_v39 = vmul.f32 0.01, %v2614_v35  ;;  %3477 = vmatmul.mubr.bf16.gmra.mrb[200].mxu1 %v3030_v27  ;;  %v2942_v41 = vmax.f32 %v2610_v30, %v2814_v34 }
 0x364   : > { %v2817_v40 = vmul.f32 0.01, %v2616_v38  ;;  %v2943_v43 = vmax.f32 %v2612_v29, %v2815_v37 }
 0x365   : > { %v2944_v42 = vmax.f32 %v2614_v35, %v2816_v39 }
 0x366   : > { %v2945_v44 = vmax.f32 %v2616_v38, %v2817_v40  ;;  %v2619_v45 = vpop.f32.mrb[208].mxu0 }
 0x367   : > { %v2620_v46 = vadd.f32 %v2619_v45, %v6543_v55  ;;  %v2621_v47 = vpop.f32.mrb[209].mxu0  ;;  %v3032_v48 = vpack.c.bf16 %v2944_v42, %v2942_v41 }
 0x368   : > { %v2622_v49 = vadd.f32 %v2621_v47, %v6546_v57  ;;  %v2623_v51 = vpop.f32.mrb[210].mxu0  ;;  %v3033_v52 = vpack.c.bf16 %v2945_v44, %v2943_v43 }
 0x369   : > { %v2818_v53 = vmul.f32 0.01, %v2620_v46  ;;  %v2624_v54 = vadd.f32 %v2623_v51, %v6543_v55  ;;  %v2625_v56 = vpop.f32.mrb[211].mxu0 }
 0x36a   : > { %v2819_v58 = vmul.f32 0.01, %v2622_v49  ;;  %v2626_v59 = vadd.f32 %v2625_v56, %v6546_v57  ;;  %3486 = vmatprep.mubr.bf16.mxu1 %v3033_v52 }
 0x36b   : > { %v2820_v60 = vmul.f32 0.01, %v2624_v54  ;;  %3487 = vmatmul.mubr.bf16.gmra.mrb[204].mxu1 %v3032_v48  ;;  %v2946_v24 = vmax.f32 %v2620_v46, %v2818_v53 }
 0x36c   : > { %v2821_v61 = vmul.f32 0.01, %v2626_v59  ;;  %v2947_v63 = vmax.f32 %v2622_v49, %v2819_v58  ;;  %v6696_v49 = vld [vmem:[%s7312_s3 + $0x28] sm:$0xff]  }
 0x36d   : > { %v2948_v62 = vmax.f32 %v2624_v54, %v2820_v60  ;;  %5752 = vmatpush1.bf16.msra.mxu1 %v6696_v49 }
 0x36e   : > { %v2949_v1 = vmax.f32 %v2626_v59, %v2821_v61  ;;  %v2629_v2 = vpop.f32.mrb[212].mxu0  ;;  %5737 = vmatprep.subr.bf16.mxu1 %v6074_v0 }
 0x36f   : > { %v2630_v3 = vadd.f32 %v2629_v2, %v6543_v55  ;;  %v2631_v4 = vpop.f32.mrb[213].mxu0  ;;  %v3034_v5 = vpack.c.bf16 %v2948_v62, %v2946_v24 }
 0x370   : > { %v2632_v6 = vadd.f32 %v2631_v4, %v6546_v57  ;;  %v2633_v7 = vpop.f32.mrb[214].mxu0  ;;  %v3035_v9 = vpack.c.bf16 %v2949_v1, %v2947_v63 }
 0x371   : > { %v2822_v10 = vmul.f32 0.01, %v2630_v3  ;;  %v2634_v11 = vadd.f32 %v2633_v7, %v6543_v55  ;;  %v2635_v12 = vpop.f32.mrb[215].mxu0 }
 0x372   : > { %v2823_v13 = vmul.f32 0.01, %v2632_v6  ;;  %v2636_v14 = vadd.f32 %v2635_v12, %v6546_v57  ;;  %3496 = vmatprep.mubr.bf16.mxu1 %v3035_v9 }
 0x373   : > { %v2824_v15 = vmul.f32 0.01, %v2634_v11  ;;  %3497 = vmatmul.mubr.bf16.gmra.mrb[208].mxu1 %v3034_v5  ;;  %v2950_v17 = vmax.f32 %v2630_v3, %v2822_v10 }
 0x374   : > { %v2825_v16 = vmul.f32 0.01, %v2636_v14  ;;  %v2951_v19 = vmax.f32 %v2632_v6, %v2823_v13 }
 0x375   : > { %v2952_v18 = vmax.f32 %v2634_v11, %v2824_v15 }
 0x376   : > { %v2953_v20 = vmax.f32 %v2636_v14, %v2825_v16  ;;  %v2639_v22 = vpop.f32.mrb[216].mxu0 }
 0x377   : > { %v2640_v30 = vadd.f32 %v2639_v22, %v6543_v55  ;;  %v2641_v26 = vpop.f32.mrb[217].mxu0  ;;  %v3036_v27 = vpack.c.bf16 %v2952_v18, %v2950_v17 }
 0x378   : > { %v2642_v29 = vadd.f32 %v2641_v26, %v6546_v57  ;;  %v2643_v31 = vpop.f32.mrb[218].mxu0  ;;  %v3037_v33 = vpack.c.bf16 %v2953_v20, %v2951_v19 }
 0x379   : > { %v2826_v34 = vmul.f32 0.01, %v2640_v30  ;;  %v2644_v35 = vadd.f32 %v2643_v31, %v6543_v55  ;;  %v2645_v36 = vpop.f32.mrb[219].mxu0  ;;  %v6711_v31 = vld [vmem:[%s7312_s3 + $0x30] sm:$0xff]  }
 0x37a   : > { %v2827_v37 = vmul.f32 0.01, %v2642_v29  ;;  %v2646_v38 = vadd.f32 %v2645_v36, %v6546_v57  ;;  %3506 = vmatprep.mubr.bf16.mxu1 %v3037_v33  ;;  %5753 = vmatpush1.bf16.msra.mxu1 %v6711_v31 }
 0x37b   : > { %v2828_v39 = vmul.f32 0.01, %v2644_v35  ;;  %3507 = vmatmul.mubr.bf16.gmra.mrb[212].mxu1 %v3036_v27  ;;  %v2954_v41 = vmax.f32 %v2640_v30, %v2826_v34  ;;  %5738 = vmatprep.subr.bf16.mxu1 %v6074_v0 }
 0x37c   : > { %v2829_v40 = vmul.f32 0.01, %v2646_v38  ;;  %v2955_v43 = vmax.f32 %v2642_v29, %v2827_v37 }
 0x37d   : > { %v2956_v42 = vmax.f32 %v2644_v35, %v2828_v39 }
 0x37e   : > { %v2957_v44 = vmax.f32 %v2646_v38, %v2829_v40  ;;  %v2649_v45 = vpop.f32.mrb[220].mxu0 }
 0x37f   : > { %v2650_v46 = vadd.f32 %v2649_v45, %v6543_v55  ;;  %v2651_v47 = vpop.f32.mrb[221].mxu0  ;;  %v3038_v48 = vpack.c.bf16 %v2956_v42, %v2954_v41 }
 0x380   : > { %v2652_v51 = vadd.f32 %v2651_v47, %v6546_v57  ;;  %v2653_v52 = vpop.f32.mrb[222].mxu0  ;;  %v3039_v53 = vpack.c.bf16 %v2957_v44, %v2955_v43 }
 0x381   : > { %v2830_v54 = vmul.f32 0.01, %v2650_v46  ;;  %v2654_v56 = vadd.f32 %v2653_v52, %v6543_v55  ;;  %v2655_v58 = vpop.f32.mrb[223].mxu0 }
 0x382   : > { %v2831_v59 = vmul.f32 0.01, %v2652_v51  ;;  %v2656_v60 = vadd.f32 %v2655_v58, %v6546_v57  ;;  %3516 = vmatprep.mubr.bf16.mxu1 %v3039_v53 }
 0x383   : > { %v2832_v61 = vmul.f32 0.01, %v2654_v56  ;;  %3517 = vmatmul.mubr.bf16.gmra.mrb[216].mxu1 %v3038_v48  ;;  %v2958_v62 = vmax.f32 %v2650_v46, %v2830_v54 }
 0x384   : > { %v2833_v24 = vmul.f32 0.01, %v2656_v60  ;;  %v2959_v1 = vmax.f32 %v2652_v51, %v2831_v59 }
 0x385   : > { %v2960_v63 = vmax.f32 %v2654_v56, %v2832_v61 }
 0x386   : > { %v2961_v2 = vmax.f32 %v2656_v60, %v2833_v24  ;;  %v2659_v3 = vpop.f32.mrb[224].mxu0 }
 0x387   : > { %v2660_v4 = vadd.f32 %v2659_v3, %v6543_v55  ;;  %v2661_v5 = vpop.f32.mrb[225].mxu0  ;;  %v3040_v6 = vpack.c.bf16 %v2960_v63, %v2958_v62 }
 0x388   : > { %v2662_v7 = vadd.f32 %v2661_v5, %v6546_v57  ;;  %v2663_v9 = vpop.f32.mrb[226].mxu0  ;;  %v3041_v10 = vpack.c.bf16 %v2961_v2, %v2959_v1 }
 0x389   : > { %v2834_v11 = vmul.f32 0.01, %v2660_v4  ;;  %v2664_v12 = vadd.f32 %v2663_v9, %v6543_v55  ;;  %v2665_v13 = vpop.f32.mrb[227].mxu0 }
 0x38a   : > { %v2835_v14 = vmul.f32 0.01, %v2662_v7  ;;  %v2666_v15 = vadd.f32 %v2665_v13, %v6546_v57  ;;  %3526 = vmatprep.mubr.bf16.mxu1 %v3041_v10  ;;  %v6726_v10 = vld [vmem:[%s7312_s3 + $0x38] sm:$0xff]  }
 0x38b   : > { %v2836_v16 = vmul.f32 0.01, %v2664_v12  ;;  %3527 = vmatmul.mubr.bf16.gmra.mrb[220].mxu1 %v3040_v6  ;;  %v2962_v18 = vmax.f32 %v2660_v4, %v2834_v11 }
 0x38c   : > { %v2837_v17 = vmul.f32 0.01, %v2666_v15  ;;  %v2963_v20 = vmax.f32 %v2662_v7, %v2835_v14  ;;  %v5646_v14 = vld [vmem:[%s7313_s4 + $0x3] ss:$8 sm:$0x3]  ;;  %5754 = vmatpush1.bf16.msra.mxu1 %v6726_v10 }
 0x38d   : > { %v2964_v19 = vmax.f32 %v2664_v12, %v2836_v16  ;;  %5739 = vmatprep.subr.bf16.mxu1 %v6074_v0 }
 0x38e   : > { %v2965_v22 = vmax.f32 %v2666_v15, %v2837_v17  ;;  %v2669_v30 = vpop.f32.mrb[228].mxu0 }
 0x38f   : > { %v2670_v26 = vadd.f32 %v2669_v30, %v6543_v55  ;;  %v2671_v27 = vpop.f32.mrb[229].mxu0  ;;  %v3042_v29 = vpack.c.bf16 %v2964_v19, %v2962_v18 }
 0x390   : > { %v2672_v33 = vadd.f32 %v2671_v27, %v6546_v57  ;;  %v2673_v34 = vpop.f32.mrb[230].mxu0  ;;  %v3043_v35 = vpack.c.bf16 %v2965_v22, %v2963_v20  ;;  %v6737_v22 = vrot.slane %v5646_v14, %v6260_v21 }
 0x391   : > { %v2838_v36 = vmul.f32 0.01, %v2670_v26  ;;  %v2674_v37 = vadd.f32 %v2673_v34, %v6543_v55  ;;  %v2675_v38 = vpop.f32.mrb[231].mxu0 }
 0x392   : > { %v2839_v39 = vmul.f32 0.01, %v2672_v33  ;;  %v2676_v40 = vadd.f32 %v2675_v38, %v6546_v57  ;;  %3536 = vmatprep.mubr.bf16.mxu1 %v3043_v35 }
 0x393   : > { %v2840_v41 = vmul.f32 0.01, %v2674_v37  ;;  %3537 = vmatmul.mubr.bf16.gmra.mrb[224].mxu1 %v3042_v29  ;;  %v2966_v43 = vmax.f32 %v2670_v26, %v2838_v36  ;;  %v6740_v26 = vrot.slane %v5646_v14, %v6265_v23 }
 0x394   : > { %v2841_v42 = vmul.f32 0.01, %v2676_v40  ;;  %v2967_v45 = vmax.f32 %v2672_v33, %v2839_v39 }
 0x395   : > { %v2968_v44 = vmax.f32 %v2674_v37, %v2840_v41 }
 0x396   : > { %v2969_v46 = vmax.f32 %v2676_v40, %v2841_v42  ;;  %v2679_v47 = vpop.f32.mrb[232].mxu0 }
 0x397   : > { %v2680_v48 = vadd.f32 %v2679_v47, %v6543_v55  ;;  %v2681_v51 = vpop.f32.mrb[233].mxu0  ;;  %v3044_v52 = vpack.c.bf16 %v2968_v44, %v2966_v43 }
 0x398   : > { %v2682_v53 = vadd.f32 %v2681_v51, %v6546_v57  ;;  %v2683_v54 = vpop.f32.mrb[234].mxu0  ;;  %v3045_v56 = vpack.c.bf16 %v2969_v46, %v2967_v45 }
 0x399   : > { %v2842_v58 = vmul.f32 0.01, %v2680_v48  ;;  %v2684_v59 = vadd.f32 %v2683_v54, %v6543_v55  ;;  %v2685_v60 = vpop.f32.mrb[235].mxu0 }
 0x39a   : > { %v2843_v61 = vmul.f32 0.01, %v2682_v53  ;;  %v2686_v24 = vadd.f32 %v2685_v60, %v6546_v57  ;;  %3546 = vmatprep.mubr.bf16.mxu1 %v3045_v56 }
 0x39b   : > { %v2844_v62 = vmul.f32 0.01, %v2684_v59  ;;  %3547 = vmatmul.mubr.bf16.gmra.mrb[228].mxu1 %v3044_v52  ;;  %v2970_v1 = vmax.f32 %v2680_v48, %v2842_v58 }
 0x39c   : > { %v2845_v63 = vmul.f32 0.01, %v2686_v24  ;;  %v2971_v3 = vmax.f32 %v2682_v53, %v2843_v61 }
 0x39d   : > { %v2972_v2 = vmax.f32 %v2684_v59, %v2844_v62 }
 0x39e   : > { %v2973_v4 = vmax.f32 %v2686_v24, %v2845_v63  ;;  %v2689_v5 = vpop.f32.mrb[236].mxu0 }
 0x39f   : > { %v2690_v6 = vadd.f32 %v2689_v5, %v6543_v55  ;;  %v2691_v7 = vpop.f32.mrb[237].mxu0  ;;  %v3046_v9 = vpack.c.bf16 %v2972_v2, %v2970_v1 }
 0x3a0   : > { %v2692_v11 = vadd.f32 %v2691_v7, %v6546_v57  ;;  %v2693_v12 = vpop.f32.mrb[238].mxu0  ;;  %v3047_v13 = vpack.c.bf16 %v2973_v4, %v2971_v3 }
 0x3a1   : > { %v2846_v15 = vmul.f32 0.01, %v2690_v6  ;;  %v2694_v16 = vadd.f32 %v2693_v12, %v6543_v55  ;;  %v2695_v17 = vpop.f32.mrb[239].mxu0 }
 0x3a2   : > { %v2847_v18 = vmul.f32 0.01, %v2692_v11  ;;  %v2696_v19 = vadd.f32 %v2695_v17, %v6546_v57  ;;  %3556 = vmatprep.mubr.bf16.mxu1 %v3047_v13 }
 0x3a3   : > { %v2848_v20 = vmul.f32 0.01, %v2694_v16  ;;  %3557 = vmatmul.mubr.bf16.gmra.mrb[232].mxu1 %v3046_v9  ;;  %v2974_v27 = vmax.f32 %v2690_v6, %v2846_v15 }
 0x3a4   : > { %v2849_v30 = vmul.f32 0.01, %v2696_v19  ;;  %v2975_v33 = vmax.f32 %v2692_v11, %v2847_v18 }
 0x3a5   : > { %v2976_v29 = vmax.f32 %v2694_v16, %v2848_v20 }
 0x3a6   : > { %v2977_v34 = vmax.f32 %v2696_v19, %v2849_v30  ;;  %v2699_v35 = vpop.f32.mrb[240].mxu0  ;;  %v3298_v36 = vpop.f32.mrb[128].mxu1  ;;  %v6755_v19 = vld [vmem:[%s7312_s3 + $0x40] sm:$0xff]  }
 0x3a7   : > { %v2700_v37 = vadd.f32 %v2699_v35, %v6543_v55  ;;  %v3299_v38 = vadd.f32 %v3298_v36, %v6737_v22  ;;  %v2701_v39 = vpop.f32.mrb[241].mxu0  ;;  %v3300_v40 = vpop.f32.mrb[129].mxu1  ;;  %v3048_v41 = vpack.c.bf16 %v2976_v29, %v2974_v27  ;;  %5755 = vmatpush1.bf16.msra.mxu1 %v6755_v19 }
 0x3a8   : > { %v2702_v42 = vadd.f32 %v2701_v39, %v6546_v57  ;;  %v3301_v43 = vadd.f32 %v3300_v40, %v6740_v26  ;;  %v2703_v44 = vpop.f32.mrb[242].mxu0  ;;  %v3302_v45 = vpop.f32.mrb[130].mxu1  ;;  %v3049_v46 = vpack.c.bf16 %v2977_v34, %v2975_v33  ;;  %5740 = vmatprep.subr.bf16.mxu1 %v6074_v0 }
 0x3a9   : > { %v2850_v47 = vmul.f32 0.01, %v2700_v37  ;;  %v3617_v48 = vmul.f32 0.01, %v3299_v38  ;;  %v2704_v51 = vadd.f32 %v2703_v44, %v6543_v55  ;;  %v3303_v52 = vadd.f32 %v3302_v45, %v6737_v22  ;;  %v2705_v53 = vpop.f32.mrb[243].mxu0  ;;  %v3304_v54 = vpop.f32.mrb[131].mxu1 }
 0x3aa   : > { %v2851_v56 = vmul.f32 0.01, %v2702_v42  ;;  %v3618_v58 = vmul.f32 0.01, %v3301_v43  ;;  %v2706_v59 = vadd.f32 %v2705_v53, %v6546_v57  ;;  %v3305_v60 = vadd.f32 %v3304_v54, %v6740_v26  ;;  %3566 = vmatprep.mubr.bf16.mxu1 %v3049_v46 }
 0x3ab   : > { %v2852_v61 = vmul.f32 0.01, %v2704_v51  ;;  %v3619_v24 = vmul.f32 0.01, %v3303_v52  ;;  %3567 = vmatmul.mubr.bf16.gmra.mrb[236].mxu1 %v3048_v41  ;;  %v2978_v1 = vmax.f32 %v2700_v37, %v2850_v47  ;;  %v3745_v2 = vmax.f32 %v3299_v38, %v3617_v48 }
 0x3ac   : > { %v2853_v62 = vmul.f32 0.01, %v2706_v59  ;;  %v3620_v63 = vmul.f32 0.01, %v3305_v60  ;;  %v2979_v5 = vmax.f32 %v2702_v42, %v2851_v56  ;;  %v3746_v6 = vmax.f32 %v3301_v43, %v3618_v58 }
 0x3ad   : > { %v2980_v3 = vmax.f32 %v2704_v51, %v2852_v61  ;;  %v3747_v4 = vmax.f32 %v3303_v52, %v3619_v24 }
 0x3ae   : > { %v2981_v7 = vmax.f32 %v2706_v59, %v2853_v62  ;;  %v3748_v9 = vmax.f32 %v3305_v60, %v3620_v63  ;;  %v2709_v11 = vpop.f32.mrb[244].mxu0  ;;  %v3308_v12 = vpop.f32.mrb[132].mxu1 }
 0x3af   : > { %v3873_v13 = vpack.c.bf16 %v3747_v4, %v3745_v2  ;;  %v2710_v14 = vadd.f32 %v2709_v11, %v6543_v55  ;;  %v3309_v15 = vadd.f32 %v3308_v12, %v6737_v22  ;;  %v2711_v16 = vpop.f32.mrb[245].mxu0  ;;  %v3310_v17 = vpop.f32.mrb[133].mxu1  ;;  %v3050_v18 = vpack.c.bf16 %v2980_v3, %v2978_v1 }
 0x3b0   : > { %v2712_v20 = vadd.f32 %v2711_v16, %v6546_v57  ;;  %v3311_v30 = vadd.f32 %v3310_v17, %v6740_v26  ;;  %v2713_v27 = vpop.f32.mrb[246].mxu0  ;;  %v3312_v29 = vpop.f32.mrb[134].mxu1  ;;  %v3051_v33 = vpack.c.bf16 %v2981_v7, %v2979_v5  ;;  %v3874_v34 = vpack.c.bf16 %v3748_v9, %v3746_v6 }
 0x3b1   : > { %v2854_v35 = vmul.f32 0.01, %v2710_v14  ;;  %v3621_v36 = vmul.f32 0.01, %v3309_v15  ;;  %v2714_v37 = vadd.f32 %v2713_v27, %v6543_v55  ;;  %v3313_v38 = vadd.f32 %v3312_v29, %v6737_v22  ;;  %v2715_v39 = vpop.f32.mrb[247].mxu0  ;;  %v3314_v40 = vpop.f32.mrb[135].mxu1 }
 0x3b2   : > { %v2855_v41 = vmul.f32 0.01, %v2712_v20  ;;  %v3622_v42 = vmul.f32 0.01, %v3311_v30  ;;  %v2716_v43 = vadd.f32 %v2715_v39, %v6546_v57  ;;  %v3315_v44 = vadd.f32 %v3314_v40, %v6740_v26  ;;  %3576 = vmatprep.mubr.bf16.mxu1 %v3051_v33  ;;  %4175 = vmatprep.mubr.bf16.mxu0 %v3874_v34 }
 0x3b3   : > { %v2856_v45 = vmul.f32 0.01, %v2714_v37  ;;  %v3623_v46 = vmul.f32 0.01, %v3313_v38  ;;  %3577 = vmatmul.mubr.bf16.gmra.mrb[240].mxu1 %v3050_v18  ;;  %4176 = vmatmul.mubr.bf16.vlgmr.msra.gmra.mrb[0].mxu0 %v3873_v13  ;;  %v2982_v51 = vmax.f32 %v2710_v14, %v2854_v35  ;;  %v3749_v52 = vmax.f32 %v3309_v15, %v3621_v36 }
 0x3b4   : > { %v2857_v47 = vmul.f32 0.01, %v2716_v43  ;;  %v3624_v48 = vmul.f32 0.01, %v3315_v44  ;;  %4952 = vmatpush1.bf16.msra.mxu0 %v6621_v32  ;;  %v2983_v56 = vmax.f32 %v2712_v20, %v2855_v41  ;;  %v3750_v58 = vmax.f32 %v3311_v30, %v3622_v42 }
 0x3b5   : > { %v2984_v53 = vmax.f32 %v2714_v37, %v2856_v45  ;;  %v3751_v54 = vmax.f32 %v3313_v38, %v3623_v46  ;;  %4953 = vmatprep.subr.bf16.mxu0 %v6074_v0 }
 0x3b6   : > { %v2985_v59 = vmax.f32 %v2716_v43, %v2857_v47  ;;  %v3752_v60 = vmax.f32 %v3315_v44, %v3624_v48  ;;  %v2719_v61 = vpop.f32.mrb[248].mxu0  ;;  %v3318_v24 = vpop.f32.mrb[136].mxu1 }
 0x3b7   : > { %v3875_v62 = vpack.c.bf16 %v3751_v54, %v3749_v52  ;;  %v2720_v63 = vadd.f32 %v2719_v61, %v6543_v55  ;;  %v3319_v1 = vadd.f32 %v3318_v24, %v6737_v22  ;;  %v2721_v2 = vpop.f32.mrb[249].mxu0  ;;  %v3320_v3 = vpop.f32.mrb[137].mxu1  ;;  %v3052_v32 = vpack.c.bf16 %v2984_v53, %v2982_v51  ;;  %v6784_v52 = vld [vmem:[%s7312_s3 + $0x48] sm:$0xff]  }
 0x3b8   : > { %v2722_v4 = vadd.f32 %v2721_v2, %v6546_v57  ;;  %v3321_v5 = vadd.f32 %v3320_v3, %v6740_v26  ;;  %v2723_v6 = vpop.f32.mrb[250].mxu0  ;;  %v3322_v7 = vpop.f32.mrb[138].mxu1  ;;  %v3053_v9 = vpack.c.bf16 %v2985_v59, %v2983_v56  ;;  %v3876_v11 = vpack.c.bf16 %v3752_v60, %v3750_v58  ;;  %4954 = vmatpush1.bf16.msra.mxu0 %v6636_v8 }
 0x3b9   : > { %v2858_v12 = vmul.f32 0.01, %v2720_v63  ;;  %v3625_v13 = vmul.f32 0.01, %v3319_v1  ;;  %v2724_v14 = vadd.f32 %v2723_v6, %v6543_v55  ;;  %v3323_v15 = vadd.f32 %v3322_v7, %v6737_v22  ;;  %v2725_v16 = vpop.f32.mrb[251].mxu0  ;;  %v3324_v17 = vpop.f32.mrb[139].mxu1  ;;  %4955 = vmatprep.subr.bf16.mxu0 %v6074_v0  ;;  %5756 = vmatpush1.bf16.msra.mxu1 %v6784_v52 }
 0x3ba   : > { %v2859_v18 = vmul.f32 0.01, %v2722_v4  ;;  %v3626_v20 = vmul.f32 0.01, %v3321_v5  ;;  %v2726_v30 = vadd.f32 %v2725_v16, %v6546_v57  ;;  %v3325_v27 = vadd.f32 %v3324_v17, %v6740_v26  ;;  %3586 = vmatprep.mubr.bf16.mxu1 %v3053_v9  ;;  %4185 = vmatprep.mubr.bf16.mxu0 %v3876_v11 }
 0x3bb   : > { %v2860_v29 = vmul.f32 0.01, %v2724_v14  ;;  %v3627_v8 = vmul.f32 0.01, %v3323_v15  ;;  %3587 = vmatmul.mubr.bf16.gmra.mrb[244].mxu1 %v3052_v32  ;;  %4186 = vmatmul.mubr.bf16.gmra.mrb[4].mxu0 %v3875_v62  ;;  %v2986_v35 = vmax.f32 %v2720_v63, %v2858_v12  ;;  %v3753_v36 = vmax.f32 %v3319_v1, %v3625_v13 }
 0x3bc   : > { %v2861_v33 = vmul.f32 0.01, %v2726_v30  ;;  %v3628_v34 = vmul.f32 0.01, %v3325_v27  ;;  %4956 = vmatpush1.bf16.msra.mxu0 %v6651_v50  ;;  %v2987_v39 = vmax.f32 %v2722_v4, %v2859_v18  ;;  %v3754_v40 = vmax.f32 %v3321_v5, %v3626_v20  ;;  %5741 = vmatprep.subr.bf16.mxu1 %v6074_v0 }
 0x3bd   : > { %v2988_v37 = vmax.f32 %v2724_v14, %v2860_v29  ;;  %v3755_v38 = vmax.f32 %v3323_v15, %v3627_v8  ;;  %4957 = vmatprep.subr.bf16.mxu0 %v6074_v0 }
 0x3be   : > { %v2989_v41 = vmax.f32 %v2726_v30, %v2861_v33  ;;  %v3756_v42 = vmax.f32 %v3325_v27, %v3628_v34  ;;  %v2729_v43 = vpop.f32.mrb[252].mxu0  ;;  %v3328_v44 = vpop.f32.mrb[140].mxu1 }
 0x3bf   : > { %v3877_v45 = vpack.c.bf16 %v3755_v38, %v3753_v36  ;;  %v2730_v46 = vadd.f32 %v2729_v43, %v6543_v55  ;;  %v3329_v47 = vadd.f32 %v3328_v44, %v6737_v22  ;;  %v2731_v48 = vpop.f32.mrb[253].mxu0  ;;  %v3330_v51 = vpop.f32.mrb[141].mxu1  ;;  %v3054_v50 = vpack.c.bf16 %v2988_v37, %v2986_v35 }
 0x3c0   : > { %v2732_v53 = vadd.f32 %v2731_v48, %v6546_v57  ;;  %v3331_v54 = vadd.f32 %v3330_v51, %v6740_v26  ;;  %v2733_v56 = vpop.f32.mrb[254].mxu0  ;;  %v3332_v58 = vpop.f32.mrb[142].mxu1  ;;  %v3055_v59 = vpack.c.bf16 %v2989_v41, %v2987_v39  ;;  %v3878_v60 = vpack.c.bf16 %v3756_v42, %v3754_v40  ;;  %4958 = vmatpush1.bf16.msra.mxu0 %v6666_v28  ;;  %v6025_v48 = vld [vmem:[%s7312_s3 + $0x50] sm:$0xff]  }
 0x3c1   : > { %v2862_v61 = vmul.f32 0.01, %v2730_v46  ;;  %v3629_v24 = vmul.f32 0.01, %v3329_v47  ;;  %v2734_v62 = vadd.f32 %v2733_v56, %v6543_v55  ;;  %v3333_v63 = vadd.f32 %v3332_v58, %v6737_v22  ;;  %v2735_v1 = vpop.f32.mrb[255].mxu0  ;;  %v3334_v2 = vpop.f32.mrb[143].mxu1  ;;  %4959 = vmatprep.subr.bf16.mxu0 %v6074_v0  ;;  %5757 = vmatpush1.bf16.msra.mxu1 %v6025_v48 }
 0x3c2   : > { %v2863_v3 = vmul.f32 0.01, %v2732_v53  ;;  %v3630_v32 = vmul.f32 0.01, %v3331_v54  ;;  %v2736_v4 = vadd.f32 %v2735_v1, %v6546_v57  ;;  %v3335_v5 = vadd.f32 %v3334_v2, %v6740_v26  ;;  %3596 = vmatprep.mubr.bf16.mxu1 %v3055_v59  ;;  %4195 = vmatprep.mubr.bf16.mxu0 %v3878_v60 }
 0x3c3   : > { %v2864_v28 = vmul.f32 0.01, %v2734_v62  ;;  %v3631_v6 = vmul.f32 0.01, %v3333_v63  ;;  %3597 = vmatmul.mubr.bf16.gmra.mrb[248].mxu1 %v3054_v50  ;;  %4196 = vmatmul.mubr.bf16.gmra.mrb[8].mxu0 %v3877_v45  ;;  %v2990_v9 = vmax.f32 %v2730_v46, %v2862_v61  ;;  %v3757_v11 = vmax.f32 %v3329_v47, %v3629_v24 }
 0x3c4   : > { %v2865_v55 = vmul.f32 0.01, %v2736_v4  ;;  %v3632_v7 = vmul.f32 0.01, %v3335_v5  ;;  %4960 = vmatpush1.bf16.msra.mxu0 %v6681_v25  ;;  %v2991_v57 = vmax.f32 %v2732_v53, %v2863_v3  ;;  %v3758_v14 = vmax.f32 %v3331_v54, %v3630_v32  ;;  %5742 = vmatprep.subr.bf16.mxu1 %v6074_v0 }
 0x3c5   : > { %v2992_v12 = vmax.f32 %v2734_v62, %v2864_v28  ;;  %v3759_v13 = vmax.f32 %v3333_v63, %v3631_v6  ;;  %4961 = vmatprep.subr.bf16.mxu0 %v6074_v0 }
 0x3c6   : > { %v2993_v15 = vmax.f32 %v2736_v4, %v2865_v55  ;;  %v3760_v16 = vmax.f32 %v3335_v5, %v3632_v7  ;;  %v3338_v17 = vpop.f32.mrb[144].mxu1 }
 0x3c7   : > { %v3879_v18 = vpack.c.bf16 %v3759_v13, %v3757_v11  ;;  %v3339_v20 = vadd.f32 %v3338_v17, %v6737_v22  ;;  %v3340_v30 = vpop.f32.mrb[145].mxu1  ;;  %v3056_v27 = vpack.c.bf16 %v2992_v12, %v2990_v9 }
 0x3c8   : > { %v3341_v29 = vadd.f32 %v3340_v30, %v6740_v26  ;;  %v3342_v8 = vpop.f32.mrb[146].mxu1  ;;  %v3057_v25 = vpack.c.bf16 %v2993_v15, %v2991_v57  ;;  %v3880_v33 = vpack.c.bf16 %v3760_v16, %v3758_v14  ;;  %4962 = vmatpush1.bf16.msra.mxu0 %v6696_v49 }
 0x3c9   : > { %v3633_v34 = vmul.f32 0.01, %v3339_v20  ;;  %v3343_v35 = vadd.f32 %v3342_v8, %v6737_v22  ;;  %v3344_v36 = vpop.f32.mrb[147].mxu1  ;;  %4963 = vmatprep.subr.bf16.mxu0 %v6074_v0 }
 0x3ca   : > { %v3634_v37 = vmul.f32 0.01, %v3341_v29  ;;  %v3345_v38 = vadd.f32 %v3344_v36, %v6740_v26  ;;  %3606 = vmatprep.mubr.bf16.mxu1 %v3057_v25  ;;  %4205 = vmatprep.mubr.bf16.mxu0 %v3880_v33 }
 0x3cb   : > { %v3635_v39 = vmul.f32 0.01, %v3343_v35  ;;  %3607 = vmatmul.mubr.bf16.gmra.mrb[252].mxu1 %v3056_v27  ;;  %4206 = vmatmul.mubr.bf16.gmra.mrb[12].mxu0 %v3879_v18  ;;  %v3761_v41 = vmax.f32 %v3339_v20, %v3633_v34  ;;  %v6026_v20 = vld [vmem:[%s7312_s3 + $0x58] sm:$0xff]  }
 0x3cc   : > { %v3636_v40 = vmul.f32 0.01, %v3345_v38  ;;  %4964 = vmatpush1.bf16.msra.mxu0 %v6711_v31  ;;  %v3762_v49 = vmax.f32 %v3341_v29, %v3634_v37  ;;  %5758 = vmatpush1.bf16.msra.mxu1 %v6026_v20 }
 0x3cd   : > { %v3763_v42 = vmax.f32 %v3343_v35, %v3635_v39  ;;  %4965 = vmatprep.subr.bf16.mxu0 %v6074_v0  ;;  %5743 = vmatprep.subr.bf16.mxu1 %v6074_v0 }
 0x3ce   : > { %v3764_v43 = vmax.f32 %v3345_v38, %v3636_v40  ;;  %v3348_v44 = vpop.f32.mrb[148].mxu1 }
 0x3cf   : > { %v3881_v45 = vpack.c.bf16 %v3763_v42, %v3761_v41  ;;  %v3349_v46 = vadd.f32 %v3348_v44, %v6737_v22  ;;  %v3350_v47 = vpop.f32.mrb[149].mxu1 }
 0x3d0   : > { %v3351_v51 = vadd.f32 %v3350_v47, %v6740_v26  ;;  %v3352_v50 = vpop.f32.mrb[150].mxu1  ;;  %v3882_v53 = vpack.c.bf16 %v3764_v43, %v3762_v49  ;;  %4966 = vmatpush1.bf16.msra.mxu0 %v6726_v10 }
 0x3d1   : > { %v3637_v31 = vmul.f32 0.01, %v3349_v46  ;;  %v3353_v54 = vadd.f32 %v3352_v50, %v6737_v22  ;;  %v3354_v56 = vpop.f32.mrb[151].mxu1  ;;  %4967 = vmatprep.subr.bf16.mxu0 %v6074_v0 }
 0x3d2   : > { %v3638_v58 = vmul.f32 0.01, %v3351_v51  ;;  %v3355_v59 = vadd.f32 %v3354_v56, %v6740_v26  ;;  %4215 = vmatprep.mubr.bf16.mxu0 %v3882_v53 }
 0x3d3   : > { %v3639_v60 = vmul.f32 0.01, %v3353_v54  ;;  %4216 = vmatmul.mubr.bf16.gmra.mrb[16].mxu0 %v3881_v45  ;;  %v3765_v24 = vmax.f32 %v3349_v46, %v3637_v31 }
 0x3d4   : > { %v3640_v61 = vmul.f32 0.01, %v3355_v59  ;;  %4968 = vmatpush1.bf16.msra.mxu0 %v6755_v19  ;;  %v3766_v62 = vmax.f32 %v3351_v51, %v3638_v58 }
 0x3d5   : > { %v3767_v10 = vmax.f32 %v3353_v54, %v3639_v60  ;;  %4969 = vmatprep.subr.bf16.mxu0 %v6074_v0 }
 0x3d6   : > { %v3768_v63 = vmax.f32 %v3355_v59, %v3640_v61  ;;  %v3358_v1 = vpop.f32.mrb[152].mxu1 }
 0x3d7   : > { %v3883_v2 = vpack.c.bf16 %v3767_v10, %v3765_v24  ;;  %v3359_v3 = vadd.f32 %v3358_v1, %v6737_v22  ;;  %v3360_v32 = vpop.f32.mrb[153].mxu1  ;;  %v6027_v1 = vld [vmem:[%s7312_s3 + $0x60] sm:$0xff]  }
 0x3d8   : > { %v3361_v4 = vadd.f32 %v3360_v32, %v6740_v26  ;;  %v3362_v5 = vpop.f32.mrb[154].mxu1  ;;  %v3884_v28 = vpack.c.bf16 %v3768_v63, %v3766_v62  ;;  %4970 = vmatpush1.bf16.msra.mxu0 %v6784_v52  ;;  %5759 = vmatpush1.bf16.msra.mxu1 %v6027_v1 }
 0x3d9   : > { %v3641_v6 = vmul.f32 0.01, %v3359_v3  ;;  %v3363_v19 = vadd.f32 %v3362_v5, %v6737_v22  ;;  %v3364_v55 = vpop.f32.mrb[155].mxu1  ;;  %4971 = vmatprep.subr.bf16.mxu0 %v6074_v0  ;;  %5744 = vmatprep.subr.bf16.mxu1 %v6074_v0 }
 0x3da   : > { %v3642_v7 = vmul.f32 0.01, %v3361_v4  ;;  %v3365_v9 = vadd.f32 %v3364_v55, %v6740_v26  ;;  %4225 = vmatprep.mubr.bf16.mxu0 %v3884_v28 }
 0x3db   : > { %v3643_v11 = vmul.f32 0.01, %v3363_v19  ;;  %4226 = vmatmul.mubr.bf16.gmra.mrb[20].mxu0 %v3883_v2  ;;  %v3769_v13 = vmax.f32 %v3359_v3, %v3641_v6 }
 0x3dc   : > { %v3644_v12 = vmul.f32 0.01, %v3365_v9  ;;  %4972 = vmatpush1.bf16.msra.mxu0 %v6025_v48  ;;  %v3770_v14 = vmax.f32 %v3361_v4, %v3642_v7 }
 0x3dd   : > { %v3771_v57 = vmax.f32 %v3363_v19, %v3643_v11  ;;  %4973 = vmatprep.subr.bf16.mxu0 %v6074_v0 }
 0x3de   : > { %v3772_v52 = vmax.f32 %v3365_v9, %v3644_v12  ;;  %v3368_v15 = vpop.f32.mrb[156].mxu1 }
 0x3df   : > { %v3885_v16 = vpack.c.bf16 %v3771_v57, %v3769_v13  ;;  %v3369_v17 = vadd.f32 %v3368_v15, %v6737_v22  ;;  %v3370_v18 = vpop.f32.mrb[157].mxu1 }
 0x3e0   : > { %v3371_v30 = vadd.f32 %v3370_v18, %v6740_v26  ;;  %v3372_v27 = vpop.f32.mrb[158].mxu1  ;;  %v3886_v29 = vpack.c.bf16 %v3772_v52, %v3770_v14  ;;  %4974 = vmatpush1.bf16.msra.mxu0 %v6026_v20 }
 0x3e1   : > { %v3645_v8 = vmul.f32 0.01, %v3369_v17  ;;  %v3373_v25 = vadd.f32 %v3372_v27, %v6737_v22  ;;  %v3374_v33 = vpop.f32.mrb[159].mxu1  ;;  %4975 = vmatprep.subr.bf16.mxu0 %v6074_v0 }
 0x3e2   : > { %v3646_v34 = vmul.f32 0.01, %v3371_v30  ;;  %v3375_v35 = vadd.f32 %v3374_v33, %v6740_v26  ;;  %4235 = vmatprep.mubr.bf16.mxu0 %v3886_v29 }
 0x3e3   : > { %v3647_v36 = vmul.f32 0.01, %v3373_v25  ;;  %4236 = vmatmul.mubr.bf16.gmra.mrb[24].mxu0 %v3885_v16  ;;  %v3773_v38 = vmax.f32 %v3369_v17, %v3645_v8 }
 0x3e4   : > { %v3648_v37 = vmul.f32 0.01, %v3375_v35  ;;  %v3774_v40 = vmax.f32 %v3371_v30, %v3646_v34  ;;  %4976 = vmatpush1.bf16.msra.mxu0 %v6027_v1 }
 0x3e5   : > { %v3775_v39 = vmax.f32 %v3373_v25, %v3647_v36  ;;  %4977 = vmatprep.subr.bf16.mxu0 %v6074_v0 }
 0x3e6   : > { %v3776_v41 = vmax.f32 %v3375_v35, %v3648_v37  ;;  %v3378_v42 = vpop.f32.mrb[160].mxu1 }
 0x3e7   : > { %v3887_v49 = vpack.c.bf16 %v3775_v39, %v3773_v38  ;;  %v3379_v43 = vadd.f32 %v3378_v42, %v6737_v22  ;;  %v3380_v44 = vpop.f32.mrb[161].mxu1  ;;  %v6028_v42 = vld [vmem:[%s7312_s3 + $0x68] sm:$0xff]  }
 0x3e8   : > { %v3381_v45 = vadd.f32 %v3380_v44, %v6740_v26  ;;  %v3382_v46 = vpop.f32.mrb[162].mxu1  ;;  %v3888_v47 = vpack.c.bf16 %v3776_v41, %v3774_v40  ;;  %5760 = vmatpush1.bf16.msra.mxu1 %v6028_v42  ;;  %4978 = vmatpush1.bf16.msra.mxu0 %v6028_v42 }
 0x3e9   : > { %v3649_v48 = vmul.f32 0.01, %v3379_v43  ;;  %v3383_v51 = vadd.f32 %v3382_v46, %v6737_v22  ;;  %v3384_v50 = vpop.f32.mrb[163].mxu1  ;;  %5745 = vmatprep.subr.bf16.mxu1 %v6074_v0  ;;  %4979 = vmatprep.subr.bf16.mxu0 %v6074_v0 }
 0x3ea   : > { %v3650_v53 = vmul.f32 0.01, %v3381_v45  ;;  %v3385_v31 = vadd.f32 %v3384_v50, %v6740_v26  ;;  %4245 = vmatprep.mubr.bf16.mxu0 %v3888_v47 }
 0x3eb   : > { %v3651_v54 = vmul.f32 0.01, %v3383_v51  ;;  %4246 = vmatmul.mubr.bf16.gmra.mrb[28].mxu0 %v3887_v49  ;;  %v3777_v58 = vmax.f32 %v3379_v43, %v3649_v48 }
 0x3ec   : > { %v3652_v56 = vmul.f32 0.01, %v3385_v31  ;;  %v3778_v60 = vmax.f32 %v3381_v45, %v3650_v53 }
 0x3ed   : > { %v3779_v59 = vmax.f32 %v3383_v51, %v3651_v54 }
 0x3ee   : > { %v3780_v61 = vmax.f32 %v3385_v31, %v3652_v56  ;;  %v3388_v24 = vpop.f32.mrb[164].mxu1 }
 0x3ef   : > { %v3889_v10 = vpack.c.bf16 %v3779_v59, %v3777_v58  ;;  %v3389_v62 = vadd.f32 %v3388_v24, %v6737_v22  ;;  %v3390_v63 = vpop.f32.mrb[165].mxu1 }
 0x3f0   : > { %v3391_v2 = vadd.f32 %v3390_v63, %v6740_v26  ;;  %v3392_v3 = vpop.f32.mrb[166].mxu1  ;;  %v3890_v32 = vpack.c.bf16 %v3780_v61, %v3778_v60 }
 0x3f1   : > { %v3653_v4 = vmul.f32 0.01, %v3389_v62  ;;  %v3393_v5 = vadd.f32 %v3392_v3, %v6737_v22  ;;  %v3394_v28 = vpop.f32.mrb[167].mxu1 }
 0x3f2   : > { %v3654_v6 = vmul.f32 0.01, %v3391_v2  ;;  %v3395_v19 = vadd.f32 %v3394_v28, %v6740_v26  ;;  %4255 = vmatprep.mubr.bf16.mxu0 %v3890_v32 }
 0x3f3   : > { %v3655_v55 = vmul.f32 0.01, %v3393_v5  ;;  %4256 = vmatmul.mubr.bf16.gmra.mrb[32].mxu0 %v3889_v10  ;;  %v3781_v9 = vmax.f32 %v3389_v62, %v3653_v4 }
 0x3f4   : > { %v3656_v7 = vmul.f32 0.01, %v3395_v19  ;;  %v3782_v12 = vmax.f32 %v3391_v2, %v3654_v6 }
 0x3f5   : > { %v3783_v11 = vmax.f32 %v3393_v5, %v3655_v55 }
 0x3f6   : > { %v3784_v13 = vmax.f32 %v3395_v19, %v3656_v7  ;;  %v3398_v57 = vpop.f32.mrb[168].mxu1 }
 0x3f7   : > { %v3891_v14 = vpack.c.bf16 %v3783_v11, %v3781_v9  ;;  %v3399_v52 = vadd.f32 %v3398_v57, %v6737_v22  ;;  %v3400_v15 = vpop.f32.mrb[169].mxu1  ;;  %v6029_v57 = vld [vmem:[%s7312_s3 + $0x70] sm:$0xff]  }
 0x3f8   : > { %v3401_v16 = vadd.f32 %v3400_v15, %v6740_v26  ;;  %v3402_v17 = vpop.f32.mrb[170].mxu1  ;;  %v3892_v18 = vpack.c.bf16 %v3784_v13, %v3782_v12  ;;  %5761 = vmatpush1.bf16.msra.mxu1 %v6029_v57  ;;  %4980 = vmatpush1.bf16.msra.mxu0 %v6029_v57 }
 0x3f9   : > { %v3657_v20 = vmul.f32 0.01, %v3399_v52  ;;  %v3403_v30 = vadd.f32 %v3402_v17, %v6737_v22  ;;  %v3404_v27 = vpop.f32.mrb[171].mxu1  ;;  %5746 = vmatprep.subr.bf16.mxu1 %v6074_v0  ;;  %4981 = vmatprep.subr.bf16.mxu0 %v6074_v0 }
 0x3fa   : > { %v3658_v29 = vmul.f32 0.01, %v3401_v16  ;;  %v3405_v8 = vadd.f32 %v3404_v27, %v6740_v26  ;;  %4265 = vmatprep.mubr.bf16.mxu0 %v3892_v18 }
 0x3fb   : > { %v3659_v25 = vmul.f32 0.01, %v3403_v30  ;;  %4266 = vmatmul.mubr.bf16.gmra.mrb[36].mxu0 %v3891_v14  ;;  %v3785_v34 = vmax.f32 %v3399_v52, %v3657_v20 }
 0x3fc   : > { %v3660_v33 = vmul.f32 0.01, %v3405_v8  ;;  %v3786_v36 = vmax.f32 %v3401_v16, %v3658_v29 }
 0x3fd   : > { %v3787_v35 = vmax.f32 %v3403_v30, %v3659_v25 }
 0x3fe   : > { %v3788_v37 = vmax.f32 %v3405_v8, %v3660_v33  ;;  %v3408_v38 = vpop.f32.mrb[172].mxu1 }
 0x3ff   : > { %v3893_v39 = vpack.c.bf16 %v3787_v35, %v3785_v34  ;;  %v3409_v40 = vadd.f32 %v3408_v38, %v6737_v22  ;;  %v3410_v41 = vpop.f32.mrb[173].mxu1 }
 0x400   : > { %v3411_v49 = vadd.f32 %v3410_v41, %v6740_v26  ;;  %v3412_v43 = vpop.f32.mrb[174].mxu1  ;;  %v3894_v44 = vpack.c.bf16 %v3788_v37, %v3786_v36 }
 0x401   : > { %v3661_v45 = vmul.f32 0.01, %v3409_v40  ;;  %v3413_v46 = vadd.f32 %v3412_v43, %v6737_v22  ;;  %v3414_v47 = vpop.f32.mrb[175].mxu1 }
 0x402   : > { %v3662_v48 = vmul.f32 0.01, %v3411_v49  ;;  %v3415_v51 = vadd.f32 %v3414_v47, %v6740_v26  ;;  %4275 = vmatprep.mubr.bf16.mxu0 %v3894_v44 }
 0x403   : > { %v3663_v50 = vmul.f32 0.01, %v3413_v46  ;;  %4276 = vmatmul.mubr.bf16.gmra.mrb[40].mxu0 %v3893_v39  ;;  %v3789_v31 = vmax.f32 %v3409_v40, %v3661_v45 }
 0x404   : > { %v3664_v53 = vmul.f32 0.01, %v3415_v51  ;;  %v3790_v56 = vmax.f32 %v3411_v49, %v3662_v48 }
 0x405   : > { %v3791_v54 = vmax.f32 %v3413_v46, %v3663_v50 }
 0x406   : > { %v3792_v58 = vmax.f32 %v3415_v51, %v3664_v53  ;;  %v3418_v59 = vpop.f32.mrb[176].mxu1 }
 0x407   : > { %v3895_v60 = vpack.c.bf16 %v3791_v54, %v3789_v31  ;;  %v3419_v61 = vadd.f32 %v3418_v59, %v6737_v22  ;;  %v3420_v24 = vpop.f32.mrb[177].mxu1 }
 0x408   : > { %v3421_v10 = vadd.f32 %v3420_v24, %v6740_v26  ;;  %v3422_v62 = vpop.f32.mrb[178].mxu1  ;;  %v3896_v63 = vpack.c.bf16 %v3792_v58, %v3790_v56  ;;  %v6030_v58 = vld [vmem:[%s7312_s3 + $0x78] sm:$0xff]  }
 0x409   : > { %v3665_v1 = vmul.f32 0.01, %v3419_v61  ;;  %v3423_v2 = vadd.f32 %v3422_v62, %v6737_v22  ;;  %v3424_v3 = vpop.f32.mrb[179].mxu1  ;;  %5762 = vmatpush1.bf16.msra.mxu1 %v6030_v58  ;;  %4982 = vmatpush1.bf16.msra.mxu0 %v6030_v58 }
 0x40a   : > { %v3666_v32 = vmul.f32 0.01, %v3421_v10  ;;  %v3425_v4 = vadd.f32 %v3424_v3, %v6740_v26  ;;  %4285 = vmatprep.mubr.bf16.mxu0 %v3896_v63 }
 0x40b   : > { %v3667_v5 = vmul.f32 0.01, %v3423_v2  ;;  %4286 = vmatmul.mubr.bf16.gmra.mrb[44].mxu0 %v3895_v60  ;;  %v3793_v6 = vmax.f32 %v3419_v61, %v3665_v1 }
 0x40c   : > { %v3668_v28 = vmul.f32 0.01, %v3425_v4  ;;  %v3794_v55 = vmax.f32 %v3421_v10, %v3666_v32 }
 0x40d   : > { %v3795_v19 = vmax.f32 %v3423_v2, %v3667_v5 }
 0x40e   : > { %v3796_v7 = vmax.f32 %v3425_v4, %v3668_v28  ;;  %v3428_v9 = vpop.f32.mrb[180].mxu1 }
 0x40f   : > { %v3897_v11 = vpack.c.bf16 %v3795_v19, %v3793_v6  ;;  %v3429_v12 = vadd.f32 %v3428_v9, %v6737_v22  ;;  %v3430_v13 = vpop.f32.mrb[181].mxu1 }
 0x410   : > { %v3431_v14 = vadd.f32 %v3430_v13, %v6740_v26  ;;  %v3432_v52 = vpop.f32.mrb[182].mxu1  ;;  %v3898_v15 = vpack.c.bf16 %v3796_v7, %v3794_v55 }
 0x411   : > { %v3669_v16 = vmul.f32 0.01, %v3429_v12  ;;  %v3433_v17 = vadd.f32 %v3432_v52, %v6737_v22  ;;  %v3434_v18 = vpop.f32.mrb[183].mxu1 }
 0x412   : > { %v3670_v20 = vmul.f32 0.01, %v3431_v14  ;;  %v3435_v30 = vadd.f32 %v3434_v18, %v6740_v26  ;;  %4295 = vmatprep.mubr.bf16.mxu0 %v3898_v15 }
 0x413   : > { %v3671_v27 = vmul.f32 0.01, %v3433_v17  ;;  %4296 = vmatmul.mubr.bf16.gmra.mrb[48].mxu0 %v3897_v11  ;;  %v3797_v8 = vmax.f32 %v3429_v12, %v3669_v16 }
 0x414   : > { %v3672_v29 = vmul.f32 0.01, %v3435_v30  ;;  %v3798_v33 = vmax.f32 %v3431_v14, %v3670_v20 }
 0x415   : > { %v3799_v25 = vmax.f32 %v3433_v17, %v3671_v27 }
 0x416   : > { %v3800_v34 = vmax.f32 %v3435_v30, %v3672_v29  ;;  %v3438_v35 = vpop.f32.mrb[184].mxu1 }
 0x417   : > { %v3899_v36 = vpack.c.bf16 %v3799_v25, %v3797_v8  ;;  %v3439_v37 = vadd.f32 %v3438_v35, %v6737_v22  ;;  %v3440_v38 = vpop.f32.mrb[185].mxu1 }
 0x418   : > { %v3441_v39 = vadd.f32 %v3440_v38, %v6740_v26  ;;  %v3442_v40 = vpop.f32.mrb[186].mxu1  ;;  %v3900_v41 = vpack.c.bf16 %v3800_v34, %v3798_v33 }
 0x419   : > { %v3673_v42 = vmul.f32 0.01, %v3439_v37  ;;  %v3443_v49 = vadd.f32 %v3442_v40, %v6737_v22  ;;  %v3444_v43 = vpop.f32.mrb[187].mxu1 }
 0x41a   : > { %v3674_v44 = vmul.f32 0.01, %v3441_v39  ;;  %v3445_v0 = vadd.f32 %v3444_v43, %v6740_v26  ;;  %4305 = vmatprep.mubr.bf16.mxu0 %v3900_v41 }
 0x41b   : > { %v3675_v45 = vmul.f32 0.01, %v3443_v49  ;;  %4306 = vmatmul.mubr.bf16.gmra.mrb[52].mxu0 %v3899_v36  ;;  %v3801_v47 = vmax.f32 %v3439_v37, %v3673_v42 }
 0x41c   : > { %v3676_v46 = vmul.f32 0.01, %v3445_v0  ;;  %v3802_v51 = vmax.f32 %v3441_v39, %v3674_v44 }
 0x41d   : > { %v3803_v48 = vmax.f32 %v3443_v49, %v3675_v45 }
 0x41e   : > { %v3804_v50 = vmax.f32 %v3445_v0, %v3676_v46  ;;  %v3448_v53 = vpop.f32.mrb[188].mxu1 }
 0x41f   : > { %v3901_v31 = vpack.c.bf16 %v3803_v48, %v3801_v47  ;;  %v3449_v54 = vadd.f32 %v3448_v53, %v6737_v22  ;;  %v3450_v56 = vpop.f32.mrb[189].mxu1 }
 0x420   : > { %v3451_v59 = vadd.f32 %v3450_v56, %v6740_v26  ;;  %v3452_v60 = vpop.f32.mrb[190].mxu1  ;;  %v3902_v61 = vpack.c.bf16 %v3804_v50, %v3802_v51 }
 0x421   : > { %v3677_v24 = vmul.f32 0.01, %v3449_v54  ;;  %v3453_v10 = vadd.f32 %v3452_v60, %v6737_v22  ;;  %v3454_v62 = vpop.f32.mrb[191].mxu1 }
 0x422   : > { %v3678_v63 = vmul.f32 0.01, %v3451_v59  ;;  %v3455_v1 = vadd.f32 %v3454_v62, %v6740_v26  ;;  %4315 = vmatprep.mubr.bf16.mxu0 %v3902_v61 }
 0x423   : > { %v3679_v2 = vmul.f32 0.01, %v3453_v10  ;;  %4316 = vmatmul.mubr.bf16.gmra.mrb[56].mxu0 %v3901_v31  ;;  %v3805_v32 = vmax.f32 %v3449_v54, %v3677_v24 }
 0x424   : > { %v3680_v3 = vmul.f32 0.01, %v3455_v1  ;;  %v3806_v5 = vmax.f32 %v3451_v59, %v3678_v63 }
 0x425   : > { %v3807_v4 = vmax.f32 %v3453_v10, %v3679_v2 }
 0x426   : > { %v3808_v28 = vmax.f32 %v3455_v1, %v3680_v3  ;;  %v3458_v6 = vpop.f32.mrb[192].mxu1 }
 0x427   : > { %v3903_v19 = vpack.c.bf16 %v3807_v4, %v3805_v32  ;;  %v3459_v55 = vadd.f32 %v3458_v6, %v6737_v22  ;;  %v3460_v7 = vpop.f32.mrb[193].mxu1 }
 0x428   : > { %v3461_v9 = vadd.f32 %v3460_v7, %v6740_v26  ;;  %v3462_v11 = vpop.f32.mrb[194].mxu1  ;;  %v3904_v12 = vpack.c.bf16 %v3808_v28, %v3806_v5 }
 0x429   : > { %v3681_v13 = vmul.f32 0.01, %v3459_v55  ;;  %v3463_v57 = vadd.f32 %v3462_v11, %v6737_v22  ;;  %v3464_v14 = vpop.f32.mrb[195].mxu1 }
 0x42a   : > { %v3682_v52 = vmul.f32 0.01, %v3461_v9  ;;  %v3465_v15 = vadd.f32 %v3464_v14, %v6740_v26  ;;  %4325 = vmatprep.mubr.bf16.mxu0 %v3904_v12 }
 0x42b   : > { %v3683_v16 = vmul.f32 0.01, %v3463_v57  ;;  %4326 = vmatmul.mubr.bf16.gmra.mrb[60].mxu0 %v3903_v19  ;;  %v3809_v18 = vmax.f32 %v3459_v55, %v3681_v13 }
 0x42c   : > { %v3684_v17 = vmul.f32 0.01, %v3465_v15  ;;  %v3810_v30 = vmax.f32 %v3461_v9, %v3682_v52 }
 0x42d   : > { %v3811_v20 = vmax.f32 %v3463_v57, %v3683_v16 }
 0x42e   : > { %v3812_v27 = vmax.f32 %v3465_v15, %v3684_v17  ;;  %v3468_v29 = vpop.f32.mrb[196].mxu1 }
 0x42f   : > { %v3905_v8 = vpack.c.bf16 %v3811_v20, %v3809_v18  ;;  %v3469_v25 = vadd.f32 %v3468_v29, %v6737_v22  ;;  %v3470_v33 = vpop.f32.mrb[197].mxu1 }
 0x430   : > { %v3471_v34 = vadd.f32 %v3470_v33, %v6740_v26  ;;  %v3472_v35 = vpop.f32.mrb[198].mxu1  ;;  %v3906_v36 = vpack.c.bf16 %v3812_v27, %v3810_v30 }
 0x431   : > { %v3685_v37 = vmul.f32 0.01, %v3469_v25  ;;  %v3473_v38 = vadd.f32 %v3472_v35, %v6737_v22  ;;  %v3474_v39 = vpop.f32.mrb[199].mxu1 }
 0x432   : > { %v3686_v40 = vmul.f32 0.01, %v3471_v34  ;;  %v3475_v41 = vadd.f32 %v3474_v39, %v6740_v26  ;;  %4335 = vmatprep.mubr.bf16.mxu0 %v3906_v36 }
 0x433   : > { %v3687_v42 = vmul.f32 0.01, %v3473_v38  ;;  %4336 = vmatmul.mubr.bf16.gmra.mrb[64].mxu0 %v3905_v8  ;;  %v3813_v43 = vmax.f32 %v3469_v25, %v3685_v37 }
 0x434   : > { %v3688_v49 = vmul.f32 0.01, %v3475_v41  ;;  %v3814_v0 = vmax.f32 %v3471_v34, %v3686_v40 }
 0x435   : > { %v3815_v44 = vmax.f32 %v3473_v38, %v3687_v42 }
 0x436   : > { %v3816_v45 = vmax.f32 %v3475_v41, %v3688_v49  ;;  %v3478_v46 = vpop.f32.mrb[200].mxu1 }
 0x437   : > { %v3907_v47 = vpack.c.bf16 %v3815_v44, %v3813_v43  ;;  %v3479_v48 = vadd.f32 %v3478_v46, %v6737_v22  ;;  %v3480_v51 = vpop.f32.mrb[201].mxu1 }
 0x438   : > { %v3481_v50 = vadd.f32 %v3480_v51, %v6740_v26  ;;  %v3482_v53 = vpop.f32.mrb[202].mxu1  ;;  %v3908_v31 = vpack.c.bf16 %v3816_v45, %v3814_v0 }
 0x439   : > { %v3689_v54 = vmul.f32 0.01, %v3479_v48  ;;  %v3483_v56 = vadd.f32 %v3482_v53, %v6737_v22  ;;  %v3484_v58 = vpop.f32.mrb[203].mxu1 }
 0x43a   : > { %v3690_v59 = vmul.f32 0.01, %v3481_v50  ;;  %v3485_v60 = vadd.f32 %v3484_v58, %v6740_v26  ;;  %4345 = vmatprep.mubr.bf16.mxu0 %v3908_v31 }
 0x43b   : > { %v3691_v61 = vmul.f32 0.01, %v3483_v56  ;;  %4346 = vmatmul.mubr.bf16.gmra.mrb[68].mxu0 %v3907_v47  ;;  %v3817_v10 = vmax.f32 %v3479_v48, %v3689_v54 }
 0x43c   : > { %v3692_v24 = vmul.f32 0.01, %v3485_v60  ;;  %v3818_v63 = vmax.f32 %v3481_v50, %v3690_v59 }
 0x43d   : > { %v3819_v62 = vmax.f32 %v3483_v56, %v3691_v61 }
 0x43e   : > { %v3820_v1 = vmax.f32 %v3485_v60, %v3692_v24  ;;  %v3488_v2 = vpop.f32.mrb[204].mxu1 }
 0x43f   : > { %v3909_v3 = vpack.c.bf16 %v3819_v62, %v3817_v10  ;;  %v3489_v32 = vadd.f32 %v3488_v2, %v6737_v22  ;;  %v3490_v4 = vpop.f32.mrb[205].mxu1 }
 0x440   : > { %v3491_v5 = vadd.f32 %v3490_v4, %v6740_v26  ;;  %v3492_v28 = vpop.f32.mrb[206].mxu1  ;;  %v3910_v6 = vpack.c.bf16 %v3820_v1, %v3818_v63 }
 0x441   : > { %v3693_v19 = vmul.f32 0.01, %v3489_v32  ;;  %v3493_v55 = vadd.f32 %v3492_v28, %v6737_v22  ;;  %v3494_v7 = vpop.f32.mrb[207].mxu1 }
 0x442   : > { %v3694_v9 = vmul.f32 0.01, %v3491_v5  ;;  %v3495_v11 = vadd.f32 %v3494_v7, %v6740_v26  ;;  %4355 = vmatprep.mubr.bf16.mxu0 %v3910_v6 }
 0x443   : > { %v3695_v12 = vmul.f32 0.01, %v3493_v55  ;;  %4356 = vmatmul.mubr.bf16.gmra.mrb[72].mxu0 %v3909_v3  ;;  %v3821_v57 = vmax.f32 %v3489_v32, %v3693_v19 }
 0x444   : > { %v3696_v13 = vmul.f32 0.01, %v3495_v11  ;;  %v3822_v52 = vmax.f32 %v3491_v5, %v3694_v9 }
 0x445   : > { %v3823_v14 = vmax.f32 %v3493_v55, %v3695_v12 }
 0x446   : > { %v3824_v15 = vmax.f32 %v3495_v11, %v3696_v13  ;;  %v3498_v16 = vpop.f32.mrb[208].mxu1 }
 0x447   : > { %v3911_v17 = vpack.c.bf16 %v3823_v14, %v3821_v57  ;;  %v3499_v18 = vadd.f32 %v3498_v16, %v6737_v22  ;;  %v3500_v20 = vpop.f32.mrb[209].mxu1 }
 0x448   : > { %v3501_v30 = vadd.f32 %v3500_v20, %v6740_v26  ;;  %v3502_v27 = vpop.f32.mrb[210].mxu1  ;;  %v3912_v29 = vpack.c.bf16 %v3824_v15, %v3822_v52 }
 0x449   : > { %v3697_v8 = vmul.f32 0.01, %v3499_v18  ;;  %v3503_v25 = vadd.f32 %v3502_v27, %v6737_v22  ;;  %v3504_v33 = vpop.f32.mrb[211].mxu1 }
 0x44a   : > { %v3698_v34 = vmul.f32 0.01, %v3501_v30  ;;  %v3505_v35 = vadd.f32 %v3504_v33, %v6740_v26  ;;  %4365 = vmatprep.mubr.bf16.mxu0 %v3912_v29 }
 0x44b   : > { %v3699_v36 = vmul.f32 0.01, %v3503_v25  ;;  %4366 = vmatmul.mubr.bf16.gmra.mrb[76].mxu0 %v3911_v17  ;;  %v3825_v38 = vmax.f32 %v3499_v18, %v3697_v8 }
 0x44c   : > { %v3700_v37 = vmul.f32 0.01, %v3505_v35  ;;  %v3826_v40 = vmax.f32 %v3501_v30, %v3698_v34 }
 0x44d   : > { %v3827_v39 = vmax.f32 %v3503_v25, %v3699_v36 }
 0x44e   : > { %v3828_v41 = vmax.f32 %v3505_v35, %v3700_v37  ;;  %v3508_v42 = vpop.f32.mrb[212].mxu1 }
 0x44f   : > { %v3913_v49 = vpack.c.bf16 %v3827_v39, %v3825_v38  ;;  %v3509_v43 = vadd.f32 %v3508_v42, %v6737_v22  ;;  %v3510_v44 = vpop.f32.mrb[213].mxu1 }
 0x450   : > { %v3511_v0 = vadd.f32 %v3510_v44, %v6740_v26  ;;  %v3512_v45 = vpop.f32.mrb[214].mxu1  ;;  %v3914_v46 = vpack.c.bf16 %v3828_v41, %v3826_v40 }
 0x451   : > { %v3701_v47 = vmul.f32 0.01, %v3509_v43  ;;  %v3513_v48 = vadd.f32 %v3512_v45, %v6737_v22  ;;  %v3514_v51 = vpop.f32.mrb[215].mxu1 }
 0x452   : > { %v3702_v50 = vmul.f32 0.01, %v3511_v0  ;;  %v3515_v53 = vadd.f32 %v3514_v51, %v6740_v26  ;;  %4375 = vmatprep.mubr.bf16.mxu0 %v3914_v46 }
 0x453   : > { %v3703_v31 = vmul.f32 0.01, %v3513_v48  ;;  %4376 = vmatmul.mubr.bf16.gmra.mrb[80].mxu0 %v3913_v49  ;;  %v3829_v56 = vmax.f32 %v3509_v43, %v3701_v47 }
 0x454   : > { %v3704_v54 = vmul.f32 0.01, %v3515_v53  ;;  %v3830_v59 = vmax.f32 %v3511_v0, %v3702_v50 }
 0x455   : > { %v3831_v58 = vmax.f32 %v3513_v48, %v3703_v31 }
 0x456   : > { %v3832_v60 = vmax.f32 %v3515_v53, %v3704_v54  ;;  %v3518_v61 = vpop.f32.mrb[216].mxu1 }
 0x457   : > { %v3915_v24 = vpack.c.bf16 %v3831_v58, %v3829_v56  ;;  %v3519_v10 = vadd.f32 %v3518_v61, %v6737_v22  ;;  %v3520_v62 = vpop.f32.mrb[217].mxu1 }
 0x458   : > { %v3521_v63 = vadd.f32 %v3520_v62, %v6740_v26  ;;  %v3522_v1 = vpop.f32.mrb[218].mxu1  ;;  %v3916_v2 = vpack.c.bf16 %v3832_v60, %v3830_v59 }
 0x459   : > { %v3705_v3 = vmul.f32 0.01, %v3519_v10  ;;  %v3523_v32 = vadd.f32 %v3522_v1, %v6737_v22  ;;  %v3524_v4 = vpop.f32.mrb[219].mxu1 }
 0x45a   : > { %v3706_v5 = vmul.f32 0.01, %v3521_v63  ;;  %v3525_v28 = vadd.f32 %v3524_v4, %v6740_v26  ;;  %4385 = vmatprep.mubr.bf16.mxu0 %v3916_v2 }
 0x45b   : > { %v3707_v6 = vmul.f32 0.01, %v3523_v32  ;;  %4386 = vmatmul.mubr.bf16.gmra.mrb[84].mxu0 %v3915_v24  ;;  %v3833_v55 = vmax.f32 %v3519_v10, %v3705_v3 }
 0x45c   : > { %v3708_v19 = vmul.f32 0.01, %v3525_v28  ;;  %v3834_v9 = vmax.f32 %v3521_v63, %v3706_v5 }
 0x45d   : > { %v3835_v7 = vmax.f32 %v3523_v32, %v3707_v6 }
 0x45e   : > { %v3836_v11 = vmax.f32 %v3525_v28, %v3708_v19  ;;  %v3528_v12 = vpop.f32.mrb[220].mxu1 }
 0x45f   : > { %v3917_v13 = vpack.c.bf16 %v3835_v7, %v3833_v55  ;;  %v3529_v57 = vadd.f32 %v3528_v12, %v6737_v22  ;;  %v3530_v14 = vpop.f32.mrb[221].mxu1 }
 0x460   : > { %v3531_v52 = vadd.f32 %v3530_v14, %v6740_v26  ;;  %v3532_v15 = vpop.f32.mrb[222].mxu1  ;;  %v3918_v16 = vpack.c.bf16 %v3836_v11, %v3834_v9 }
 0x461   : > { %v3709_v17 = vmul.f32 0.01, %v3529_v57  ;;  %v3533_v18 = vadd.f32 %v3532_v15, %v6737_v22  ;;  %v3534_v20 = vpop.f32.mrb[223].mxu1 }
 0x462   : > { %v3710_v30 = vmul.f32 0.01, %v3531_v52  ;;  %v3535_v27 = vadd.f32 %v3534_v20, %v6740_v26  ;;  %4395 = vmatprep.mubr.bf16.mxu0 %v3918_v16 }
 0x463   : > { %v3711_v29 = vmul.f32 0.01, %v3533_v18  ;;  %4396 = vmatmul.mubr.bf16.gmra.mrb[88].mxu0 %v3917_v13  ;;  %v3837_v25 = vmax.f32 %v3529_v57, %v3709_v17 }
 0x464   : > { %v3712_v8 = vmul.f32 0.01, %v3535_v27  ;;  %v3838_v34 = vmax.f32 %v3531_v52, %v3710_v30 }
 0x465   : > { %v3839_v33 = vmax.f32 %v3533_v18, %v3711_v29 }
 0x466   : > { %v3840_v35 = vmax.f32 %v3535_v27, %v3712_v8  ;;  %v3538_v36 = vpop.f32.mrb[224].mxu1 }
 0x467   : > { %v3919_v37 = vpack.c.bf16 %v3839_v33, %v3837_v25  ;;  %v3539_v38 = vadd.f32 %v3538_v36, %v6737_v22  ;;  %v3540_v39 = vpop.f32.mrb[225].mxu1 }
 0x468   : > { %v3541_v40 = vadd.f32 %v3540_v39, %v6740_v26  ;;  %v3542_v41 = vpop.f32.mrb[226].mxu1  ;;  %v3920_v42 = vpack.c.bf16 %v3840_v35, %v3838_v34 }
 0x469   : > { %v3713_v49 = vmul.f32 0.01, %v3539_v38  ;;  %v3543_v43 = vadd.f32 %v3542_v41, %v6737_v22  ;;  %v3544_v44 = vpop.f32.mrb[227].mxu1 }
 0x46a   : > { %v3714_v0 = vmul.f32 0.01, %v3541_v40  ;;  %v3545_v45 = vadd.f32 %v3544_v44, %v6740_v26  ;;  %4405 = vmatprep.mubr.bf16.mxu0 %v3920_v42 }
 0x46b   : > { %v3715_v46 = vmul.f32 0.01, %v3543_v43  ;;  %4406 = vmatmul.mubr.bf16.gmra.mrb[92].mxu0 %v3919_v37  ;;  %v3841_v48 = vmax.f32 %v3539_v38, %v3713_v49  ;;  %v5679_v37 = vld [vmem:[%s7313_s4 + $0x4] ss:$8 sm:$0x3] }
 0x46c   : > { %v3716_v47 = vmul.f32 0.01, %v3545_v45  ;;  %v3842_v50 = vmax.f32 %v3541_v40, %v3714_v0  ;;  %v6939_v0 = vrot.slane %v5679_v37, %v6265_v23 }
 0x46d   : > { %v3843_v51 = vmax.f32 %v3543_v43, %v3715_v46  ;;  %v6936_v43 = vrot.slane %v5679_v37, %v6260_v21 }
 0x46e   : > { %v3844_v53 = vmax.f32 %v3545_v45, %v3716_v47  ;;  %v3548_v31 = vpop.f32.mrb[228].mxu1 }
 0x46f   : > { %v3921_v54 = vpack.c.bf16 %v3843_v51, %v3841_v48  ;;  %v3549_v56 = vadd.f32 %v3548_v31, %v6737_v22  ;;  %v3550_v58 = vpop.f32.mrb[229].mxu1 }
 0x470   : > { %v3551_v59 = vadd.f32 %v3550_v58, %v6740_v26  ;;  %v3552_v60 = vpop.f32.mrb[230].mxu1  ;;  %v3922_v61 = vpack.c.bf16 %v3844_v53, %v3842_v50 }
 0x471   : > { %v3717_v24 = vmul.f32 0.01, %v3549_v56  ;;  %v3553_v10 = vadd.f32 %v3552_v60, %v6737_v22  ;;  %v3554_v62 = vpop.f32.mrb[231].mxu1 }
 0x472   : > { %v3718_v63 = vmul.f32 0.01, %v3551_v59  ;;  %v3555_v1 = vadd.f32 %v3554_v62, %v6740_v26  ;;  %4415 = vmatprep.mubr.bf16.mxu0 %v3922_v61 }
 0x473   : > { %v3719_v2 = vmul.f32 0.01, %v3553_v10  ;;  %4416 = vmatmul.mubr.bf16.gmra.mrb[96].mxu0 %v3921_v54  ;;  %v3845_v32 = vmax.f32 %v3549_v56, %v3717_v24 }
 0x474   : > { %v3720_v3 = vmul.f32 0.01, %v3555_v1  ;;  %v3846_v5 = vmax.f32 %v3551_v59, %v3718_v63 }
 0x475   : > { %v3847_v4 = vmax.f32 %v3553_v10, %v3719_v2 }
 0x476   : > { %v3848_v28 = vmax.f32 %v3555_v1, %v3720_v3  ;;  %v3558_v6 = vpop.f32.mrb[232].mxu1 }
 0x477   : > { %v3923_v19 = vpack.c.bf16 %v3847_v4, %v3845_v32  ;;  %v3559_v55 = vadd.f32 %v3558_v6, %v6737_v22  ;;  %v3560_v7 = vpop.f32.mrb[233].mxu1 }
 0x478   : > { %v3561_v9 = vadd.f32 %v3560_v7, %v6740_v26  ;;  %v3562_v11 = vpop.f32.mrb[234].mxu1  ;;  %v3924_v12 = vpack.c.bf16 %v3848_v28, %v3846_v5 }
 0x479   : > { %v3721_v13 = vmul.f32 0.01, %v3559_v55  ;;  %v3563_v57 = vadd.f32 %v3562_v11, %v6737_v22  ;;  %v3564_v14 = vpop.f32.mrb[235].mxu1 }
 0x47a   : > { %v3722_v52 = vmul.f32 0.01, %v3561_v9  ;;  %v3565_v15 = vadd.f32 %v3564_v14, %v6740_v26  ;;  %4425 = vmatprep.mubr.bf16.mxu0 %v3924_v12 }
 0x47b   : > { %v3723_v16 = vmul.f32 0.01, %v3563_v57  ;;  %4426 = vmatmul.mubr.bf16.gmra.mrb[100].mxu0 %v3923_v19  ;;  %v3849_v18 = vmax.f32 %v3559_v55, %v3721_v13 }
 0x47c   : > { %v3724_v17 = vmul.f32 0.01, %v3565_v15  ;;  %v3850_v30 = vmax.f32 %v3561_v9, %v3722_v52 }
 0x47d   : > { %v3851_v20 = vmax.f32 %v3563_v57, %v3723_v16 }
 0x47e   : > { %v3852_v27 = vmax.f32 %v3565_v15, %v3724_v17  ;;  %v3568_v29 = vpop.f32.mrb[236].mxu1 }
 0x47f   : > { %v3925_v8 = vpack.c.bf16 %v3851_v20, %v3849_v18  ;;  %v3569_v25 = vadd.f32 %v3568_v29, %v6737_v22  ;;  %v3570_v33 = vpop.f32.mrb[237].mxu1 }
 0x480   : > { %v3571_v34 = vadd.f32 %v3570_v33, %v6740_v26  ;;  %v3572_v35 = vpop.f32.mrb[238].mxu1  ;;  %v3926_v36 = vpack.c.bf16 %v3852_v27, %v3850_v30 }
 0x481   : > { %v3725_v38 = vmul.f32 0.01, %v3569_v25  ;;  %v3573_v39 = vadd.f32 %v3572_v35, %v6737_v22  ;;  %v3574_v40 = vpop.f32.mrb[239].mxu1 }
 0x482   : > { %v3726_v41 = vmul.f32 0.01, %v3571_v34  ;;  %v3575_v42 = vadd.f32 %v3574_v40, %v6740_v26  ;;  %4435 = vmatprep.mubr.bf16.mxu0 %v3926_v36 }
 0x483   : > { %v3727_v49 = vmul.f32 0.01, %v3573_v39  ;;  %4436 = vmatmul.mubr.bf16.gmra.mrb[104].mxu0 %v3925_v8  ;;  %v3853_v45 = vmax.f32 %v3569_v25, %v3725_v38 }
 0x484   : > { %v3728_v44 = vmul.f32 0.01, %v3575_v42  ;;  %v3854_v47 = vmax.f32 %v3571_v34, %v3726_v41 }
 0x485   : > { %v3855_v46 = vmax.f32 %v3573_v39, %v3727_v49 }
 0x486   : > { %v3856_v48 = vmax.f32 %v3575_v42, %v3728_v44  ;;  %v3578_v51 = vpop.f32.mrb[240].mxu1  ;;  %v4177_v50 = vpop.f32.mrb[0].mxu0 }
 0x487   : > { %v3927_v53 = vpack.c.bf16 %v3855_v46, %v3853_v45  ;;  %v3579_v31 = vadd.f32 %v3578_v51, %v6737_v22  ;;  %v4178_v54 = vadd.f32 %v4177_v50, %v6936_v43  ;;  %v3580_v56 = vpop.f32.mrb[241].mxu1  ;;  %v4179_v58 = vpop.f32.mrb[1].mxu0 }
 0x488   : > { %v3581_v21 = vadd.f32 %v3580_v56, %v6740_v26  ;;  %v4180_v59 = vadd.f32 %v4179_v58, %v6939_v0  ;;  %v3582_v60 = vpop.f32.mrb[242].mxu1  ;;  %v4181_v23 = vpop.f32.mrb[2].mxu0  ;;  %v3928_v61 = vpack.c.bf16 %v3856_v48, %v3854_v47 }
 0x489   : > { %v3729_v24 = vmul.f32 0.01, %v3579_v31  ;;  %v4496_v10 = vmul.f32 0.01, %v4178_v54  ;;  %v3583_v62 = vadd.f32 %v3582_v60, %v6737_v22  ;;  %v4182_v63 = vadd.f32 %v4181_v23, %v6936_v43  ;;  %v3584_v1 = vpop.f32.mrb[243].mxu1  ;;  %v4183_v2 = vpop.f32.mrb[3].mxu0 }
 0x48a   : > { %v3730_v3 = vmul.f32 0.01, %v3581_v21  ;;  %v4497_v32 = vmul.f32 0.01, %v4180_v59  ;;  %v3585_v4 = vadd.f32 %v3584_v1, %v6740_v26  ;;  %v4184_v5 = vadd.f32 %v4183_v2, %v6939_v0  ;;  %4445 = vmatprep.mubr.bf16.mxu0 %v3928_v61 }
 0x48b   : > { %v3731_v28 = vmul.f32 0.01, %v3583_v62  ;;  %v4498_v6 = vmul.f32 0.01, %v4182_v63  ;;  %4446 = vmatmul.mubr.bf16.gmra.mrb[108].mxu0 %v3927_v53  ;;  %v3857_v7 = vmax.f32 %v3579_v31, %v3729_v24  ;;  %v4624_v9 = vmax.f32 %v4178_v54, %v4496_v10 }
 0x48c   : > { %v3732_v19 = vmul.f32 0.01, %v3585_v4  ;;  %v4499_v55 = vmul.f32 0.01, %v4184_v5  ;;  %v3858_v13 = vmax.f32 %v3581_v21, %v3730_v3  ;;  %v4625_v57 = vmax.f32 %v4180_v59, %v4497_v32 }
 0x48d   : > { %v3859_v11 = vmax.f32 %v3583_v62, %v3731_v28  ;;  %v4626_v12 = vmax.f32 %v4182_v63, %v4498_v6 }
 0x48e   : > { %v3860_v14 = vmax.f32 %v3585_v4, %v3732_v19  ;;  %v4627_v52 = vmax.f32 %v4184_v5, %v4499_v55  ;;  %v3588_v15 = vpop.f32.mrb[244].mxu1  ;;  %v4187_v16 = vpop.f32.mrb[4].mxu0 }
 0x48f   : > { %v3929_v17 = vpack.c.bf16 %v3859_v11, %v3857_v7  ;;  %v6949_v18 = vpack.c.bf16 %v4626_v12, %v4624_v9  ;;  %v3589_v20 = vadd.f32 %v3588_v15, %v6737_v22  ;;  %v4188_v30 = vadd.f32 %v4187_v16, %v6936_v43  ;;  %v3590_v27 = vpop.f32.mrb[245].mxu1  ;;  %v4189_v29 = vpop.f32.mrb[5].mxu0 }
 0x490   : > { %v3591_v8 = vadd.f32 %v3590_v27, %v6740_v26  ;;  %v4190_v25 = vadd.f32 %v4189_v29, %v6939_v0  ;;  %v3592_v33 = vpop.f32.mrb[246].mxu1  ;;  %v4191_v34 = vpop.f32.mrb[6].mxu0  ;;  %v3930_v35 = vpack.c.bf16 %v3860_v14, %v3858_v13  ;;  %v6955_v36 = vpack.c.bf16 %v4627_v52, %v4625_v57 }
 0x491   : > { %v3733_v37 = vmul.f32 0.01, %v3589_v20  ;;  %v4500_v38 = vmul.f32 0.01, %v4188_v30  ;;  %v3593_v39 = vadd.f32 %v3592_v33, %v6737_v22  ;;  %v4192_v40 = vadd.f32 %v4191_v34, %v6936_v43  ;;  %v3594_v41 = vpop.f32.mrb[247].mxu1  ;;  %v4193_v42 = vpop.f32.mrb[7].mxu0 }
 0x492   : > { %v3734_v49 = vmul.f32 0.01, %v3591_v8  ;;  %v4501_v44 = vmul.f32 0.01, %v4190_v25  ;;  %v3595_v45 = vadd.f32 %v3594_v41, %v6740_v26  ;;  %v4194_v46 = vadd.f32 %v4193_v42, %v6939_v0  ;;  %4455 = vmatprep.mubr.bf16.mxu0 %v3930_v35 }
 0x493   : > { %v3735_v47 = vmul.f32 0.01, %v3593_v39  ;;  %v4502_v48 = vmul.f32 0.01, %v4192_v40  ;;  %4456 = vmatmul.mubr.bf16.gmra.mrb[112].mxu0 %v3929_v17  ;;  %v3861_v53 = vmax.f32 %v3589_v20, %v3733_v37  ;;  %v4628_v31 = vmax.f32 %v4188_v30, %v4500_v38 }
 0x494   : > { %v3736_v51 = vmul.f32 0.01, %v3595_v45  ;;  %v4503_v50 = vmul.f32 0.01, %v4194_v46  ;;  %v3862_v58 = vmax.f32 %v3591_v8, %v3734_v49  ;;  %v4629_v21 = vmax.f32 %v4190_v25, %v4501_v44 }
 0x495   : > { %v3863_v54 = vmax.f32 %v3593_v39, %v3735_v47  ;;  %v4630_v56 = vmax.f32 %v4192_v40, %v4502_v48 }
 0x496   : > { %v3864_v59 = vmax.f32 %v3595_v45, %v3736_v51  ;;  %v4631_v60 = vmax.f32 %v4194_v46, %v4503_v50  ;;  %v3598_v23 = vpop.f32.mrb[248].mxu1  ;;  %v4197_v61 = vpop.f32.mrb[8].mxu0 }
 0x497   : > { %v3931_v24 = vpack.c.bf16 %v3863_v54, %v3861_v53  ;;  %v6961_v10 = vpack.c.bf16 %v4630_v56, %v4628_v31  ;;  %v3599_v62 = vadd.f32 %v3598_v23, %v6737_v22  ;;  %v4198_v63 = vadd.f32 %v4197_v61, %v6936_v43  ;;  %v3600_v1 = vpop.f32.mrb[249].mxu1  ;;  %v4199_v2 = vpop.f32.mrb[9].mxu0 }
 0x498   : > { %v3601_v3 = vadd.f32 %v3600_v1, %v6740_v26  ;;  %v4200_v32 = vadd.f32 %v4199_v2, %v6939_v0  ;;  %v3602_v4 = vpop.f32.mrb[250].mxu1  ;;  %v4201_v5 = vpop.f32.mrb[10].mxu0  ;;  %v3932_v28 = vpack.c.bf16 %v3864_v59, %v3862_v58  ;;  %v6967_v6 = vpack.c.bf16 %v4631_v60, %v4629_v21 }
 0x499   : > { %v3737_v19 = vmul.f32 0.01, %v3599_v62  ;;  %v4504_v55 = vmul.f32 0.01, %v4198_v63  ;;  %v3603_v7 = vadd.f32 %v3602_v4, %v6737_v22  ;;  %v4202_v9 = vadd.f32 %v4201_v5, %v6936_v43  ;;  %v3604_v11 = vpop.f32.mrb[251].mxu1  ;;  %v4203_v12 = vpop.f32.mrb[11].mxu0 }
 0x49a   : > { %v3738_v13 = vmul.f32 0.01, %v3601_v3  ;;  %v4505_v57 = vmul.f32 0.01, %v4200_v32  ;;  %v3605_v14 = vadd.f32 %v3604_v11, %v6740_v26  ;;  %v4204_v52 = vadd.f32 %v4203_v12, %v6939_v0  ;;  %4465 = vmatprep.mubr.bf16.mxu0 %v3932_v28 }
 0x49b   : > { %v3739_v15 = vmul.f32 0.01, %v3603_v7  ;;  %v4506_v16 = vmul.f32 0.01, %v4202_v9  ;;  %4466 = vmatmul.mubr.bf16.gmra.mrb[116].mxu0 %v3931_v24  ;;  %v3865_v30 = vmax.f32 %v3599_v62, %v3737_v19  ;;  %v4632_v27 = vmax.f32 %v4198_v63, %v4504_v55 }
 0x49c   : > { %v3740_v17 = vmul.f32 0.01, %v3605_v14  ;;  %v4507_v20 = vmul.f32 0.01, %v4204_v52  ;;  %v3866_v25 = vmax.f32 %v3601_v3, %v3738_v13  ;;  %v4633_v33 = vmax.f32 %v4200_v32, %v4505_v57 }
 0x49d   : > { %v3867_v29 = vmax.f32 %v3603_v7, %v3739_v15  ;;  %v4634_v8 = vmax.f32 %v4202_v9, %v4506_v16 }
 0x49e   : > { %v3868_v34 = vmax.f32 %v3605_v14, %v3740_v17  ;;  %v4635_v35 = vmax.f32 %v4204_v52, %v4507_v20  ;;  %v3608_v37 = vpop.f32.mrb[252].mxu1  ;;  %v4207_v38 = vpop.f32.mrb[12].mxu0 }
 0x49f   : > { %v3933_v39 = vpack.c.bf16 %v3867_v29, %v3865_v30  ;;  %v6973_v40 = vpack.c.bf16 %v4634_v8, %v4632_v27  ;;  %v3609_v41 = vadd.f32 %v3608_v37, %v6737_v22  ;;  %v4208_v42 = vadd.f32 %v4207_v38, %v6936_v43  ;;  %v3610_v49 = vpop.f32.mrb[253].mxu1  ;;  %v4209_v44 = vpop.f32.mrb[13].mxu0 }
 0x4a0   : > { %v3611_v45 = vadd.f32 %v3610_v49, %v6740_v26  ;;  %v4210_v46 = vadd.f32 %v4209_v44, %v6939_v0  ;;  %v3612_v47 = vpop.f32.mrb[254].mxu1  ;;  %v4211_v48 = vpop.f32.mrb[14].mxu0  ;;  %v3934_v51 = vpack.c.bf16 %v3868_v34, %v3866_v25  ;;  %v6979_v50 = vpack.c.bf16 %v4635_v35, %v4633_v33 }
 0x4a1   : > { %v3741_v53 = vmul.f32 0.01, %v3609_v41  ;;  %v4508_v31 = vmul.f32 0.01, %v4208_v42  ;;  %v3613_v54 = vadd.f32 %v3612_v47, %v6737_v22  ;;  %v4212_v56 = vadd.f32 %v4211_v48, %v6936_v43  ;;  %v3614_v58 = vpop.f32.mrb[255].mxu1  ;;  %v4213_v21 = vpop.f32.mrb[15].mxu0 }
 0x4a2   : > { %v3742_v59 = vmul.f32 0.01, %v3611_v45  ;;  %v4509_v60 = vmul.f32 0.01, %v4210_v46  ;;  %v3615_v23 = vadd.f32 %v3614_v58, %v6740_v26  ;;  %v4214_v61 = vadd.f32 %v4213_v21, %v6939_v0  ;;  %4475 = vmatprep.mubr.bf16.mxu0 %v3934_v51 }
 0x4a3   : > { %v3743_v24 = vmul.f32 0.01, %v3613_v54  ;;  %v4510_v62 = vmul.f32 0.01, %v4212_v56  ;;  %4476 = vmatmul.mubr.bf16.gmra.mrb[120].mxu0 %v3933_v39  ;;  %v3869_v2 = vmax.f32 %v3609_v41, %v3741_v53  ;;  %v4636_v3 = vmax.f32 %v4208_v42, %v4508_v31 }
 0x4a4   : > { %v3744_v63 = vmul.f32 0.01, %v3615_v23  ;;  %v4511_v1 = vmul.f32 0.01, %v4214_v61  ;;  %v3870_v4 = vmax.f32 %v3611_v45, %v3742_v59  ;;  %v4637_v5 = vmax.f32 %v4210_v46, %v4509_v60 }
 0x4a5   : > { %v3871_v32 = vmax.f32 %v3613_v54, %v3743_v24  ;;  %v4638_v22 = vmax.f32 %v4212_v56, %v4510_v62 }
 0x4a6   : > { %v3872_v28 = vmax.f32 %v3615_v23, %v3744_v63  ;;  %v4639_v19 = vmax.f32 %v4214_v61, %v4511_v1  ;;  %v4217_v55 = vpop.f32.mrb[16].mxu0 }
 0x4a7   : > { %v3935_v7 = vpack.c.bf16 %v3871_v32, %v3869_v2  ;;  %v4758_v9 = vpack.c.bf16 %v4638_v22, %v4636_v3  ;;  %v4218_v26 = vadd.f32 %v4217_v55, %v6936_v43  ;;  %v4219_v11 = vpop.f32.mrb[17].mxu0 }
 0x4a8   : > { %v4220_v12 = vadd.f32 %v4219_v11, %v6939_v0  ;;  %v4221_v13 = vpop.f32.mrb[18].mxu0  ;;  %v3936_v57 = vpack.c.bf16 %v3872_v28, %v3870_v4  ;;  %v4759_v14 = vpack.c.bf16 %v4639_v19, %v4637_v5 }
 0x4a9   : > { %v4512_v52 = vmul.f32 0.01, %v4218_v26  ;;  %v4222_v15 = vadd.f32 %v4221_v13, %v6936_v43  ;;  %v4223_v16 = vpop.f32.mrb[19].mxu0 }
 0x4aa   : > { %v4513_v17 = vmul.f32 0.01, %v4220_v12  ;;  %v4224_v20 = vadd.f32 %v4223_v16, %v6939_v0  ;;  %4485 = vmatprep.mubr.bf16.mxu0 %v3936_v57  ;;  %5007 = vmatprep.mubr.bf16.mxu1 %v4759_v14 }
 0x4ab   : > { %v4514_v30 = vmul.f32 0.01, %v4222_v15  ;;  %4486 = vmatmul.mubr.bf16.gmra.mrb[124].mxu0 %v3935_v7  ;;  %5008 = vmatmul.mubr.bf16.vlgmr.msra.gmra.mrb[0].mxu1 %v4758_v9  ;;  %v4640_v29 = vmax.f32 %v4218_v26, %v4512_v52 }
 0x4ac   : > { %v4515_v27 = vmul.f32 0.01, %v4224_v20  ;;  %4983 = vmatprep.mubr.bf16.mxu0 %v6955_v36  ;;  %v4641_v25 = vmax.f32 %v4220_v12, %v4513_v17 }
 0x4ad   : > { %v4642_v8 = vmax.f32 %v4222_v15, %v4514_v30 }
 0x4ae   : > { %v4643_v33 = vmax.f32 %v4224_v20, %v4515_v27  ;;  %v4227_v34 = vpop.f32.mrb[20].mxu0 }
 0x4af   : > { %v4760_v35 = vpack.c.bf16 %v4642_v8, %v4640_v29  ;;  %v4228_v37 = vadd.f32 %v4227_v34, %v6936_v43  ;;  %v4229_v38 = vpop.f32.mrb[21].mxu0 }
 0x4b0   : > { %v4230_v39 = vadd.f32 %v4229_v38, %v6939_v0  ;;  %v4231_v41 = vpop.f32.mrb[22].mxu0  ;;  %v4761_v42 = vpack.c.bf16 %v4643_v33, %v4641_v25 }
 0x4b1   : > { %v4516_v49 = vmul.f32 0.01, %v4228_v37  ;;  %v4232_v44 = vadd.f32 %v4231_v41, %v6936_v43  ;;  %v4233_v45 = vpop.f32.mrb[23].mxu0 }
 0x4b2   : > { %v4517_v46 = vmul.f32 0.01, %v4230_v39  ;;  %v4234_v36 = vadd.f32 %v4233_v45, %v6939_v0  ;;  %5015 = vmatprep.mubr.bf16.mxu1 %v4761_v42 }
 0x4b3   : > { %v4518_v47 = vmul.f32 0.01, %v4232_v44  ;;  %4984 = vmatmul.mubr.bf16.vlgmr.msra.gmra.mrb[128].mxu0 %v6949_v18  ;;  %5016 = vmatmul.mubr.bf16.gmra.mrb[4].mxu1 %v4760_v35  ;;  %v4644_v51 = vmax.f32 %v4228_v37, %v4516_v49 }
 0x4b4   : > { %v4519_v48 = vmul.f32 0.01, %v4234_v36  ;;  %4991 = vmatprep.mubr.bf16.mxu0 %v6967_v6  ;;  %v4645_v31 = vmax.f32 %v4230_v39, %v4517_v46 }
 0x4b5   : > { %v4646_v53 = vmax.f32 %v4232_v44, %v4518_v47 }
 0x4b6   : > { %v4647_v54 = vmax.f32 %v4234_v36, %v4519_v48  ;;  %v4237_v56 = vpop.f32.mrb[24].mxu0 }
 0x4b7   : > { %v4762_v58 = vpack.c.bf16 %v4646_v53, %v4644_v51  ;;  %v4238_v21 = vadd.f32 %v4237_v56, %v6936_v43  ;;  %v4239_v59 = vpop.f32.mrb[25].mxu0 }
 0x4b8   : > { %v4240_v60 = vadd.f32 %v4239_v59, %v6939_v0  ;;  %v4241_v23 = vpop.f32.mrb[26].mxu0  ;;  %v4763_v61 = vpack.c.bf16 %v4647_v54, %v4645_v31 }
 0x4b9   : > { %v4520_v24 = vmul.f32 0.01, %v4238_v21  ;;  %v4242_v18 = vadd.f32 %v4241_v23, %v6936_v43  ;;  %v4243_v62 = vpop.f32.mrb[27].mxu0 }
 0x4ba   : > { %v4521_v63 = vmul.f32 0.01, %v4240_v60  ;;  %v4244_v6 = vadd.f32 %v4243_v62, %v6939_v0  ;;  %5023 = vmatprep.mubr.bf16.mxu1 %v4763_v61 }
 0x4bb   : > { %v4522_v1 = vmul.f32 0.01, %v4242_v18  ;;  %4992 = vmatmul.mubr.bf16.gmra.mrb[132].mxu0 %v6961_v10  ;;  %5024 = vmatmul.mubr.bf16.gmra.mrb[8].mxu1 %v4762_v58  ;;  %v4648_v3 = vmax.f32 %v4238_v21, %v4520_v24 }
 0x4bc   : > { %v4523_v2 = vmul.f32 0.01, %v4244_v6  ;;  %4999 = vmatprep.mubr.bf16.mxu0 %v6979_v50  ;;  %v4649_v22 = vmax.f32 %v4240_v60, %v4521_v63 }
 0x4bd   : > { %v4650_v32 = vmax.f32 %v4242_v18, %v4522_v1 }
 0x4be   : > { %v4651_v4 = vmax.f32 %v4244_v6, %v4523_v2  ;;  %v4247_v5 = vpop.f32.mrb[28].mxu0 }
 0x4bf   : > { %v4764_v28 = vpack.c.bf16 %v4650_v32, %v4648_v3  ;;  %v4248_v19 = vadd.f32 %v4247_v5, %v6936_v43  ;;  %v4249_v55 = vpop.f32.mrb[29].mxu0 }
 0x4c0   : > { %v4250_v7 = vadd.f32 %v4249_v55, %v6939_v0  ;;  %v4251_v9 = vpop.f32.mrb[30].mxu0  ;;  %v4765_v26 = vpack.c.bf16 %v4651_v4, %v4649_v22 }
 0x4c1   : > { %v4524_v11 = vmul.f32 0.01, %v4248_v19  ;;  %v4252_v10 = vadd.f32 %v4251_v9, %v6936_v43  ;;  %v4253_v12 = vpop.f32.mrb[31].mxu0 }
 0x4c2   : > { %v4525_v13 = vmul.f32 0.01, %v4250_v7  ;;  %v4254_v50 = vadd.f32 %v4253_v12, %v6939_v0  ;;  %5031 = vmatprep.mubr.bf16.mxu1 %v4765_v26 }
 0x4c3   : > { %v4526_v57 = vmul.f32 0.01, %v4252_v10  ;;  %5000 = vmatmul.mubr.bf16.gmra.mrb[136].mxu0 %v6973_v40  ;;  %5032 = vmatmul.mubr.bf16.gmra.mrb[12].mxu1 %v4764_v28  ;;  %v4652_v52 = vmax.f32 %v4248_v19, %v4524_v11 }
 0x4c4   : > { %v4527_v14 = vmul.f32 0.01, %v4254_v50  ;;  %v4653_v16 = vmax.f32 %v4250_v7, %v4525_v13 }
 0x4c5   : > { %v4654_v15 = vmax.f32 %v4252_v10, %v4526_v57 }
 0x4c6   : > { %v4655_v17 = vmax.f32 %v4254_v50, %v4527_v14  ;;  %v4257_v20 = vpop.f32.mrb[32].mxu0 }
 0x4c7   : > { %v4766_v30 = vpack.c.bf16 %v4654_v15, %v4652_v52  ;;  %v4258_v27 = vadd.f32 %v4257_v20, %v6936_v43  ;;  %v4259_v29 = vpop.f32.mrb[33].mxu0 }
 0x4c8   : > { %v4260_v8 = vadd.f32 %v4259_v29, %v6939_v0  ;;  %v4261_v25 = vpop.f32.mrb[34].mxu0  ;;  %v4767_v33 = vpack.c.bf16 %v4655_v17, %v4653_v16 }
 0x4c9   : > { %v4528_v34 = vmul.f32 0.01, %v4258_v27  ;;  %v4262_v35 = vadd.f32 %v4261_v25, %v6936_v43  ;;  %v4263_v37 = vpop.f32.mrb[35].mxu0 }
 0x4ca   : > { %v4529_v40 = vmul.f32 0.01, %v4260_v8  ;;  %v4264_v38 = vadd.f32 %v4263_v37, %v6939_v0  ;;  %5039 = vmatprep.mubr.bf16.mxu1 %v4767_v33 }
 0x4cb   : > { %v4530_v39 = vmul.f32 0.01, %v4262_v35  ;;  %5040 = vmatmul.mubr.bf16.gmra.mrb[16].mxu1 %v4766_v30  ;;  %v4656_v42 = vmax.f32 %v4258_v27, %v4528_v34 }
 0x4cc   : > { %v4531_v41 = vmul.f32 0.01, %v4264_v38  ;;  %v4657_v44 = vmax.f32 %v4260_v8, %v4529_v40 }
 0x4cd   : > { %v4658_v49 = vmax.f32 %v4262_v35, %v4530_v39 }
 0x4ce   : > { %v4659_v45 = vmax.f32 %v4264_v38, %v4531_v41  ;;  %v4267_v46 = vpop.f32.mrb[36].mxu0 }
 0x4cf   : > { %v4768_v36 = vpack.c.bf16 %v4658_v49, %v4656_v42  ;;  %v4268_v47 = vadd.f32 %v4267_v46, %v6936_v43  ;;  %v4269_v48 = vpop.f32.mrb[37].mxu0 }
 0x4d0   : > { %v4270_v51 = vadd.f32 %v4269_v48, %v6939_v0  ;;  %v4271_v53 = vpop.f32.mrb[38].mxu0  ;;  %v4769_v31 = vpack.c.bf16 %v4659_v45, %v4657_v44 }
 0x4d1   : > { %v4532_v54 = vmul.f32 0.01, %v4268_v47  ;;  %v4272_v56 = vadd.f32 %v4271_v53, %v6936_v43  ;;  %v4273_v58 = vpop.f32.mrb[39].mxu0 }
 0x4d2   : > { %v4533_v21 = vmul.f32 0.01, %v4270_v51  ;;  %v4274_v59 = vadd.f32 %v4273_v58, %v6939_v0  ;;  %5047 = vmatprep.mubr.bf16.mxu1 %v4769_v31 }
 0x4d3   : > { %v4534_v60 = vmul.f32 0.01, %v4272_v56  ;;  %5048 = vmatmul.mubr.bf16.gmra.mrb[20].mxu1 %v4768_v36  ;;  %v4660_v61 = vmax.f32 %v4268_v47, %v4532_v54 }
 0x4d4   : > { %v4535_v23 = vmul.f32 0.01, %v4274_v59  ;;  %v4661_v18 = vmax.f32 %v4270_v51, %v4533_v21 }
 0x4d5   : > { %v4662_v24 = vmax.f32 %v4272_v56, %v4534_v60 }
 0x4d6   : > { %v4663_v62 = vmax.f32 %v4274_v59, %v4535_v23  ;;  %v4277_v63 = vpop.f32.mrb[40].mxu0 }
 0x4d7   : > { %v4770_v6 = vpack.c.bf16 %v4662_v24, %v4660_v61  ;;  %v4278_v1 = vadd.f32 %v4277_v63, %v6936_v43  ;;  %v4279_v2 = vpop.f32.mrb[41].mxu0 }
 0x4d8   : > { %v4280_v3 = vadd.f32 %v4279_v2, %v6939_v0  ;;  %v4281_v32 = vpop.f32.mrb[42].mxu0  ;;  %v4771_v22 = vpack.c.bf16 %v4663_v62, %v4661_v18 }
 0x4d9   : > { %v4536_v4 = vmul.f32 0.01, %v4278_v1  ;;  %v4282_v5 = vadd.f32 %v4281_v32, %v6936_v43  ;;  %v4283_v28 = vpop.f32.mrb[43].mxu0 }
 0x4da   : > { %v4537_v19 = vmul.f32 0.01, %v4280_v3  ;;  %v4284_v55 = vadd.f32 %v4283_v28, %v6939_v0  ;;  %5055 = vmatprep.mubr.bf16.mxu1 %v4771_v22 }
 0x4db   : > { %v4538_v7 = vmul.f32 0.01, %v4282_v5  ;;  %5056 = vmatmul.mubr.bf16.gmra.mrb[24].mxu1 %v4770_v6  ;;  %v4664_v26 = vmax.f32 %v4278_v1, %v4536_v4 }
 0x4dc   : > { %v4539_v9 = vmul.f32 0.01, %v4284_v55  ;;  %v4665_v10 = vmax.f32 %v4280_v3, %v4537_v19 }
 0x4dd   : > { %v4666_v11 = vmax.f32 %v4282_v5, %v4538_v7 }
 0x4de   : > { %v4667_v12 = vmax.f32 %v4284_v55, %v4539_v9  ;;  %v4287_v13 = vpop.f32.mrb[44].mxu0 }
 0x4df   : > { %v4772_v50 = vpack.c.bf16 %v4666_v11, %v4664_v26  ;;  %v4288_v57 = vadd.f32 %v4287_v13, %v6936_v43  ;;  %v4289_v14 = vpop.f32.mrb[45].mxu0 }
 0x4e0   : > { %v4290_v52 = vadd.f32 %v4289_v14, %v6939_v0  ;;  %v4291_v15 = vpop.f32.mrb[46].mxu0  ;;  %v4773_v16 = vpack.c.bf16 %v4667_v12, %v4665_v10 }
 0x4e1   : > { %v4540_v17 = vmul.f32 0.01, %v4288_v57  ;;  %v4292_v20 = vadd.f32 %v4291_v15, %v6936_v43  ;;  %v4293_v30 = vpop.f32.mrb[47].mxu0 }
 0x4e2   : > { %v4541_v27 = vmul.f32 0.01, %v4290_v52  ;;  %v4294_v29 = vadd.f32 %v4293_v30, %v6939_v0  ;;  %5063 = vmatprep.mubr.bf16.mxu1 %v4773_v16 }
 0x4e3   : > { %v4542_v8 = vmul.f32 0.01, %v4292_v20  ;;  %5064 = vmatmul.mubr.bf16.gmra.mrb[28].mxu1 %v4772_v50  ;;  %v4668_v33 = vmax.f32 %v4288_v57, %v4540_v17 }
 0x4e4   : > { %v4543_v25 = vmul.f32 0.01, %v4294_v29  ;;  %v4669_v35 = vmax.f32 %v4290_v52, %v4541_v27 }
 0x4e5   : > { %v4670_v34 = vmax.f32 %v4292_v20, %v4542_v8 }
 0x4e6   : > { %v4671_v37 = vmax.f32 %v4294_v29, %v4543_v25  ;;  %v4297_v40 = vpop.f32.mrb[48].mxu0 }
 0x4e7   : > { %v4774_v38 = vpack.c.bf16 %v4670_v34, %v4668_v33  ;;  %v4298_v39 = vadd.f32 %v4297_v40, %v6936_v43  ;;  %v4299_v41 = vpop.f32.mrb[49].mxu0 }
 0x4e8   : > { %v4300_v42 = vadd.f32 %v4299_v41, %v6939_v0  ;;  %v4301_v49 = vpop.f32.mrb[50].mxu0  ;;  %v4775_v44 = vpack.c.bf16 %v4671_v37, %v4669_v35 }
 0x4e9   : > { %v4544_v45 = vmul.f32 0.01, %v4298_v39  ;;  %v4302_v46 = vadd.f32 %v4301_v49, %v6936_v43  ;;  %v4303_v36 = vpop.f32.mrb[51].mxu0 }
 0x4ea   : > { %v4545_v47 = vmul.f32 0.01, %v4300_v42  ;;  %v4304_v48 = vadd.f32 %v4303_v36, %v6939_v0  ;;  %5071 = vmatprep.mubr.bf16.mxu1 %v4775_v44 }
 0x4eb   : > { %v4546_v51 = vmul.f32 0.01, %v4302_v46  ;;  %5072 = vmatmul.mubr.bf16.gmra.mrb[32].mxu1 %v4774_v38  ;;  %v4672_v31 = vmax.f32 %v4298_v39, %v4544_v45 }
 0x4ec   : > { %v4547_v53 = vmul.f32 0.01, %v4304_v48  ;;  %v4673_v56 = vmax.f32 %v4300_v42, %v4545_v47 }
 0x4ed   : > { %v4674_v54 = vmax.f32 %v4302_v46, %v4546_v51 }
 0x4ee   : > { %v4675_v58 = vmax.f32 %v4304_v48, %v4547_v53  ;;  %v4307_v21 = vpop.f32.mrb[52].mxu0 }
 0x4ef   : > { %v4776_v59 = vpack.c.bf16 %v4674_v54, %v4672_v31  ;;  %v4308_v60 = vadd.f32 %v4307_v21, %v6936_v43  ;;  %v4309_v23 = vpop.f32.mrb[53].mxu0 }
 0x4f0   : > { %v4310_v61 = vadd.f32 %v4309_v23, %v6939_v0  ;;  %v4311_v24 = vpop.f32.mrb[54].mxu0  ;;  %v4777_v18 = vpack.c.bf16 %v4675_v58, %v4673_v56 }
 0x4f1   : > { %v4548_v62 = vmul.f32 0.01, %v4308_v60  ;;  %v4312_v63 = vadd.f32 %v4311_v24, %v6936_v43  ;;  %v4313_v6 = vpop.f32.mrb[55].mxu0 }
 0x4f2   : > { %v4549_v1 = vmul.f32 0.01, %v4310_v61  ;;  %v4314_v2 = vadd.f32 %v4313_v6, %v6939_v0  ;;  %5079 = vmatprep.mubr.bf16.mxu1 %v4777_v18 }
 0x4f3   : > { %v4550_v3 = vmul.f32 0.01, %v4312_v63  ;;  %5080 = vmatmul.mubr.bf16.gmra.mrb[36].mxu1 %v4776_v59  ;;  %v4676_v22 = vmax.f32 %v4308_v60, %v4548_v62 }
 0x4f4   : > { %v4551_v32 = vmul.f32 0.01, %v4314_v2  ;;  %v4677_v5 = vmax.f32 %v4310_v61, %v4549_v1 }
 0x4f5   : > { %v4678_v4 = vmax.f32 %v4312_v63, %v4550_v3 }
 0x4f6   : > { %v4679_v28 = vmax.f32 %v4314_v2, %v4551_v32  ;;  %v4317_v19 = vpop.f32.mrb[56].mxu0 }
 0x4f7   : > { %v4778_v55 = vpack.c.bf16 %v4678_v4, %v4676_v22  ;;  %v4318_v7 = vadd.f32 %v4317_v19, %v6936_v43  ;;  %v4319_v9 = vpop.f32.mrb[57].mxu0 }
 0x4f8   : > { %v4320_v26 = vadd.f32 %v4319_v9, %v6939_v0  ;;  %v4321_v11 = vpop.f32.mrb[58].mxu0  ;;  %v4779_v10 = vpack.c.bf16 %v4679_v28, %v4677_v5 }
 0x4f9   : > { %v4552_v12 = vmul.f32 0.01, %v4318_v7  ;;  %v4322_v13 = vadd.f32 %v4321_v11, %v6936_v43  ;;  %v4323_v50 = vpop.f32.mrb[59].mxu0 }
 0x4fa   : > { %v4553_v57 = vmul.f32 0.01, %v4320_v26  ;;  %v4324_v14 = vadd.f32 %v4323_v50, %v6939_v0  ;;  %5087 = vmatprep.mubr.bf16.mxu1 %v4779_v10 }
 0x4fb   : > { %v4554_v52 = vmul.f32 0.01, %v4322_v13  ;;  %5088 = vmatmul.mubr.bf16.gmra.mrb[40].mxu1 %v4778_v55  ;;  %v4680_v16 = vmax.f32 %v4318_v7, %v4552_v12 }
 0x4fc   : > { %v4555_v15 = vmul.f32 0.01, %v4324_v14  ;;  %v4681_v20 = vmax.f32 %v4320_v26, %v4553_v57 }
 0x4fd   : > { %v4682_v17 = vmax.f32 %v4322_v13, %v4554_v52 }
 0x4fe   : > { %v4683_v30 = vmax.f32 %v4324_v14, %v4555_v15  ;;  %v4327_v27 = vpop.f32.mrb[60].mxu0 }
 0x4ff   : > { %v4780_v29 = vpack.c.bf16 %v4682_v17, %v4680_v16  ;;  %v4328_v8 = vadd.f32 %v4327_v27, %v6936_v43  ;;  %v4329_v25 = vpop.f32.mrb[61].mxu0 }
 0x500   : > { %v4330_v33 = vadd.f32 %v4329_v25, %v6939_v0  ;;  %v4331_v34 = vpop.f32.mrb[62].mxu0  ;;  %v4781_v35 = vpack.c.bf16 %v4683_v30, %v4681_v20 }
 0x501   : > { %v4556_v37 = vmul.f32 0.01, %v4328_v8  ;;  %v4332_v40 = vadd.f32 %v4331_v34, %v6936_v43  ;;  %v4333_v38 = vpop.f32.mrb[63].mxu0 }
 0x502   : > { %v4557_v39 = vmul.f32 0.01, %v4330_v33  ;;  %v4334_v41 = vadd.f32 %v4333_v38, %v6939_v0  ;;  %5095 = vmatprep.mubr.bf16.mxu1 %v4781_v35 }
 0x503   : > { %v4558_v42 = vmul.f32 0.01, %v4332_v40  ;;  %5096 = vmatmul.mubr.bf16.gmra.mrb[44].mxu1 %v4780_v29  ;;  %v4684_v44 = vmax.f32 %v4328_v8, %v4556_v37 }
 0x504   : > { %v4559_v49 = vmul.f32 0.01, %v4334_v41  ;;  %v4685_v46 = vmax.f32 %v4330_v33, %v4557_v39 }
 0x505   : > { %v4686_v45 = vmax.f32 %v4332_v40, %v4558_v42 }
 0x506   : > { %v4687_v36 = vmax.f32 %v4334_v41, %v4559_v49  ;;  %v4337_v47 = vpop.f32.mrb[64].mxu0 }
 0x507   : > { %v4782_v48 = vpack.c.bf16 %v4686_v45, %v4684_v44  ;;  %v4338_v51 = vadd.f32 %v4337_v47, %v6936_v43  ;;  %v4339_v53 = vpop.f32.mrb[65].mxu0 }
 0x508   : > { %v4340_v31 = vadd.f32 %v4339_v53, %v6939_v0  ;;  %v4341_v54 = vpop.f32.mrb[66].mxu0  ;;  %v4783_v56 = vpack.c.bf16 %v4687_v36, %v4685_v46 }
 0x509   : > { %v4560_v58 = vmul.f32 0.01, %v4338_v51  ;;  %v4342_v21 = vadd.f32 %v4341_v54, %v6936_v43  ;;  %v4343_v59 = vpop.f32.mrb[67].mxu0 }
 0x50a   : > { %v4561_v60 = vmul.f32 0.01, %v4340_v31  ;;  %v4344_v23 = vadd.f32 %v4343_v59, %v6939_v0  ;;  %5103 = vmatprep.mubr.bf16.mxu1 %v4783_v56 }
 0x50b   : > { %v4562_v61 = vmul.f32 0.01, %v4342_v21  ;;  %5104 = vmatmul.mubr.bf16.gmra.mrb[48].mxu1 %v4782_v48  ;;  %v4688_v18 = vmax.f32 %v4338_v51, %v4560_v58 }
 0x50c   : > { %v4563_v24 = vmul.f32 0.01, %v4344_v23  ;;  %v4689_v63 = vmax.f32 %v4340_v31, %v4561_v60 }
 0x50d   : > { %v4690_v62 = vmax.f32 %v4342_v21, %v4562_v61 }
 0x50e   : > { %v4691_v6 = vmax.f32 %v4344_v23, %v4563_v24  ;;  %v4347_v1 = vpop.f32.mrb[68].mxu0 }
 0x50f   : > { %v4784_v2 = vpack.c.bf16 %v4690_v62, %v4688_v18  ;;  %v4348_v3 = vadd.f32 %v4347_v1, %v6936_v43  ;;  %v4349_v32 = vpop.f32.mrb[69].mxu0 }
 0x510   : > { %v4350_v22 = vadd.f32 %v4349_v32, %v6939_v0  ;;  %v4351_v4 = vpop.f32.mrb[70].mxu0  ;;  %v4785_v5 = vpack.c.bf16 %v4691_v6, %v4689_v63 }
 0x511   : > { %v4564_v28 = vmul.f32 0.01, %v4348_v3  ;;  %v4352_v19 = vadd.f32 %v4351_v4, %v6936_v43  ;;  %v4353_v55 = vpop.f32.mrb[71].mxu0 }
 0x512   : > { %v4565_v7 = vmul.f32 0.01, %v4350_v22  ;;  %v4354_v9 = vadd.f32 %v4353_v55, %v6939_v0  ;;  %5111 = vmatprep.mubr.bf16.mxu1 %v4785_v5 }
 0x513   : > { %v4566_v26 = vmul.f32 0.01, %v4352_v19  ;;  %5112 = vmatmul.mubr.bf16.gmra.mrb[52].mxu1 %v4784_v2  ;;  %v4692_v10 = vmax.f32 %v4348_v3, %v4564_v28 }
 0x514   : > { %v4567_v11 = vmul.f32 0.01, %v4354_v9  ;;  %v4693_v13 = vmax.f32 %v4350_v22, %v4565_v7 }
 0x515   : > { %v4694_v12 = vmax.f32 %v4352_v19, %v4566_v26 }
 0x516   : > { %v4695_v50 = vmax.f32 %v4354_v9, %v4567_v11  ;;  %v4357_v57 = vpop.f32.mrb[72].mxu0 }
 0x517   : > { %v4786_v14 = vpack.c.bf16 %v4694_v12, %v4692_v10  ;;  %v4358_v52 = vadd.f32 %v4357_v57, %v6936_v43  ;;  %v4359_v15 = vpop.f32.mrb[73].mxu0 }
 0x518   : > { %v4360_v16 = vadd.f32 %v4359_v15, %v6939_v0  ;;  %v4361_v17 = vpop.f32.mrb[74].mxu0  ;;  %v4787_v20 = vpack.c.bf16 %v4695_v50, %v4693_v13 }
 0x519   : > { %v4568_v30 = vmul.f32 0.01, %v4358_v52  ;;  %v4362_v27 = vadd.f32 %v4361_v17, %v6936_v43  ;;  %v4363_v29 = vpop.f32.mrb[75].mxu0 }
 0x51a   : > { %v4569_v8 = vmul.f32 0.01, %v4360_v16  ;;  %v4364_v25 = vadd.f32 %v4363_v29, %v6939_v0  ;;  %5119 = vmatprep.mubr.bf16.mxu1 %v4787_v20 }
 0x51b   : > { %v4570_v33 = vmul.f32 0.01, %v4362_v27  ;;  %5120 = vmatmul.mubr.bf16.gmra.mrb[56].mxu1 %v4786_v14  ;;  %v4696_v35 = vmax.f32 %v4358_v52, %v4568_v30 }
 0x51c   : > { %v4571_v34 = vmul.f32 0.01, %v4364_v25  ;;  %v4697_v40 = vmax.f32 %v4360_v16, %v4569_v8 }
 0x51d   : > { %v4698_v37 = vmax.f32 %v4362_v27, %v4570_v33 }
 0x51e   : > { %v4699_v38 = vmax.f32 %v4364_v25, %v4571_v34  ;;  %v4367_v39 = vpop.f32.mrb[76].mxu0 }
 0x51f   : > { %v4788_v41 = vpack.c.bf16 %v4698_v37, %v4696_v35  ;;  %v4368_v42 = vadd.f32 %v4367_v39, %v6936_v43  ;;  %v4369_v49 = vpop.f32.mrb[77].mxu0 }
 0x520   : > { %v4370_v44 = vadd.f32 %v4369_v49, %v6939_v0  ;;  %v4371_v45 = vpop.f32.mrb[78].mxu0  ;;  %v4789_v46 = vpack.c.bf16 %v4699_v38, %v4697_v40 }
 0x521   : > { %v4572_v36 = vmul.f32 0.01, %v4368_v42  ;;  %v4372_v47 = vadd.f32 %v4371_v45, %v6936_v43  ;;  %v4373_v48 = vpop.f32.mrb[79].mxu0 }
 0x522   : > { %v4573_v51 = vmul.f32 0.01, %v4370_v44  ;;  %v4374_v53 = vadd.f32 %v4373_v48, %v6939_v0  ;;  %5127 = vmatprep.mubr.bf16.mxu1 %v4789_v46 }
 0x523   : > { %v4574_v31 = vmul.f32 0.01, %v4372_v47  ;;  %5128 = vmatmul.mubr.bf16.gmra.mrb[60].mxu1 %v4788_v41  ;;  %v4700_v56 = vmax.f32 %v4368_v42, %v4572_v36 }
 0x524   : > { %v4575_v54 = vmul.f32 0.01, %v4374_v53  ;;  %v4701_v21 = vmax.f32 %v4370_v44, %v4573_v51 }
 0x525   : > { %v4702_v58 = vmax.f32 %v4372_v47, %v4574_v31 }
 0x526   : > { %v4703_v59 = vmax.f32 %v4374_v53, %v4575_v54  ;;  %v4377_v60 = vpop.f32.mrb[80].mxu0 }
 0x527   : > { %v4790_v23 = vpack.c.bf16 %v4702_v58, %v4700_v56  ;;  %v4378_v61 = vadd.f32 %v4377_v60, %v6936_v43  ;;  %v4379_v24 = vpop.f32.mrb[81].mxu0 }
 0x528   : > { %v4380_v18 = vadd.f32 %v4379_v24, %v6939_v0  ;;  %v4381_v62 = vpop.f32.mrb[82].mxu0  ;;  %v4791_v63 = vpack.c.bf16 %v4703_v59, %v4701_v21 }
 0x529   : > { %v4576_v6 = vmul.f32 0.01, %v4378_v61  ;;  %v4382_v1 = vadd.f32 %v4381_v62, %v6936_v43  ;;  %v4383_v2 = vpop.f32.mrb[83].mxu0 }
 0x52a   : > { %v4577_v3 = vmul.f32 0.01, %v4380_v18  ;;  %v4384_v32 = vadd.f32 %v4383_v2, %v6939_v0  ;;  %5135 = vmatprep.mubr.bf16.mxu1 %v4791_v63 }
 0x52b   : > { %v4578_v22 = vmul.f32 0.01, %v4382_v1  ;;  %5136 = vmatmul.mubr.bf16.gmra.mrb[64].mxu1 %v4790_v23  ;;  %v4704_v5 = vmax.f32 %v4378_v61, %v4576_v6 }
 0x52c   : > { %v4579_v4 = vmul.f32 0.01, %v4384_v32  ;;  %v4705_v19 = vmax.f32 %v4380_v18, %v4577_v3 }
 0x52d   : > { %v4706_v28 = vmax.f32 %v4382_v1, %v4578_v22 }
 0x52e   : > { %v4707_v55 = vmax.f32 %v4384_v32, %v4579_v4  ;;  %v4387_v7 = vpop.f32.mrb[84].mxu0 }
 0x52f   : > { %v4792_v9 = vpack.c.bf16 %v4706_v28, %v4704_v5  ;;  %v4388_v26 = vadd.f32 %v4387_v7, %v6936_v43  ;;  %v4389_v11 = vpop.f32.mrb[85].mxu0 }
 0x530   : > { %v4390_v10 = vadd.f32 %v4389_v11, %v6939_v0  ;;  %v4391_v12 = vpop.f32.mrb[86].mxu0  ;;  %v4793_v13 = vpack.c.bf16 %v4707_v55, %v4705_v19 }
 0x531   : > { %v4580_v50 = vmul.f32 0.01, %v4388_v26  ;;  %v4392_v57 = vadd.f32 %v4391_v12, %v6936_v43  ;;  %v4393_v14 = vpop.f32.mrb[87].mxu0 }
 0x532   : > { %v4581_v52 = vmul.f32 0.01, %v4390_v10  ;;  %v4394_v15 = vadd.f32 %v4393_v14, %v6939_v0  ;;  %5143 = vmatprep.mubr.bf16.mxu1 %v4793_v13 }
 0x533   : > { %v4582_v16 = vmul.f32 0.01, %v4392_v57  ;;  %5144 = vmatmul.mubr.bf16.gmra.mrb[68].mxu1 %v4792_v9  ;;  %v4708_v20 = vmax.f32 %v4388_v26, %v4580_v50 }
 0x534   : > { %v4583_v17 = vmul.f32 0.01, %v4394_v15  ;;  %v4709_v27 = vmax.f32 %v4390_v10, %v4581_v52 }
 0x535   : > { %v4710_v30 = vmax.f32 %v4392_v57, %v4582_v16 }
 0x536   : > { %v4711_v29 = vmax.f32 %v4394_v15, %v4583_v17  ;;  %v4397_v8 = vpop.f32.mrb[88].mxu0 }
 0x537   : > { %v4794_v25 = vpack.c.bf16 %v4710_v30, %v4708_v20  ;;  %v4398_v33 = vadd.f32 %v4397_v8, %v6936_v43  ;;  %v4399_v34 = vpop.f32.mrb[89].mxu0 }
 0x538   : > { %v4400_v35 = vadd.f32 %v4399_v34, %v6939_v0  ;;  %v4401_v37 = vpop.f32.mrb[90].mxu0  ;;  %v4795_v40 = vpack.c.bf16 %v4711_v29, %v4709_v27 }
 0x539   : > { %v4584_v38 = vmul.f32 0.01, %v4398_v33  ;;  %v4402_v39 = vadd.f32 %v4401_v37, %v6936_v43  ;;  %v4403_v41 = vpop.f32.mrb[91].mxu0 }
 0x53a   : > { %v4585_v42 = vmul.f32 0.01, %v4400_v35  ;;  %v4404_v49 = vadd.f32 %v4403_v41, %v6939_v0  ;;  %5151 = vmatprep.mubr.bf16.mxu1 %v4795_v40 }
 0x53b   : > { %v4586_v44 = vmul.f32 0.01, %v4402_v39  ;;  %5152 = vmatmul.mubr.bf16.gmra.mrb[72].mxu1 %v4794_v25  ;;  %v4712_v46 = vmax.f32 %v4398_v33, %v4584_v38 }
 0x53c   : > { %v4587_v45 = vmul.f32 0.01, %v4404_v49  ;;  %v4713_v47 = vmax.f32 %v4400_v35, %v4585_v42 }
 0x53d   : > { %v4714_v36 = vmax.f32 %v4402_v39, %v4586_v44 }
 0x53e   : > { %v4715_v48 = vmax.f32 %v4404_v49, %v4587_v45  ;;  %v4407_v51 = vpop.f32.mrb[92].mxu0 }
 0x53f   : > { %v4796_v53 = vpack.c.bf16 %v4714_v36, %v4712_v46  ;;  %v4408_v31 = vadd.f32 %v4407_v51, %v6936_v43  ;;  %v4409_v54 = vpop.f32.mrb[93].mxu0 }
 0x540   : > { %v4410_v56 = vadd.f32 %v4409_v54, %v6939_v0  ;;  %v4411_v58 = vpop.f32.mrb[94].mxu0  ;;  %v4797_v21 = vpack.c.bf16 %v4715_v48, %v4713_v47 }
 0x541   : > { %v4588_v59 = vmul.f32 0.01, %v4408_v31  ;;  %v4412_v60 = vadd.f32 %v4411_v58, %v6936_v43  ;;  %v4413_v23 = vpop.f32.mrb[95].mxu0 }
 0x542   : > { %v4589_v61 = vmul.f32 0.01, %v4410_v56  ;;  %v4414_v24 = vadd.f32 %v4413_v23, %v6939_v0  ;;  %5159 = vmatprep.mubr.bf16.mxu1 %v4797_v21 }
 0x543   : > { %v4590_v18 = vmul.f32 0.01, %v4412_v60  ;;  %5160 = vmatmul.mubr.bf16.gmra.mrb[76].mxu1 %v4796_v53  ;;  %v4716_v63 = vmax.f32 %v4408_v31, %v4588_v59 }
 0x544   : > { %v4591_v62 = vmul.f32 0.01, %v4414_v24  ;;  %v4717_v1 = vmax.f32 %v4410_v56, %v4589_v61 }
 0x545   : > { %v4718_v6 = vmax.f32 %v4412_v60, %v4590_v18 }
 0x546   : > { %v4719_v2 = vmax.f32 %v4414_v24, %v4591_v62  ;;  %v4417_v3 = vpop.f32.mrb[96].mxu0 }
 0x547   : > { %v4798_v32 = vpack.c.bf16 %v4718_v6, %v4716_v63  ;;  %v4418_v22 = vadd.f32 %v4417_v3, %v6936_v43  ;;  %v4419_v4 = vpop.f32.mrb[97].mxu0 }
 0x548   : > { %v4420_v5 = vadd.f32 %v4419_v4, %v6939_v0  ;;  %v4421_v28 = vpop.f32.mrb[98].mxu0  ;;  %v4799_v19 = vpack.c.bf16 %v4719_v2, %v4717_v1 }
 0x549   : > { %v4592_v55 = vmul.f32 0.01, %v4418_v22  ;;  %v4422_v7 = vadd.f32 %v4421_v28, %v6936_v43  ;;  %v4423_v9 = vpop.f32.mrb[99].mxu0 }
 0x54a   : > { %v4593_v26 = vmul.f32 0.01, %v4420_v5  ;;  %v4424_v11 = vadd.f32 %v4423_v9, %v6939_v0  ;;  %5167 = vmatprep.mubr.bf16.mxu1 %v4799_v19 }
 0x54b   : > { %v4594_v10 = vmul.f32 0.01, %v4422_v7  ;;  %5168 = vmatmul.mubr.bf16.gmra.mrb[80].mxu1 %v4798_v32  ;;  %v4720_v13 = vmax.f32 %v4418_v22, %v4592_v55 }
 0x54c   : > { %v4595_v12 = vmul.f32 0.01, %v4424_v11  ;;  %v4721_v57 = vmax.f32 %v4420_v5, %v4593_v26 }
 0x54d   : > { %v4722_v50 = vmax.f32 %v4422_v7, %v4594_v10 }
 0x54e   : > { %v4723_v14 = vmax.f32 %v4424_v11, %v4595_v12  ;;  %v4427_v52 = vpop.f32.mrb[100].mxu0 }
 0x54f   : > { %v4800_v15 = vpack.c.bf16 %v4722_v50, %v4720_v13  ;;  %v4428_v16 = vadd.f32 %v4427_v52, %v6936_v43  ;;  %v4429_v17 = vpop.f32.mrb[101].mxu0 }
 0x550   : > { %v4430_v20 = vadd.f32 %v4429_v17, %v6939_v0  ;;  %v4431_v30 = vpop.f32.mrb[102].mxu0  ;;  %v4801_v27 = vpack.c.bf16 %v4723_v14, %v4721_v57 }
 0x551   : > { %v4596_v29 = vmul.f32 0.01, %v4428_v16  ;;  %v4432_v8 = vadd.f32 %v4431_v30, %v6936_v43  ;;  %v4433_v25 = vpop.f32.mrb[103].mxu0 }
 0x552   : > { %v4597_v33 = vmul.f32 0.01, %v4430_v20  ;;  %v4434_v34 = vadd.f32 %v4433_v25, %v6939_v0  ;;  %5175 = vmatprep.mubr.bf16.mxu1 %v4801_v27 }
 0x553   : > { %v4598_v35 = vmul.f32 0.01, %v4432_v8  ;;  %5176 = vmatmul.mubr.bf16.gmra.mrb[84].mxu1 %v4800_v15  ;;  %v4724_v40 = vmax.f32 %v4428_v16, %v4596_v29 }
 0x554   : > { %v4599_v37 = vmul.f32 0.01, %v4434_v34  ;;  %v4725_v39 = vmax.f32 %v4430_v20, %v4597_v33 }
 0x555   : > { %v4726_v38 = vmax.f32 %v4432_v8, %v4598_v35 }
 0x556   : > { %v4727_v41 = vmax.f32 %v4434_v34, %v4599_v37  ;;  %v4437_v42 = vpop.f32.mrb[104].mxu0 }
 0x557   : > { %v4802_v49 = vpack.c.bf16 %v4726_v38, %v4724_v40  ;;  %v4438_v44 = vadd.f32 %v4437_v42, %v6936_v43  ;;  %v4439_v45 = vpop.f32.mrb[105].mxu0 }
 0x558   : > { %v4440_v46 = vadd.f32 %v4439_v45, %v6939_v0  ;;  %v4441_v36 = vpop.f32.mrb[106].mxu0  ;;  %v4803_v47 = vpack.c.bf16 %v4727_v41, %v4725_v39 }
 0x559   : > { %v4600_v48 = vmul.f32 0.01, %v4438_v44  ;;  %v4442_v51 = vadd.f32 %v4441_v36, %v6936_v43  ;;  %v4443_v53 = vpop.f32.mrb[107].mxu0 }
 0x55a   : > { %v4601_v31 = vmul.f32 0.01, %v4440_v46  ;;  %v4444_v54 = vadd.f32 %v4443_v53, %v6939_v0  ;;  %5183 = vmatprep.mubr.bf16.mxu1 %v4803_v47 }
 0x55b   : > { %v4602_v56 = vmul.f32 0.01, %v4442_v51  ;;  %5184 = vmatmul.mubr.bf16.gmra.mrb[88].mxu1 %v4802_v49  ;;  %v4728_v21 = vmax.f32 %v4438_v44, %v4600_v48 }
 0x55c   : > { %v4603_v58 = vmul.f32 0.01, %v4444_v54  ;;  %v4729_v60 = vmax.f32 %v4440_v46, %v4601_v31 }
 0x55d   : > { %v4730_v59 = vmax.f32 %v4442_v51, %v4602_v56 }
 0x55e   : > { %v4731_v23 = vmax.f32 %v4444_v54, %v4603_v58  ;;  %v4447_v61 = vpop.f32.mrb[108].mxu0 }
 0x55f   : > { %v4804_v24 = vpack.c.bf16 %v4730_v59, %v4728_v21  ;;  %v4448_v18 = vadd.f32 %v4447_v61, %v6936_v43  ;;  %v4449_v62 = vpop.f32.mrb[109].mxu0 }
 0x560   : > { %v4450_v63 = vadd.f32 %v4449_v62, %v6939_v0  ;;  %v4451_v6 = vpop.f32.mrb[110].mxu0  ;;  %v4805_v1 = vpack.c.bf16 %v4731_v23, %v4729_v60 }
 0x561   : > { %v4604_v2 = vmul.f32 0.01, %v4448_v18  ;;  %v4452_v3 = vadd.f32 %v4451_v6, %v6936_v43  ;;  %v4453_v32 = vpop.f32.mrb[111].mxu0 }
 0x562   : > { %v4605_v22 = vmul.f32 0.01, %v4450_v63  ;;  %v4454_v4 = vadd.f32 %v4453_v32, %v6939_v0  ;;  %5191 = vmatprep.mubr.bf16.mxu1 %v4805_v1  ;;  %v7102_v1 = vld [vmem:[%s7314_s5] ss:$0 sm:$0xff] }
 0x563   : > { %v4606_v5 = vmul.f32 0.01, %v4452_v3  ;;  %5192 = vmatmul.mubr.bf16.gmra.mrb[92].mxu1 %v4804_v24  ;;  %v4732_v19 = vmax.f32 %v4448_v18, %v4604_v2 }
 0x564   : > { %v4607_v28 = vmul.f32 0.01, %v4454_v4  ;;  %v4733_v7 = vmax.f32 %v4450_v63, %v4605_v22 }
 0x565   : > { %v4734_v55 = vmax.f32 %v4452_v3, %v4606_v5 }
 0x566   : > { %v4735_v9 = vmax.f32 %v4454_v4, %v4607_v28  ;;  %v4457_v26 = vpop.f32.mrb[112].mxu0 }
 0x567   : > { %v4806_v11 = vpack.c.bf16 %v4734_v55, %v4732_v19  ;;  %v4458_v10 = vadd.f32 %v4457_v26, %v6936_v43  ;;  %v4459_v12 = vpop.f32.mrb[113].mxu0 }
 0x568   : > { %v4460_v13 = vadd.f32 %v4459_v12, %v6939_v0  ;;  %v4461_v50 = vpop.f32.mrb[114].mxu0  ;;  %v4807_v57 = vpack.c.bf16 %v4735_v9, %v4733_v7 }
 0x569   : > { %v4608_v14 = vmul.f32 0.01, %v4458_v10  ;;  %v4462_v52 = vadd.f32 %v4461_v50, %v6936_v43  ;;  %v4463_v15 = vpop.f32.mrb[115].mxu0 }
 0x56a   : > { %v4609_v16 = vmul.f32 0.01, %v4460_v13  ;;  %v4464_v17 = vadd.f32 %v4463_v15, %v6939_v0  ;;  %5199 = vmatprep.mubr.bf16.mxu1 %v4807_v57 }
 0x56b   : > { %v4610_v20 = vmul.f32 0.01, %v4462_v52  ;;  %5200 = vmatmul.mubr.bf16.gmra.mrb[96].mxu1 %v4806_v11  ;;  %v4736_v27 = vmax.f32 %v4458_v10, %v4608_v14 }
 0x56c   : > { %v4611_v30 = vmul.f32 0.01, %v4464_v17  ;;  %v4737_v8 = vmax.f32 %v4460_v13, %v4609_v16 }
 0x56d   : > { %v4738_v29 = vmax.f32 %v4462_v52, %v4610_v20 }
 0x56e   : > { %v4739_v25 = vmax.f32 %v4464_v17, %v4611_v30  ;;  %v4467_v33 = vpop.f32.mrb[116].mxu0 }
 0x56f   : > { %v4808_v34 = vpack.c.bf16 %v4738_v29, %v4736_v27  ;;  %v4468_v35 = vadd.f32 %v4467_v33, %v6936_v43  ;;  %v4469_v37 = vpop.f32.mrb[117].mxu0 }
 0x570   : > { %v4470_v40 = vadd.f32 %v4469_v37, %v6939_v0  ;;  %v4471_v38 = vpop.f32.mrb[118].mxu0  ;;  %v4809_v39 = vpack.c.bf16 %v4739_v25, %v4737_v8 }
 0x571   : > { %v4612_v41 = vmul.f32 0.01, %v4468_v35  ;;  %v4472_v42 = vadd.f32 %v4471_v38, %v6936_v43  ;;  %v4473_v49 = vpop.f32.mrb[119].mxu0 }
 0x572   : > { %v4613_v44 = vmul.f32 0.01, %v4470_v40  ;;  %v4474_v45 = vadd.f32 %v4473_v49, %v6939_v0  ;;  %5207 = vmatprep.mubr.bf16.mxu1 %v4809_v39 }
 0x573   : > { %v4614_v46 = vmul.f32 0.01, %v4472_v42  ;;  %5208 = vmatmul.mubr.bf16.gmra.mrb[100].mxu1 %v4808_v34  ;;  %v4740_v47 = vmax.f32 %v4468_v35, %v4612_v41 }
 0x574   : > { %v4615_v36 = vmul.f32 0.01, %v4474_v45  ;;  %v4741_v51 = vmax.f32 %v4470_v40, %v4613_v44 }
 0x575   : > { %v4742_v48 = vmax.f32 %v4472_v42, %v4614_v46 }
 0x576   : > { %v4743_v53 = vmax.f32 %v4474_v45, %v4615_v36  ;;  %v4477_v31 = vpop.f32.mrb[120].mxu0 }
 0x577   : > { %v4810_v54 = vpack.c.bf16 %v4742_v48, %v4740_v47  ;;  %v4478_v56 = vadd.f32 %v4477_v31, %v6936_v43  ;;  %v4479_v58 = vpop.f32.mrb[121].mxu0 }
 0x578   : > { %v4480_v21 = vadd.f32 %v4479_v58, %v6939_v0  ;;  %v4481_v59 = vpop.f32.mrb[122].mxu0  ;;  %v4811_v60 = vpack.c.bf16 %v4743_v53, %v4741_v51 }
 0x579   : > { %v4616_v23 = vmul.f32 0.01, %v4478_v56  ;;  %v4482_v61 = vadd.f32 %v4481_v59, %v6936_v43  ;;  %v4483_v24 = vpop.f32.mrb[123].mxu0 }
 0x57a   : > { %v4617_v18 = vmul.f32 0.01, %v4480_v21  ;;  %v4484_v62 = vadd.f32 %v4483_v24, %v6939_v0  ;;  %5215 = vmatprep.mubr.bf16.mxu1 %v4811_v60 }
 0x57b   : > { %v4618_v63 = vmul.f32 0.01, %v4482_v61  ;;  %5216 = vmatmul.mubr.bf16.gmra.mrb[104].mxu1 %v4810_v54  ;;  %v4744_v2 = vmax.f32 %v4478_v56, %v4616_v23 }
 0x57c   : > { %v4619_v6 = vmul.f32 0.01, %v4484_v62  ;;  %v4745_v32 = vmax.f32 %v4480_v21, %v4617_v18 }
 0x57d   : > { %v4746_v3 = vmax.f32 %v4482_v61, %v4618_v63 }
 0x57e   : > { %v4747_v22 = vmax.f32 %v4484_v62, %v4619_v6  ;;  %v4487_v4 = vpop.f32.mrb[124].mxu0  ;;  %v5009_v5 = vpop.f32.mrb[0].mxu1 }
 0x57f   : > { %v4812_v28 = vpack.c.bf16 %v4746_v3, %v4744_v2  ;;  %v4488_v19 = vadd.f32 %v4487_v4, %v6936_v43  ;;  %v5010_v55 = vadd.f32 %v7102_v1, %v5009_v5  ;;  %v4489_v7 = vpop.f32.mrb[125].mxu0  ;;  %v5011_v9 = vpop.f32.mrb[1].mxu1 }
 0x580   : > { %v4490_v26 = vadd.f32 %v4489_v7, %v6939_v0  ;;  %v4491_v11 = vpop.f32.mrb[126].mxu0  ;;  %v5012_v10 = vpop.f32.mrb[2].mxu1  ;;  %v4813_v12 = vpack.c.bf16 %v4747_v22, %v4745_v32 }
 0x581   : > { %v4620_v13 = vmul.f32 0.01, %v4488_v19  ;;  %v5246_v50 = vmul.f32 0.01, %v5010_v55  ;;  %v4492_v57 = vadd.f32 %v4491_v11, %v6936_v43  ;;  %v5013_v14 = vadd.f32 %v7102_v1, %v5012_v10  ;;  %v4493_v52 = vpop.f32.mrb[127].mxu0  ;;  %v5014_v15 = vpop.f32.mrb[3].mxu1 }
 0x582   : > { %v4621_v16 = vmul.f32 0.01, %v4490_v26  ;;  %v4494_v17 = vadd.f32 %v4493_v52, %v6939_v0  ;;  %5223 = vmatprep.mubr.bf16.mxu1 %v4813_v12 }
 0x583   : > { %v5310_v20 = vmax.f32 %v5010_v55, %v5246_v50  ;;  %v4622_v30 = vmul.f32 0.01, %v4492_v57  ;;  %v5247_v27 = vmul.f32 0.01, %v5013_v14  ;;  %5224 = vmatmul.mubr.bf16.gmra.mrb[108].mxu1 %v4812_v28  ;;  %v4748_v29 = vmax.f32 %v4488_v19, %v4620_v13 }
 0x584   : > { %v4623_v43 = vmul.f32 0.01, %v4494_v17  ;;  %v4749_v33 = vmax.f32 %v4490_v26, %v4621_v16 }
 0x585   : > { %5375 = vst.msk [vmem:[%s7113_s16 + $0x30] sm:$0xff] %vm5368_vm1, %v5310_v20  ;;  %v4750_v8 = vmax.f32 %v4492_v57, %v4622_v30  ;;  %v5311_v25 = vmax.f32 %v5013_v14, %v5247_v27 }
 0x586   : > { %v4751_v34 = vmax.f32 %v4494_v17, %v4623_v43  ;;  %v4985_v35 = vpop.f32.mrb[128].mxu0  ;;  %v5017_v37 = vpop.f32.mrb[4].mxu1 }
 0x587   : > { %v4814_v40 = vpack.c.bf16 %v4750_v8, %v4748_v29  ;;  %5376 = vst.msk [vmem:[%s7113_s16 + $0x38] sm:$0xff] %vm5368_vm1, %v5311_v25  ;;  %v4986_v0 = vadd.f32 %v7102_v1, %v4985_v35  ;;  %v5018_v38 = vadd.f32 %v7102_v1, %v5017_v37  ;;  %v4987_v39 = vpop.f32.mrb[129].mxu0  ;;  %v5019_v41 = vpop.f32.mrb[5].mxu1 }
 0x588   : > { %v4988_v42 = vpop.f32.mrb[130].mxu0  ;;  %v5020_v49 = vpop.f32.mrb[6].mxu1  ;;  %v4815_v44 = vpack.c.bf16 %v4751_v34, %v4749_v33 }
 0x589   : > { %v5240_v45 = vmul.f32 0.01, %v4986_v0  ;;  %v5248_v46 = vmul.f32 0.01, %v5018_v38  ;;  %v4989_v36 = vadd.f32 %v7102_v1, %v4988_v42  ;;  %v5021_v47 = vadd.f32 %v7102_v1, %v5020_v49  ;;  %v4990_v48 = vpop.f32.mrb[131].mxu0  ;;  %v5022_v51 = vpop.f32.mrb[7].mxu1 }
 0x58a   : > { %5231 = vmatprep.mubr.bf16.mxu1 %v4815_v44 }
 0x58b   : > { %v5304_v53 = vmax.f32 %v4986_v0, %v5240_v45  ;;  %v5312_v31 = vmax.f32 %v5018_v38, %v5248_v46  ;;  %v5241_v54 = vmul.f32 0.01, %v4989_v36  ;;  %v5249_v56 = vmul.f32 0.01, %v5021_v47  ;;  %5232 = vmatmul.mubr.bf16.gmra.mrb[112].mxu1 %v4814_v40 }
 0x58d   : > { %5369 = vst.msk [vmem:[%s7113_s16] sm:$0xff] %vm5368_vm1, %v5304_v53  ;;  %5377 = vst.msk [vmem:[%s7113_s16 + $0x40] sm:$0xff] %vm5368_vm1, %v5312_v31  ;;  %v5305_v58 = vmax.f32 %v4989_v36, %v5241_v54  ;;  %v5313_v21 = vmax.f32 %v5021_v47, %v5249_v56 }
 0x58e   : > { %v4993_v59 = vpop.f32.mrb[132].mxu0  ;;  %v5025_v60 = vpop.f32.mrb[8].mxu1 }
 0x58f   : > { %5370 = vst.msk [vmem:[%s7113_s16 + $0x8] sm:$0xff] %vm5368_vm1, %v5305_v58  ;;  %5378 = vst.msk [vmem:[%s7113_s16 + $0x48] sm:$0xff] %vm5368_vm1, %v5313_v21  ;;  %v4994_v23 = vadd.f32 %v7102_v1, %v4993_v59  ;;  %v5026_v61 = vadd.f32 %v7102_v1, %v5025_v60  ;;  %v4995_v24 = vpop.f32.mrb[133].mxu0  ;;  %v5027_v18 = vpop.f32.mrb[9].mxu1 }
 0x590   : > { %v4996_v62 = vpop.f32.mrb[134].mxu0  ;;  %v5028_v63 = vpop.f32.mrb[10].mxu1 }
 0x591   : > { %v5242_v6 = vmul.f32 0.01, %v4994_v23  ;;  %v5250_v2 = vmul.f32 0.01, %v5026_v61  ;;  %v4997_v3 = vadd.f32 %v7102_v1, %v4996_v62  ;;  %v5029_v32 = vadd.f32 %v7102_v1, %v5028_v63  ;;  %v4998_v22 = vpop.f32.mrb[135].mxu0  ;;  %v5030_v4 = vpop.f32.mrb[11].mxu1 }
 0x593   : > { %v5306_v5 = vmax.f32 %v4994_v23, %v5242_v6  ;;  %v5314_v28 = vmax.f32 %v5026_v61, %v5250_v2  ;;  %v5243_v19 = vmul.f32 0.01, %v4997_v3  ;;  %v5251_v55 = vmul.f32 0.01, %v5029_v32 }
 0x595   : > { %5371 = vst.msk [vmem:[%s7113_s16 + $0x10] sm:$0xff] %vm5368_vm1, %v5306_v5  ;;  %5379 = vst.msk [vmem:[%s7113_s16 + $0x50] sm:$0xff] %vm5368_vm1, %v5314_v28  ;;  %v5307_v7 = vmax.f32 %v4997_v3, %v5243_v19  ;;  %v5315_v9 = vmax.f32 %v5029_v32, %v5251_v55 }
 0x596   : > { %v5001_v26 = vpop.f32.mrb[136].mxu0  ;;  %v5033_v11 = vpop.f32.mrb[12].mxu1 }
 0x597   : > { %5372 = vst.msk [vmem:[%s7113_s16 + $0x18] sm:$0xff] %vm5368_vm1, %v5307_v7  ;;  %5380 = vst.msk [vmem:[%s7113_s16 + $0x58] sm:$0xff] %vm5368_vm1, %v5315_v9  ;;  %v5002_v10 = vadd.f32 %v7102_v1, %v5001_v26  ;;  %v5034_v12 = vadd.f32 %v7102_v1, %v5033_v11  ;;  %v5003_v13 = vpop.f32.mrb[137].mxu0  ;;  %v5035_v50 = vpop.f32.mrb[13].mxu1 }
 0x598   : > { %v5004_v57 = vpop.f32.mrb[138].mxu0  ;;  %v5036_v14 = vpop.f32.mrb[14].mxu1 }
 0x599   : > { %v5244_v52 = vmul.f32 0.01, %v5002_v10  ;;  %v5252_v15 = vmul.f32 0.01, %v5034_v12  ;;  %v5005_v16 = vadd.f32 %v7102_v1, %v5004_v57  ;;  %v5037_v17 = vadd.f32 %v7102_v1, %v5036_v14  ;;  %v5006_v20 = vpop.f32.mrb[139].mxu0  ;;  %v5038_v30 = vpop.f32.mrb[15].mxu1 }
 0x59b   : > { %v5308_v27 = vmax.f32 %v5002_v10, %v5244_v52  ;;  %v5316_v43 = vmax.f32 %v5034_v12, %v5252_v15  ;;  %v5245_v29 = vmul.f32 0.01, %v5005_v16  ;;  %v5253_v8 = vmul.f32 0.01, %v5037_v17 }
 0x59d   : > { %5373 = vst.msk [vmem:[%s7113_s16 + $0x20] sm:$0xff] %vm5368_vm1, %v5308_v27  ;;  %5381 = vst.msk [vmem:[%s7113_s16 + $0x60] sm:$0xff] %vm5368_vm1, %v5316_v43  ;;  %v5309_v25 = vmax.f32 %v5005_v16, %v5245_v29  ;;  %v5317_v33 = vmax.f32 %v5037_v17, %v5253_v8 }
 0x59e   : > { %v5041_v34 = vpop.f32.mrb[16].mxu1 }
 0x59f   : > { %5374 = vst.msk [vmem:[%s7113_s16 + $0x28] sm:$0xff] %vm5368_vm1, %v5309_v25  ;;  %5382 = vst.msk [vmem:[%s7113_s16 + $0x68] sm:$0xff] %vm5368_vm1, %v5317_v33  ;;  %v5042_v35 = vadd.f32 %v7102_v1, %v5041_v34  ;;  %v5043_v37 = vpop.f32.mrb[17].mxu1 }
 0x5a0   : > { %v5044_v40 = vpop.f32.mrb[18].mxu1 }
 0x5a1   : > { %v5254_v0 = vmul.f32 0.01, %v5042_v35  ;;  %v5045_v38 = vadd.f32 %v7102_v1, %v5044_v40  ;;  %v5046_v39 = vpop.f32.mrb[19].mxu1 }
 0x5a3   : > { %v5318_v41 = vmax.f32 %v5042_v35, %v5254_v0  ;;  %v5255_v42 = vmul.f32 0.01, %v5045_v38 }
 0x5a5   : > { %5383 = vst.msk [vmem:[%s7113_s16 + $0x70] sm:$0xff] %vm5368_vm1, %v5318_v41  ;;  %v5319_v49 = vmax.f32 %v5045_v38, %v5255_v42 }
 0x5a6   : > { %v5049_v44 = vpop.f32.mrb[20].mxu1 }
 0x5a7   : > { %5384 = vst.msk [vmem:[%s7113_s16 + $0x78] sm:$0xff] %vm5368_vm1, %v5319_v49  ;;  %v5050_v45 = vadd.f32 %v7102_v1, %v5049_v44  ;;  %v5051_v46 = vpop.f32.mrb[21].mxu1 }
 0x5a8   : > { %v5052_v36 = vpop.f32.mrb[22].mxu1 }
 0x5a9   : > { %v5256_v47 = vmul.f32 0.01, %v5050_v45  ;;  %v5053_v48 = vadd.f32 %v7102_v1, %v5052_v36  ;;  %v5054_v51 = vpop.f32.mrb[23].mxu1 }
 0x5ab   : > { %v5320_v53 = vmax.f32 %v5050_v45, %v5256_v47  ;;  %v5257_v31 = vmul.f32 0.01, %v5053_v48 }
 0x5ad   : > { %5385 = vst.msk [vmem:[%s7113_s16 + $0x80] sm:$0xff] %vm5368_vm1, %v5320_v53  ;;  %v5321_v54 = vmax.f32 %v5053_v48, %v5257_v31 }
 0x5ae   : > { %v5057_v56 = vpop.f32.mrb[24].mxu1 }
 0x5af   : > { %5386 = vst.msk [vmem:[%s7113_s16 + $0x88] sm:$0xff] %vm5368_vm1, %v5321_v54  ;;  %v5058_v58 = vadd.f32 %v7102_v1, %v5057_v56  ;;  %v5059_v21 = vpop.f32.mrb[25].mxu1 }
 0x5b0   : > { %v5060_v59 = vpop.f32.mrb[26].mxu1 }
 0x5b1   : > { %v5258_v60 = vmul.f32 0.01, %v5058_v58  ;;  %v5061_v23 = vadd.f32 %v7102_v1, %v5060_v59  ;;  %v5062_v61 = vpop.f32.mrb[27].mxu1 }
 0x5b3   : > { %v5322_v24 = vmax.f32 %v5058_v58, %v5258_v60  ;;  %v5259_v18 = vmul.f32 0.01, %v5061_v23 }
 0x5b5   : > { %5387 = vst.msk [vmem:[%s7113_s16 + $0x90] sm:$0xff] %vm5368_vm1, %v5322_v24  ;;  %v5323_v62 = vmax.f32 %v5061_v23, %v5259_v18 }
 0x5b6   : > { %v5065_v63 = vpop.f32.mrb[28].mxu1 }
 0x5b7   : > { %5388 = vst.msk [vmem:[%s7113_s16 + $0x98] sm:$0xff] %vm5368_vm1, %v5323_v62  ;;  %v5066_v6 = vadd.f32 %v7102_v1, %v5065_v63  ;;  %v5067_v2 = vpop.f32.mrb[29].mxu1 }
 0x5b8   : > { %v5068_v3 = vpop.f32.mrb[30].mxu1 }
 0x5b9   : > { %v5260_v32 = vmul.f32 0.01, %v5066_v6  ;;  %v5069_v22 = vadd.f32 %v7102_v1, %v5068_v3  ;;  %v5070_v4 = vpop.f32.mrb[31].mxu1 }
 0x5bb   : > { %v5324_v5 = vmax.f32 %v5066_v6, %v5260_v32  ;;  %v5261_v28 = vmul.f32 0.01, %v5069_v22 }
 0x5bd   : > { %5389 = vst.msk [vmem:[%s7113_s16 + $0xa0] sm:$0xff] %vm5368_vm1, %v5324_v5  ;;  %v5325_v19 = vmax.f32 %v5069_v22, %v5261_v28 }
 0x5be   : > { %v5073_v55 = vpop.f32.mrb[32].mxu1 }
 0x5bf   : > { %5390 = vst.msk [vmem:[%s7113_s16 + $0xa8] sm:$0xff] %vm5368_vm1, %v5325_v19  ;;  %v5074_v7 = vadd.f32 %v7102_v1, %v5073_v55  ;;  %v5075_v9 = vpop.f32.mrb[33].mxu1 }
 0x5c0   : > { %v5076_v26 = vpop.f32.mrb[34].mxu1 }
 0x5c1   : > { %v5262_v11 = vmul.f32 0.01, %v5074_v7  ;;  %v5077_v10 = vadd.f32 %v7102_v1, %v5076_v26  ;;  %v5078_v12 = vpop.f32.mrb[35].mxu1 }
 0x5c3   : > { %v5326_v13 = vmax.f32 %v5074_v7, %v5262_v11  ;;  %v5263_v50 = vmul.f32 0.01, %v5077_v10 }
 0x5c5   : > { %5391 = vst.msk [vmem:[%s7113_s16 + $0xb0] sm:$0xff] %vm5368_vm1, %v5326_v13  ;;  %v5327_v57 = vmax.f32 %v5077_v10, %v5263_v50 }
 0x5c6   : > { %v5081_v14 = vpop.f32.mrb[36].mxu1 }
 0x5c7   : > { %5392 = vst.msk [vmem:[%s7113_s16 + $0xb8] sm:$0xff] %vm5368_vm1, %v5327_v57  ;;  %v5082_v52 = vadd.f32 %v7102_v1, %v5081_v14  ;;  %v5083_v15 = vpop.f32.mrb[37].mxu1 }
 0x5c8   : > { %v5084_v16 = vpop.f32.mrb[38].mxu1 }
 0x5c9   : > { %v5264_v17 = vmul.f32 0.01, %v5082_v52  ;;  %v5085_v20 = vadd.f32 %v7102_v1, %v5084_v16  ;;  %v5086_v30 = vpop.f32.mrb[39].mxu1 }
 0x5cb   : > { %v5328_v27 = vmax.f32 %v5082_v52, %v5264_v17  ;;  %v5265_v43 = vmul.f32 0.01, %v5085_v20 }
 0x5cd   : > { %5393 = vst.msk [vmem:[%s7113_s16 + $0xc0] sm:$0xff] %vm5368_vm1, %v5328_v27  ;;  %v5329_v29 = vmax.f32 %v5085_v20, %v5265_v43 }
 0x5ce   : > { %v5089_v8 = vpop.f32.mrb[40].mxu1 }
 0x5cf   : > { %5394 = vst.msk [vmem:[%s7113_s16 + $0xc8] sm:$0xff] %vm5368_vm1, %v5329_v29  ;;  %v5090_v25 = vadd.f32 %v7102_v1, %v5089_v8  ;;  %v5091_v33 = vpop.f32.mrb[41].mxu1 }
 0x5d0   : > { %v5092_v34 = vpop.f32.mrb[42].mxu1 }
 0x5d1   : > { %v5266_v35 = vmul.f32 0.01, %v5090_v25  ;;  %v5093_v37 = vadd.f32 %v7102_v1, %v5092_v34  ;;  %v5094_v40 = vpop.f32.mrb[43].mxu1 }
 0x5d3   : > { %v5330_v0 = vmax.f32 %v5090_v25, %v5266_v35  ;;  %v5267_v38 = vmul.f32 0.01, %v5093_v37 }
 0x5d5   : > { %5395 = vst.msk [vmem:[%s7113_s16 + $0xd0] sm:$0xff] %vm5368_vm1, %v5330_v0  ;;  %v5331_v39 = vmax.f32 %v5093_v37, %v5267_v38 }
 0x5d6   : > { %v5097_v41 = vpop.f32.mrb[44].mxu1 }
 0x5d7   : > { %5396 = vst.msk [vmem:[%s7113_s16 + $0xd8] sm:$0xff] %vm5368_vm1, %v5331_v39  ;;  %v5098_v42 = vadd.f32 %v7102_v1, %v5097_v41  ;;  %v5099_v49 = vpop.f32.mrb[45].mxu1 }
 0x5d8   : > { %v5100_v44 = vpop.f32.mrb[46].mxu1 }
 0x5d9   : > { %v5268_v45 = vmul.f32 0.01, %v5098_v42  ;;  %v5101_v46 = vadd.f32 %v7102_v1, %v5100_v44  ;;  %v5102_v36 = vpop.f32.mrb[47].mxu1 }
 0x5db   : > { %v5332_v47 = vmax.f32 %v5098_v42, %v5268_v45  ;;  %v5269_v48 = vmul.f32 0.01, %v5101_v46 }
 0x5dd   : > { %5397 = vst.msk [vmem:[%s7113_s16 + $0xe0] sm:$0xff] %vm5368_vm1, %v5332_v47  ;;  %v5333_v51 = vmax.f32 %v5101_v46, %v5269_v48 }
 0x5de   : > { %v5105_v53 = vpop.f32.mrb[48].mxu1 }
 0x5df   : > { %5398 = vst.msk [vmem:[%s7113_s16 + $0xe8] sm:$0xff] %vm5368_vm1, %v5333_v51  ;;  %v5106_v31 = vadd.f32 %v7102_v1, %v5105_v53  ;;  %v5107_v54 = vpop.f32.mrb[49].mxu1 }
 0x5e0   : > { %v5108_v56 = vpop.f32.mrb[50].mxu1 }
 0x5e1   : > { %v5270_v58 = vmul.f32 0.01, %v5106_v31  ;;  %v5109_v21 = vadd.f32 %v7102_v1, %v5108_v56  ;;  %v5110_v59 = vpop.f32.mrb[51].mxu1 }
 0x5e3   : > { %v5334_v60 = vmax.f32 %v5106_v31, %v5270_v58  ;;  %v5271_v23 = vmul.f32 0.01, %v5109_v21 }
 0x5e5   : > { %5399 = vst.msk [vmem:[%s7113_s16 + $0xf0] sm:$0xff] %vm5368_vm1, %v5334_v60  ;;  %v5335_v61 = vmax.f32 %v5109_v21, %v5271_v23 }
 0x5e6   : > { %v5113_v24 = vpop.f32.mrb[52].mxu1 }
 0x5e7   : > { %5400 = vst.msk [vmem:[%s7113_s16 + $0xf8] sm:$0xff] %vm5368_vm1, %v5335_v61  ;;  %v5114_v18 = vadd.f32 %v7102_v1, %v5113_v24  ;;  %v5115_v62 = vpop.f32.mrb[53].mxu1 }
 0x5e8   : > { %v5116_v63 = vpop.f32.mrb[54].mxu1 }
 0x5e9   : > { %v5272_v6 = vmul.f32 0.01, %v5114_v18  ;;  %v5117_v2 = vadd.f32 %v7102_v1, %v5116_v63  ;;  %v5118_v3 = vpop.f32.mrb[55].mxu1 }
 0x5eb   : > { %v5336_v32 = vmax.f32 %v5114_v18, %v5272_v6  ;;  %v5273_v22 = vmul.f32 0.01, %v5117_v2 }
 0x5ed   : > { %5401 = vst.msk [vmem:[%s7113_s16 + $0x100] sm:$0xff] %vm5368_vm1, %v5336_v32  ;;  %v5337_v4 = vmax.f32 %v5117_v2, %v5273_v22 }
 0x5ee   : > { %v5121_v5 = vpop.f32.mrb[56].mxu1 }
 0x5ef   : > { %5402 = vst.msk [vmem:[%s7113_s16 + $0x108] sm:$0xff] %vm5368_vm1, %v5337_v4  ;;  %v5122_v28 = vadd.f32 %v7102_v1, %v5121_v5  ;;  %v5123_v19 = vpop.f32.mrb[57].mxu1 }
 0x5f0   : > { %v5124_v55 = vpop.f32.mrb[58].mxu1 }
 0x5f1   : > { %v5274_v7 = vmul.f32 0.01, %v5122_v28  ;;  %v5125_v9 = vadd.f32 %v7102_v1, %v5124_v55  ;;  %v5126_v26 = vpop.f32.mrb[59].mxu1 }
 0x5f3   : > { %v5338_v11 = vmax.f32 %v5122_v28, %v5274_v7  ;;  %v5275_v10 = vmul.f32 0.01, %v5125_v9 }
 0x5f5   : > { %5403 = vst.msk [vmem:[%s7113_s16 + $0x110] sm:$0xff] %vm5368_vm1, %v5338_v11  ;;  %v5339_v12 = vmax.f32 %v5125_v9, %v5275_v10 }
 0x5f6   : > { %v5129_v13 = vpop.f32.mrb[60].mxu1 }
 0x5f7   : > { %5404 = vst.msk [vmem:[%s7113_s16 + $0x118] sm:$0xff] %vm5368_vm1, %v5339_v12  ;;  %v5130_v50 = vadd.f32 %v7102_v1, %v5129_v13  ;;  %v5131_v57 = vpop.f32.mrb[61].mxu1 }
 0x5f8   : > { %v5132_v14 = vpop.f32.mrb[62].mxu1 }
 0x5f9   : > { %v5276_v52 = vmul.f32 0.01, %v5130_v50  ;;  %v5133_v15 = vadd.f32 %v7102_v1, %v5132_v14  ;;  %v5134_v16 = vpop.f32.mrb[63].mxu1 }
 0x5fb   : > { %v5340_v17 = vmax.f32 %v5130_v50, %v5276_v52  ;;  %v5277_v20 = vmul.f32 0.01, %v5133_v15 }
 0x5fd   : > { %5405 = vst.msk [vmem:[%s7113_s16 + $0x120] sm:$0xff] %vm5368_vm1, %v5340_v17  ;;  %v5341_v30 = vmax.f32 %v5133_v15, %v5277_v20 }
 0x5fe   : > { %v5137_v27 = vpop.f32.mrb[64].mxu1 }
 0x5ff   : > { %5406 = vst.msk [vmem:[%s7113_s16 + $0x128] sm:$0xff] %vm5368_vm1, %v5341_v30  ;;  %v5138_v43 = vadd.f32 %v7102_v1, %v5137_v27  ;;  %v5139_v29 = vpop.f32.mrb[65].mxu1 }
 0x600   : > { %v5140_v8 = vpop.f32.mrb[66].mxu1 }
 0x601   : > { %v5278_v25 = vmul.f32 0.01, %v5138_v43  ;;  %v5141_v33 = vadd.f32 %v7102_v1, %v5140_v8  ;;  %v5142_v34 = vpop.f32.mrb[67].mxu1 }
 0x603   : > { %v5342_v35 = vmax.f32 %v5138_v43, %v5278_v25  ;;  %v5279_v37 = vmul.f32 0.01, %v5141_v33 }
 0x605   : > { %5407 = vst.msk [vmem:[%s7113_s16 + $0x130] sm:$0xff] %vm5368_vm1, %v5342_v35  ;;  %v5343_v40 = vmax.f32 %v5141_v33, %v5279_v37 }
 0x606   : > { %v5145_v0 = vpop.f32.mrb[68].mxu1 }
 0x607   : > { %5408 = vst.msk [vmem:[%s7113_s16 + $0x138] sm:$0xff] %vm5368_vm1, %v5343_v40  ;;  %v5146_v38 = vadd.f32 %v7102_v1, %v5145_v0  ;;  %v5147_v39 = vpop.f32.mrb[69].mxu1 }
 0x608   : > { %v5148_v41 = vpop.f32.mrb[70].mxu1 }
 0x609   : > { %v5280_v42 = vmul.f32 0.01, %v5146_v38  ;;  %v5149_v49 = vadd.f32 %v7102_v1, %v5148_v41  ;;  %v5150_v44 = vpop.f32.mrb[71].mxu1 }
 0x60b   : > { %v5344_v45 = vmax.f32 %v5146_v38, %v5280_v42  ;;  %v5281_v46 = vmul.f32 0.01, %v5149_v49 }
 0x60d   : > { %5409 = vst.msk [vmem:[%s7113_s16 + $0x140] sm:$0xff] %vm5368_vm1, %v5344_v45  ;;  %v5345_v36 = vmax.f32 %v5149_v49, %v5281_v46 }
 0x60e   : > { %v5153_v47 = vpop.f32.mrb[72].mxu1 }
 0x60f   : > { %5410 = vst.msk [vmem:[%s7113_s16 + $0x148] sm:$0xff] %vm5368_vm1, %v5345_v36  ;;  %v5154_v48 = vadd.f32 %v7102_v1, %v5153_v47  ;;  %v5155_v51 = vpop.f32.mrb[73].mxu1 }
 0x610   : > { %v5156_v53 = vpop.f32.mrb[74].mxu1 }
 0x611   : > { %v5282_v31 = vmul.f32 0.01, %v5154_v48  ;;  %v5157_v54 = vadd.f32 %v7102_v1, %v5156_v53  ;;  %v5158_v56 = vpop.f32.mrb[75].mxu1 }
 0x613   : > { %v5346_v58 = vmax.f32 %v5154_v48, %v5282_v31  ;;  %v5283_v21 = vmul.f32 0.01, %v5157_v54 }
 0x615   : > { %5411 = vst.msk [vmem:[%s7113_s16 + $0x150] sm:$0xff] %vm5368_vm1, %v5346_v58  ;;  %v5347_v59 = vmax.f32 %v5157_v54, %v5283_v21 }
 0x616   : > { %v5161_v60 = vpop.f32.mrb[76].mxu1 }
 0x617   : > { %5412 = vst.msk [vmem:[%s7113_s16 + $0x158] sm:$0xff] %vm5368_vm1, %v5347_v59  ;;  %v5162_v23 = vadd.f32 %v7102_v1, %v5161_v60  ;;  %v5163_v61 = vpop.f32.mrb[77].mxu1 }
 0x618   : > { %v5164_v24 = vpop.f32.mrb[78].mxu1 }
 0x619   : > { %v5284_v18 = vmul.f32 0.01, %v5162_v23  ;;  %v5165_v62 = vadd.f32 %v7102_v1, %v5164_v24  ;;  %v5166_v63 = vpop.f32.mrb[79].mxu1 }
 0x61b   : > { %v5348_v6 = vmax.f32 %v5162_v23, %v5284_v18  ;;  %v5285_v2 = vmul.f32 0.01, %v5165_v62 }
 0x61d   : > { %5413 = vst.msk [vmem:[%s7113_s16 + $0x160] sm:$0xff] %vm5368_vm1, %v5348_v6  ;;  %v5349_v3 = vmax.f32 %v5165_v62, %v5285_v2 }
 0x61e   : > { %v5169_v32 = vpop.f32.mrb[80].mxu1 }
 0x61f   : > { %5414 = vst.msk [vmem:[%s7113_s16 + $0x168] sm:$0xff] %vm5368_vm1, %v5349_v3  ;;  %v5170_v22 = vadd.f32 %v7102_v1, %v5169_v32  ;;  %v5171_v4 = vpop.f32.mrb[81].mxu1 }
 0x620   : > { %v5172_v5 = vpop.f32.mrb[82].mxu1 }
 0x621   : > { %v5286_v28 = vmul.f32 0.01, %v5170_v22  ;;  %v5173_v19 = vadd.f32 %v7102_v1, %v5172_v5  ;;  %v5174_v55 = vpop.f32.mrb[83].mxu1 }
 0x623   : > { %v5350_v7 = vmax.f32 %v5170_v22, %v5286_v28  ;;  %v5287_v9 = vmul.f32 0.01, %v5173_v19 }
 0x625   : > { %5415 = vst.msk [vmem:[%s7113_s16 + $0x170] sm:$0xff] %vm5368_vm1, %v5350_v7  ;;  %v5351_v26 = vmax.f32 %v5173_v19, %v5287_v9 }
 0x626   : > { %v5177_v11 = vpop.f32.mrb[84].mxu1 }
 0x627   : > { %5416 = vst.msk [vmem:[%s7113_s16 + $0x178] sm:$0xff] %vm5368_vm1, %v5351_v26  ;;  %v5178_v10 = vadd.f32 %v7102_v1, %v5177_v11  ;;  %v5179_v12 = vpop.f32.mrb[85].mxu1 }
 0x628   : > { %v5180_v13 = vpop.f32.mrb[86].mxu1 }
 0x629   : > { %v5288_v50 = vmul.f32 0.01, %v5178_v10  ;;  %v5181_v57 = vadd.f32 %v7102_v1, %v5180_v13  ;;  %v5182_v14 = vpop.f32.mrb[87].mxu1 }
 0x62b   : > { %v5352_v52 = vmax.f32 %v5178_v10, %v5288_v50  ;;  %v5289_v15 = vmul.f32 0.01, %v5181_v57 }
 0x62d   : > { %5417 = vst.msk [vmem:[%s7113_s16 + $0x180] sm:$0xff] %vm5368_vm1, %v5352_v52  ;;  %v5353_v16 = vmax.f32 %v5181_v57, %v5289_v15 }
 0x62e   : > { %v5185_v17 = vpop.f32.mrb[88].mxu1 }
 0x62f   : > { %5418 = vst.msk [vmem:[%s7113_s16 + $0x188] sm:$0xff] %vm5368_vm1, %v5353_v16  ;;  %v5186_v20 = vadd.f32 %v7102_v1, %v5185_v17  ;;  %v5187_v30 = vpop.f32.mrb[89].mxu1 }
 0x630   : > { %v5188_v27 = vpop.f32.mrb[90].mxu1 }
 0x631   : > { %v5290_v43 = vmul.f32 0.01, %v5186_v20  ;;  %v5189_v29 = vadd.f32 %v7102_v1, %v5188_v27  ;;  %v5190_v8 = vpop.f32.mrb[91].mxu1 }
 0x633   : > { %v5354_v25 = vmax.f32 %v5186_v20, %v5290_v43  ;;  %v5291_v33 = vmul.f32 0.01, %v5189_v29 }
 0x635   : > { %5419 = vst.msk [vmem:[%s7113_s16 + $0x190] sm:$0xff] %vm5368_vm1, %v5354_v25  ;;  %v5355_v34 = vmax.f32 %v5189_v29, %v5291_v33 }
 0x636   : > { %v5193_v35 = vpop.f32.mrb[92].mxu1 }
 0x637   : > { %5420 = vst.msk [vmem:[%s7113_s16 + $0x198] sm:$0xff] %vm5368_vm1, %v5355_v34  ;;  %v5194_v37 = vadd.f32 %v7102_v1, %v5193_v35  ;;  %v5195_v40 = vpop.f32.mrb[93].mxu1 }
 0x638   : > { %v5196_v0 = vpop.f32.mrb[94].mxu1 }
 0x639   : > { %v5292_v38 = vmul.f32 0.01, %v5194_v37  ;;  %v5197_v39 = vadd.f32 %v7102_v1, %v5196_v0  ;;  %v5198_v41 = vpop.f32.mrb[95].mxu1 }
 0x63b   : > { %v5356_v42 = vmax.f32 %v5194_v37, %v5292_v38  ;;  %v5293_v49 = vmul.f32 0.01, %v5197_v39 }
 0x63d   : > { %5421 = vst.msk [vmem:[%s7113_s16 + $0x1a0] sm:$0xff] %vm5368_vm1, %v5356_v42  ;;  %v5357_v44 = vmax.f32 %v5197_v39, %v5293_v49 }
 0x63e   : > { %v5201_v45 = vpop.f32.mrb[96].mxu1 }
 0x63f   : > { %5422 = vst.msk [vmem:[%s7113_s16 + $0x1a8] sm:$0xff] %vm5368_vm1, %v5357_v44  ;;  %v5202_v46 = vadd.f32 %v7102_v1, %v5201_v45  ;;  %v5203_v36 = vpop.f32.mrb[97].mxu1 }
 0x640   : > { %v5204_v47 = vpop.f32.mrb[98].mxu1 }
 0x641   : > { %v5294_v48 = vmul.f32 0.01, %v5202_v46  ;;  %v5205_v51 = vadd.f32 %v7102_v1, %v5204_v47  ;;  %v5206_v53 = vpop.f32.mrb[99].mxu1 }
 0x643   : > { %v5358_v31 = vmax.f32 %v5202_v46, %v5294_v48  ;;  %v5295_v54 = vmul.f32 0.01, %v5205_v51 }
 0x645   : > { %5423 = vst.msk [vmem:[%s7113_s16 + $0x1b0] sm:$0xff] %vm5368_vm1, %v5358_v31  ;;  %v5359_v56 = vmax.f32 %v5205_v51, %v5295_v54 }
 0x646   : > { %v5209_v58 = vpop.f32.mrb[100].mxu1 }
 0x647   : > { %5424 = vst.msk [vmem:[%s7113_s16 + $0x1b8] sm:$0xff] %vm5368_vm1, %v5359_v56  ;;  %v5210_v21 = vadd.f32 %v7102_v1, %v5209_v58  ;;  %v5211_v59 = vpop.f32.mrb[101].mxu1 }
 0x648   : > { %v5212_v60 = vpop.f32.mrb[102].mxu1 }
 0x649   : > { %v5296_v23 = vmul.f32 0.01, %v5210_v21  ;;  %v5213_v61 = vadd.f32 %v7102_v1, %v5212_v60  ;;  %v5214_v24 = vpop.f32.mrb[103].mxu1 }
 0x64b   : > { %v5360_v18 = vmax.f32 %v5210_v21, %v5296_v23  ;;  %v5297_v62 = vmul.f32 0.01, %v5213_v61 }
 0x64d   : > { %5425 = vst.msk [vmem:[%s7113_s16 + $0x1c0] sm:$0xff] %vm5368_vm1, %v5360_v18  ;;  %v5361_v63 = vmax.f32 %v5213_v61, %v5297_v62 }
 0x64e   : > { %v5217_v6 = vpop.f32.mrb[104].mxu1 }
 0x64f   : > { %5426 = vst.msk [vmem:[%s7113_s16 + $0x1c8] sm:$0xff] %vm5368_vm1, %v5361_v63  ;;  %v5218_v2 = vadd.f32 %v7102_v1, %v5217_v6  ;;  %v5219_v3 = vpop.f32.mrb[105].mxu1 }
 0x650   : > { %v5220_v32 = vpop.f32.mrb[106].mxu1 }
 0x651   : > { %v5298_v22 = vmul.f32 0.01, %v5218_v2  ;;  %v5221_v4 = vadd.f32 %v7102_v1, %v5220_v32  ;;  %v5222_v5 = vpop.f32.mrb[107].mxu1 }
 0x653   : > { %v5362_v28 = vmax.f32 %v5218_v2, %v5298_v22  ;;  %v5299_v19 = vmul.f32 0.01, %v5221_v4 }
 0x655   : > { %5427 = vst.msk [vmem:[%s7113_s16 + $0x1d0] sm:$0xff] %vm5368_vm1, %v5362_v28  ;;  %v5363_v55 = vmax.f32 %v5221_v4, %v5299_v19 }
 0x656   : > { %v5225_v7 = vpop.f32.mrb[108].mxu1 }
 0x657   : > { %5428 = vst.msk [vmem:[%s7113_s16 + $0x1d8] sm:$0xff] %vm5368_vm1, %v5363_v55  ;;  %v5226_v9 = vadd.f32 %v7102_v1, %v5225_v7  ;;  %v5227_v26 = vpop.f32.mrb[109].mxu1 }
 0x658   : > { %v5228_v11 = vpop.f32.mrb[110].mxu1 }
 0x659   : > { %v5300_v10 = vmul.f32 0.01, %v5226_v9  ;;  %v5229_v12 = vadd.f32 %v7102_v1, %v5228_v11  ;;  %v5230_v13 = vpop.f32.mrb[111].mxu1 }
 0x65b   : > { %v5364_v50 = vmax.f32 %v5226_v9, %v5300_v10  ;;  %v5301_v57 = vmul.f32 0.01, %v5229_v12 }
 0x65d   : > { %5429 = vst.msk [vmem:[%s7113_s16 + $0x1e0] sm:$0xff] %vm5368_vm1, %v5364_v50  ;;  %v5365_v14 = vmax.f32 %v5229_v12, %v5301_v57 }
 0x65e   : > { %v5233_v52 = vpop.f32.mrb[112].mxu1 }
 0x65f   : > { %5430 = vst.msk [vmem:[%s7113_s16 + $0x1e8] sm:$0xff] %vm5368_vm1, %v5365_v14  ;;  %v5234_v15 = vadd.f32 %v7102_v1, %v5233_v52  ;;  %v5235_v16 = vpop.f32.mrb[113].mxu1 }
 0x660   : > { %v5236_v17 = vpop.f32.mrb[114].mxu1 }
 0x661   : > { %v5302_v20 = vmul.f32 0.01, %v5234_v15  ;;  %v5237_v30 = vadd.f32 %v7102_v1, %v5236_v17  ;;  %v5238_v27 = vpop.f32.mrb[115].mxu1 }
 0x663   : > { %v5366_v43 = vmax.f32 %v5234_v15, %v5302_v20  ;;  %v5303_v29 = vmul.f32 0.01, %v5237_v30 }
 0x665   : > { %5431 = vst.msk [vmem:[%s7113_s16 + $0x1f0] sm:$0xff] %vm5368_vm1, %v5366_v43  ;;  %v5367_v8 = vmax.f32 %v5237_v30, %v5303_v29 }
 0x667   : > { %5432 = vst.msk [vmem:[%s7113_s16 + $0x1f8] sm:$0xff] %vm5368_vm1, %v5367_v8 }
 0x668 PF: > { %s17_s21 = sadd.s32 1, %s6069_s21  }
 0x669   : > { %p14_p3 = scmp.ge.s32.totalorder %s17_s21, 4  }
 0x66b   :  { %16 = sbr.rel (!%p14_p3) target bundleno = 1 (0x1), region = 86 }
 0x672   :  { %5455 = vsyncpa [#allocation3], 1 }
 0x673   :  { %5457 = vsyncpa [#allocation3 + $0x1], 1 }

</bundles_post_ra>
